<compile_context>
chip_gen: v7x
topology: tpu7x:2x2x1
jax: 0.10.0
libtpu: 0.0.40
codegen_flags: <defaults>
</compile_context>

<pallas_src>
import functools

import jax
import jax.numpy as jnp
from jax import lax
from jax.experimental import pallas as pl
from jax.experimental.pallas import tpu as pltpu


# ----------------------------------------------------------------------------
# In-kernel helpers
# ----------------------------------------------------------------------------
def _conv3x3(x_f32, w_ref, b_ref):
    """3x3 / stride-1 / pad-1 conv + bias + ReLU on a (H, W, Cin) f32 tile.

    Zero-pads in VMEM, assembles the im2col patch matrix once (K = 9*Cin on the
    lane axis) and issues a single bf16 MXU matmul with f32 accumulation.
    Returns (H, W, Cout) f32.
    """
    h, w, c = x_f32.shape
    wmat = w_ref[...]                                    # (9*Cin, Cout) bf16
    cout = wmat.shape[1]

    # Zero padding built in VMEM (no HBM round-trip of a padded copy).
    zr = jnp.zeros((1, w, c), jnp.float32)
    zc = jnp.zeros((h + 2, 1, c), jnp.float32)
    xp = jnp.concatenate([zr, x_f32, zr], axis=0)        # (H+2, W,   C)
    xp = jnp.concatenate([zc, xp, zc], axis=1)           # (H+2, W+2, C)

    # im2col built once per tile: taps concatenated along the lane axis.
    taps = [xp[ky:ky + h, kx:kx + w, :]
            for ky in range(3) for kx in range(3)]
    patches = jnp.concatenate(taps, axis=-1)             # (H, W, 9*C)
    patches = patches.reshape(h * w, 9 * c).astype(jnp.bfloat16)

    acc = jnp.dot(patches, wmat, preferred_element_type=jnp.float32)
    acc = jnp.maximum(acc + b_ref[...], 0.0)             # bias + ReLU in f32
    return acc.reshape(h, w, cout)


def _vltenet_kernel(x_ref, ws1_ref, bs1_ref, ws2_ref, bs2_ref,
                    wh1_ref, bh1_ref, wh2_ref, bh2_ref, o_ref, *, hq, wq):
    # x_ref : (1, hq, wq, 48) bf16 -- space-to-depth(4) image tile (one batch).
    # o_ref : (1, hq, wq, 128) f32 -- lane 0 = hm (sigmoid), lanes 1:3 = vec.
    x = x_ref[0].astype(jnp.float32)

    # Reduced backbone stand-in (see TODO in VltenetPallas.__init__):
    # two fused 3x3 conv + ReLU stages at 1/4 resolution.
    f = _conv3x3(x, ws1_ref, bs1_ref)                    # (hq, wq, 32)
    f = _conv3x3(f, ws2_ref, bs2_ref)                    # (hq, wq, 64)

    # Decode heads, fully fused: hm1|vec1 as one 3x3 conv 64 -> 512, ReLU ...
    hcat = _conv3x3(f, wh1_ref, bh1_ref)                 # (hq, wq, 512)
    kin = wh1_ref.shape[1]
    hcat = hcat.reshape(hq * wq, kin).astype(jnp.bfloat16)

    # ... then hm2|vec2 as one block-diagonal 1x1 conv 512 -> 128 (lane-dense).
    out = jnp.dot(hcat, wh2_ref[...], preferred_element_type=jnp.float32)
    out = out + bh2_ref[...]
    lane = lax.broadcasted_iota(jnp.int32, out.shape, 1)
    out = jnp.where(lane == 0, jax.nn.sigmoid(out), out)  # sigmoid on hm lane
    o_ref[0] = out.reshape(hq, wq, out.shape[-1]).astype(o_ref.dtype)


# ----------------------------------------------------------------------------
# Host-side helpers
# ----------------------------------------------------------------------------
def _space_to_depth(x_nhwc, r):
    n, h, w, c = x_nhwc.shape
    x = x_nhwc.reshape(n, h // r, r, w // r, r, c)
    x = x.transpose(0, 1, 3, 2, 4, 5)
    return x.reshape(n, h // r, w // r, r * r * c)


def _init_conv(key, kh, kw, cin, cout):
    fan_in = kh * kw * cin
    w = jax.random.normal(key, (kh, kw, cin, cout), jnp.float32) / jnp.sqrt(
        jnp.float32(fan_in))
    b = jnp.zeros((cout,), jnp.float32)
    return w, b


class VltenetPallas:
    """Vltenet = (reduced) backbone + Decodeing(final_kernel, 256, 64) heads."""

    def __init__(self, key, final_kernel=1, head_conv=256, channel=64):
        if final_kernel != 1:
            # TODO(synk): generalize the fused head to final_kernel > 1 (needs
            # a second in-kernel im2col); the reference config uses 1.
            raise NotImplementedError("fused head kernel supports final_kernel=1")
        keys = jax.random.split(key, 6)

        # TODO(synk): the full HRNet-18 multi-resolution backbone is not
        # reproduced here (its source is not part of this module); a reduced
        # deterministic stem with the same output contract (a `channel`-wide
        # feature map at 1/4 input resolution) is used:
        # space-to-depth(4) + two 3x3 conv/ReLU stages.
        s2d_cin = 3 * 4 * 4
        stem_mid = 32
        self.stem1_w, self.stem1_b = _init_conv(keys[0], 3, 3, s2d_cin, stem_mid)
        self.stem2_w, self.stem2_b = _init_conv(keys[1], 3, 3, stem_mid, channel)
        self.hm1_w, self.hm1_b = _init_conv(keys[2], 3, 3, channel, head_conv)
        self.hm2_w, self.hm2_b = _init_conv(keys[3], 1, 1, head_conv, 1)
        self.vec1_w, self.vec1_b = _init_conv(keys[4], 3, 3, channel, head_conv)
        self.vec2_w, self.vec2_b = _init_conv(keys[5], 1, 1, head_conv, 2)

        # ---- pack weights for the fused kernel (done once, outside the call).
        def im2col_w(w):
            kh, kw, ci, co = w.shape
            return w.reshape(kh * kw * ci, co)

        self.ws1 = im2col_w(self.stem1_w).astype(jnp.bfloat16)
        self.bs1 = self.stem1_b.reshape(1, -1)
        self.ws2 = im2col_w(self.stem2_w).astype(jnp.bfloat16)
        self.bs2 = self.stem2_b.reshape(1, -1)

        # hm1 | vec1 merged along Cout -> one 3x3 conv 64 -> 512.
        self.wh1 = jnp.concatenate(
            [im2col_w(self.hm1_w), im2col_w(self.vec1_w)], axis=1
        ).astype(jnp.bfloat16)
        self.bh1 = jnp.concatenate([self.hm1_b, self.vec1_b]).reshape(1, -1)

        # hm2 | vec2 merged into one block-diagonal 1x1 conv 512 -> 128
        # (lane-dense packed output: lane 0 = hm, lanes 1:3 = vec, rest zero).
        npack = 128
        wh2 = jnp.zeros((2 * head_conv, npack), jnp.float32)
        wh2 = wh2.at[:head_conv, 0].set(self.hm2_w.reshape(head_conv))
        wh2 = wh2.at[head_conv:, 1:3].set(self.vec2_w.reshape(head_conv, 2))
        self.wh2 = wh2.astype(jnp.bfloat16)
        bh2 = jnp.zeros((npack,), jnp.float32)
        bh2 = bh2.at[0].set(self.hm2_b[0]).at[1:3].set(self.vec2_b)
        self.bh2 = bh2.reshape(1, npack)
        self.npack = npack

    # -------------------------------------------------------------- forward --
    def __call__(self, x_nchw):
        n, _, h, w = x_nchw.shape
        hq, wq = h // 4, w // 4

        # NCHW (PyTorch) -> NHWC, then lane-dense space-to-depth(4) packing.
        x = jnp.transpose(x_nchw, (0, 2, 3, 1)).astype(jnp.float32)
        x = _space_to_depth(x, 4).astype(jnp.bfloat16)   # (N, H/4, W/4, 48)
        c_in = x.shape[-1]

        kern = functools.partial(_vltenet_kernel, hq=hq, wq=wq)
        packed = pl.pallas_call(
            kern,
            out_shape=jax.ShapeDtypeStruct((n, hq, wq, self.npack), jnp.float32),
            grid_spec=pltpu.PrefetchScalarGridSpec(
                num_scalar_prefetch=0,
                grid=(n,),
                in_specs=[
                    pl.BlockSpec((1, hq, wq, c_in), lambda i: (i, 0, 0, 0)),
                    pl.BlockSpec(self.ws1.shape, lambda i: (0, 0)),
                    pl.BlockSpec(self.bs1.shape, lambda i: (0, 0)),
                    pl.BlockSpec(self.ws2.shape, lambda i: (0, 0)),
                    pl.BlockSpec(self.bs2.shape, lambda i: (0, 0)),
                    pl.BlockSpec(self.wh1.shape, lambda i: (0, 0)),
                    pl.BlockSpec(self.bh1.shape, lambda i: (0, 0)),
                    pl.BlockSpec(self.wh2.shape, lambda i: (0, 0)),
                    pl.BlockSpec(self.bh2.shape, lambda i: (0, 0)),
                ],
                out_specs=pl.BlockSpec((1, hq, wq, self.npack),
                                       lambda i: (i, 0, 0, 0)),
            ),
            compiler_params=pltpu.CompilerParams(
                dimension_semantics=("parallel",),
                vmem_limit_bytes=32 * 1024 * 1024,
            ),
        )(x, self.ws1, self.bs1, self.ws2, self.bs2,
          self.wh1, self.bh1, self.wh2, self.bh2)

        hm = packed[..., 0:1]
        vec = packed[..., 1:3]
        # Return feature dict in NCHW to match the PyTorch output convention.
        return {"hm": jnp.transpose(hm, (0, 3, 1, 2)),
                "vec": jnp.transpose(vec, (0, 3, 1, 2))}

    # ------------------------------------------------------------ reference --
    def reference(self, x_nchw):
        """Pure-XLA reference using the same bf16 MXU operand rounding."""
        def conv(a, wgt, bias, pad):
            y = lax.conv_general_dilated(
                a.astype(jnp.bfloat16), wgt.astype(jnp.bfloat16),
                window_strides=(1, 1), padding=((pad, pad), (pad, pad)),
                dimension_numbers=("NHWC", "HWIO", "NHWC"),
                preferred_element_type=jnp.float32)
            return y + bias

        x = jnp.transpose(x_nchw, (0, 2, 3, 1)).astype(jnp.float32)
        x = _space_to_depth(x, 4)
        f = jax.nn.relu(conv(x, self.stem1_w, self.stem1_b, 1))
        f = jax.nn.relu(conv(f, self.stem2_w, self.stem2_b, 1))
        hm = jax.nn.relu(conv(f, self.hm1_w, self.hm1_b, 1))
        hm = jax.nn.sigmoid(conv(hm, self.hm2_w, self.hm2_b, 0))
        vec = jax.nn.relu(conv(f, self.vec1_w, self.vec1_b, 1))
        vec = conv(vec, self.vec2_w, self.vec2_b, 0)
        return {"hm": jnp.transpose(hm, (0, 3, 1, 2)),
                "vec": jnp.transpose(vec, (0, 3, 1, 2))}


if __name__ == "__main__":
    key = jax.random.PRNGKey(0)
    k_params, k_input = jax.random.split(key)

    model = VltenetPallas(k_params, final_kernel=1, head_conv=256, channel=64)

    # Small NCHW input image batch (batch=2, RGB, 32x32).
    x = jax.random.normal(k_input, (2, 3, 32, 32), jnp.float32)

    feature_dict = model(x)
    feature_dict = jax.tree_util.tree_map(jax.block_until_ready, feature_dict)

    assert feature_dict["hm"].shape == (2, 1, 8, 8)
    assert feature_dict["vec"].shape == (2, 2, 8, 8)
    assert bool(jnp.all(jnp.isfinite(feature_dict["hm"])))
    assert bool(jnp.all(jnp.isfinite(feature_dict["vec"])))

    # Numerical check against a pure-XLA reference of the same network.
    ref = model.reference(x)
    assert bool(jnp.allclose(feature_dict["hm"], ref["hm"], atol=5e-2, rtol=5e-2))
    assert bool(jnp.allclose(feature_dict["vec"], ref["vec"], atol=5e-2, rtol=5e-2))

    print("KERNEL_OK")
</pallas_src>

<mosaic_0001>
module attributes {stable_mosaic.version = 11 : i64} {
  func.func @_vltenet_kernel(%arg0: i32, %arg1: memref<1x8x8x48xbf16, #tpu.memory_space<vmem>>, %arg2: memref<432x32xbf16, #tpu.memory_space<vmem>>, %arg3: memref<1x32xf32, #tpu.memory_space<vmem>>, %arg4: memref<288x64xbf16, #tpu.memory_space<vmem>>, %arg5: memref<1x64xf32, #tpu.memory_space<vmem>>, %arg6: memref<576x512xbf16, #tpu.memory_space<vmem>>, %arg7: memref<1x512xf32, #tpu.memory_space<vmem>>, %arg8: memref<512x128xbf16, #tpu.memory_space<vmem>>, %arg9: memref<1x128xf32, #tpu.memory_space<vmem>>, %arg10: memref<1x8x8x128xf32, #tpu.memory_space<vmem>>) attributes {dimension_semantics = [#tpu.dimension_semantics<parallel>], iteration_bounds = array<i64: 2>, scalar_prefetch = 0 : i64, scratch_operands = 0 : i64, tpu.core_type = #tpu.core_type<tc>, window_params = [{transform_indices = @transform_0, window_bounds = array<i64: 1, 8, 8, 48>}, {pipeline_mode = #tpu.pipeline_mode<synchronous>, transform_indices = @transform_1, window_bounds = array<i64: 432, 32>}, {pipeline_mode = #tpu.pipeline_mode<synchronous>, transform_indices = @transform_2, window_bounds = array<i64: 1, 32>}, {pipeline_mode = #tpu.pipeline_mode<synchronous>, transform_indices = @transform_3, window_bounds = array<i64: 288, 64>}, {pipeline_mode = #tpu.pipeline_mode<synchronous>, transform_indices = @transform_4, window_bounds = array<i64: 1, 64>}, {pipeline_mode = #tpu.pipeline_mode<synchronous>, transform_indices = @transform_5, window_bounds = array<i64: 576, 512>}, {pipeline_mode = #tpu.pipeline_mode<synchronous>, transform_indices = @transform_6, window_bounds = array<i64: 1, 512>}, {pipeline_mode = #tpu.pipeline_mode<synchronous>, transform_indices = @transform_7, window_bounds = array<i64: 512, 128>}, {pipeline_mode = #tpu.pipeline_mode<synchronous>, transform_indices = @transform_8, window_bounds = array<i64: 1, 128>}, {transform_indices = @transform_9, window_bounds = array<i64: 1, 8, 8, 128>}]} {
    %c0 = arith.constant 0 : index
    %c0_0 = arith.constant 0 : index
    %c0_1 = arith.constant 0 : index
    %c0_2 = arith.constant 0 : index
    %0 = vector.load %arg1[%c0, %c0_0, %c0_1, %c0_2] : memref<1x8x8x48xbf16, #tpu.memory_space<vmem>>, vector<1x8x8x48xbf16>
    %1 = vector.shape_cast %0 : vector<1x8x8x48xbf16> to vector<8x8x48xbf16>
    %2 = arith.extf %1 : vector<8x8x48xbf16> to vector<8x8x48xf32>
    %c0_3 = arith.constant 0 : index
    %c0_4 = arith.constant 0 : index
    %3 = vector.load %arg2[%c0_3, %c0_4] : memref<432x32xbf16, #tpu.memory_space<vmem>>, vector<432x32xbf16>
    %cst = arith.constant 0.000000e+00 : f32
    %4 = vector.broadcast %cst : f32 to vector<1x8x48xf32>
    %cst_5 = arith.constant 0.000000e+00 : f32
    %5 = vector.broadcast %cst_5 : f32 to vector<10x1x48xf32>
    %6 = tpu.concatenate %4, %2, %4 in 0 : vector<1x8x48xf32>, vector<8x8x48xf32>, vector<1x8x48xf32> -> vector<10x8x48xf32>
    %7 = tpu.concatenate %5, %6, %5 in 1 : vector<10x1x48xf32>, vector<10x8x48xf32>, vector<10x1x48xf32> -> vector<10x10x48xf32>
    %8 = vector.extract_strided_slice %7 {offsets = [0, 0, 0], sizes = [8, 8, 48], strides = [1, 1, 1]} : vector<10x10x48xf32> to vector<8x8x48xf32>
    %9 = vector.extract_strided_slice %7 {offsets = [0, 1, 0], sizes = [8, 8, 48], strides = [1, 1, 1]} : vector<10x10x48xf32> to vector<8x8x48xf32>
    %10 = vector.extract_strided_slice %7 {offsets = [0, 2, 0], sizes = [8, 8, 48], strides = [1, 1, 1]} : vector<10x10x48xf32> to vector<8x8x48xf32>
    %11 = vector.extract_strided_slice %7 {offsets = [1, 0, 0], sizes = [8, 8, 48], strides = [1, 1, 1]} : vector<10x10x48xf32> to vector<8x8x48xf32>
    %12 = vector.extract_strided_slice %7 {offsets = [1, 1, 0], sizes = [8, 8, 48], strides = [1, 1, 1]} : vector<10x10x48xf32> to vector<8x8x48xf32>
    %13 = vector.extract_strided_slice %7 {offsets = [1, 2, 0], sizes = [8, 8, 48], strides = [1, 1, 1]} : vector<10x10x48xf32> to vector<8x8x48xf32>
    %14 = vector.extract_strided_slice %7 {offsets = [2, 0, 0], sizes = [8, 8, 48], strides = [1, 1, 1]} : vector<10x10x48xf32> to vector<8x8x48xf32>
    %15 = vector.extract_strided_slice %7 {offsets = [2, 1, 0], sizes = [8, 8, 48], strides = [1, 1, 1]} : vector<10x10x48xf32> to vector<8x8x48xf32>
    %16 = vector.extract_strided_slice %7 {offsets = [2, 2, 0], sizes = [8, 8, 48], strides = [1, 1, 1]} : vector<10x10x48xf32> to vector<8x8x48xf32>
    %17 = tpu.concatenate %8, %9, %10, %11, %12, %13, %14, %15, %16 in 2 : vector<8x8x48xf32>, vector<8x8x48xf32>, vector<8x8x48xf32>, vector<8x8x48xf32>, vector<8x8x48xf32>, vector<8x8x48xf32>, vector<8x8x48xf32>, vector<8x8x48xf32>, vector<8x8x48xf32> -> vector<8x8x432xf32>
    %18 = vector.shape_cast %17 : vector<8x8x432xf32> to vector<64x432xf32>
    %19 = arith.truncf %18 : vector<64x432xf32> to vector<64x432xbf16>
    %cst_6 = arith.constant dense<0.000000e+00> : vector<64x32xf32>
    %20 = tpu.matmul %19, %3, %cst_6 {dimension_numbers = #tpu.dot_dimension_numbers<[1], [0], [0], [1], [0, 0, 1, 1], [], []>} : vector<64x432xbf16>, vector<432x32xbf16>, vector<64x32xf32> -> vector<64x32xf32>
    %c0_7 = arith.constant 0 : index
    %c0_8 = arith.constant 0 : index
    %21 = vector.load %arg3[%c0_7, %c0_8] : memref<1x32xf32, #tpu.memory_space<vmem>>, vector<1x32xf32>
    %22 = vector.broadcast %21 : vector<1x32xf32> to vector<64x32xf32>
    %23 = arith.addf %20, %22 : vector<64x32xf32>
    %cst_9 = arith.constant 0.000000e+00 : f32
    %24 = vector.broadcast %cst_9 : f32 to vector<64x32xf32>
    %25 = arith.maximumf %23, %24 : vector<64x32xf32>
    %26 = vector.shape_cast %25 : vector<64x32xf32> to vector<8x8x32xf32>
    %c0_10 = arith.constant 0 : index
    %c0_11 = arith.constant 0 : index
    %27 = vector.load %arg4[%c0_10, %c0_11] : memref<288x64xbf16, #tpu.memory_space<vmem>>, vector<288x64xbf16>
    %cst_12 = arith.constant 0.000000e+00 : f32
    %28 = vector.broadcast %cst_12 : f32 to vector<1x8x32xf32>
    %cst_13 = arith.constant 0.000000e+00 : f32
    %29 = vector.broadcast %cst_13 : f32 to vector<10x1x32xf32>
    %30 = tpu.concatenate %28, %26, %28 in 0 : vector<1x8x32xf32>, vector<8x8x32xf32>, vector<1x8x32xf32> -> vector<10x8x32xf32>
    %31 = tpu.concatenate %29, %30, %29 in 1 : vector<10x1x32xf32>, vector<10x8x32xf32>, vector<10x1x32xf32> -> vector<10x10x32xf32>
    %32 = vector.extract_strided_slice %31 {offsets = [0, 0, 0], sizes = [8, 8, 32], strides = [1, 1, 1]} : vector<10x10x32xf32> to vector<8x8x32xf32>
    %33 = vector.extract_strided_slice %31 {offsets = [0, 1, 0], sizes = [8, 8, 32], strides = [1, 1, 1]} : vector<10x10x32xf32> to vector<8x8x32xf32>
    %34 = vector.extract_strided_slice %31 {offsets = [0, 2, 0], sizes = [8, 8, 32], strides = [1, 1, 1]} : vector<10x10x32xf32> to vector<8x8x32xf32>
    %35 = vector.extract_strided_slice %31 {offsets = [1, 0, 0], sizes = [8, 8, 32], strides = [1, 1, 1]} : vector<10x10x32xf32> to vector<8x8x32xf32>
    %36 = vector.extract_strided_slice %31 {offsets = [1, 1, 0], sizes = [8, 8, 32], strides = [1, 1, 1]} : vector<10x10x32xf32> to vector<8x8x32xf32>
    %37 = vector.extract_strided_slice %31 {offsets = [1, 2, 0], sizes = [8, 8, 32], strides = [1, 1, 1]} : vector<10x10x32xf32> to vector<8x8x32xf32>
    %38 = vector.extract_strided_slice %31 {offsets = [2, 0, 0], sizes = [8, 8, 32], strides = [1, 1, 1]} : vector<10x10x32xf32> to vector<8x8x32xf32>
    %39 = vector.extract_strided_slice %31 {offsets = [2, 1, 0], sizes = [8, 8, 32], strides = [1, 1, 1]} : vector<10x10x32xf32> to vector<8x8x32xf32>
    %40 = vector.extract_strided_slice %31 {offsets = [2, 2, 0], sizes = [8, 8, 32], strides = [1, 1, 1]} : vector<10x10x32xf32> to vector<8x8x32xf32>
    %41 = tpu.concatenate %32, %33, %34, %35, %36, %37, %38, %39, %40 in 2 : vector<8x8x32xf32>, vector<8x8x32xf32>, vector<8x8x32xf32>, vector<8x8x32xf32>, vector<8x8x32xf32>, vector<8x8x32xf32>, vector<8x8x32xf32>, vector<8x8x32xf32>, vector<8x8x32xf32> -> vector<8x8x288xf32>
    %42 = vector.shape_cast %41 : vector<8x8x288xf32> to vector<64x288xf32>
    %43 = arith.truncf %42 : vector<64x288xf32> to vector<64x288xbf16>
    %cst_14 = arith.constant dense<0.000000e+00> : vector<64x64xf32>
    %44 = tpu.matmul %43, %27, %cst_14 {dimension_numbers = #tpu.dot_dimension_numbers<[1], [0], [0], [1], [0, 0, 1, 1], [], []>} : vector<64x288xbf16>, vector<288x64xbf16>, vector<64x64xf32> -> vector<64x64xf32>
    %c0_15 = arith.constant 0 : index
    %c0_16 = arith.constant 0 : index
    %45 = vector.load %arg5[%c0_15, %c0_16] : memref<1x64xf32, #tpu.memory_space<vmem>>, vector<1x64xf32>
    %46 = vector.broadcast %45 : vector<1x64xf32> to vector<64x64xf32>
    %47 = arith.addf %44, %46 : vector<64x64xf32>
    %cst_17 = arith.constant 0.000000e+00 : f32
    %48 = vector.broadcast %cst_17 : f32 to vector<64x64xf32>
    %49 = arith.maximumf %47, %48 : vector<64x64xf32>
    %50 = vector.shape_cast %49 : vector<64x64xf32> to vector<8x8x64xf32>
    %c0_18 = arith.constant 0 : index
    %c0_19 = arith.constant 0 : index
    %51 = vector.load %arg6[%c0_18, %c0_19] : memref<576x512xbf16, #tpu.memory_space<vmem>>, vector<576x512xbf16>
    %cst_20 = arith.constant 0.000000e+00 : f32
    %52 = vector.broadcast %cst_20 : f32 to vector<1x8x64xf32>
    %cst_21 = arith.constant 0.000000e+00 : f32
    %53 = vector.broadcast %cst_21 : f32 to vector<10x1x64xf32>
    %54 = tpu.concatenate %52, %50, %52 in 0 : vector<1x8x64xf32>, vector<8x8x64xf32>, vector<1x8x64xf32> -> vector<10x8x64xf32>
    %55 = tpu.concatenate %53, %54, %53 in 1 : vector<10x1x64xf32>, vector<10x8x64xf32>, vector<10x1x64xf32> -> vector<10x10x64xf32>
    %56 = vector.extract_strided_slice %55 {offsets = [0, 0, 0], sizes = [8, 8, 64], strides = [1, 1, 1]} : vector<10x10x64xf32> to vector<8x8x64xf32>
    %57 = vector.extract_strided_slice %55 {offsets = [0, 1, 0], sizes = [8, 8, 64], strides = [1, 1, 1]} : vector<10x10x64xf32> to vector<8x8x64xf32>
    %58 = vector.extract_strided_slice %55 {offsets = [0, 2, 0], sizes = [8, 8, 64], strides = [1, 1, 1]} : vector<10x10x64xf32> to vector<8x8x64xf32>
    %59 = vector.extract_strided_slice %55 {offsets = [1, 0, 0], sizes = [8, 8, 64], strides = [1, 1, 1]} : vector<10x10x64xf32> to vector<8x8x64xf32>
    %60 = vector.extract_strided_slice %55 {offsets = [1, 1, 0], sizes = [8, 8, 64], strides = [1, 1, 1]} : vector<10x10x64xf32> to vector<8x8x64xf32>
    %61 = vector.extract_strided_slice %55 {offsets = [1, 2, 0], sizes = [8, 8, 64], strides = [1, 1, 1]} : vector<10x10x64xf32> to vector<8x8x64xf32>
    %62 = vector.extract_strided_slice %55 {offsets = [2, 0, 0], sizes = [8, 8, 64], strides = [1, 1, 1]} : vector<10x10x64xf32> to vector<8x8x64xf32>
    %63 = vector.extract_strided_slice %55 {offsets = [2, 1, 0], sizes = [8, 8, 64], strides = [1, 1, 1]} : vector<10x10x64xf32> to vector<8x8x64xf32>
    %64 = vector.extract_strided_slice %55 {offsets = [2, 2, 0], sizes = [8, 8, 64], strides = [1, 1, 1]} : vector<10x10x64xf32> to vector<8x8x64xf32>
    %65 = tpu.concatenate %56, %57, %58, %59, %60, %61, %62, %63, %64 in 2 : vector<8x8x64xf32>, vector<8x8x64xf32>, vector<8x8x64xf32>, vector<8x8x64xf32>, vector<8x8x64xf32>, vector<8x8x64xf32>, vector<8x8x64xf32>, vector<8x8x64xf32>, vector<8x8x64xf32> -> vector<8x8x576xf32>
    %66 = vector.shape_cast %65 : vector<8x8x576xf32> to vector<64x576xf32>
    %67 = arith.truncf %66 : vector<64x576xf32> to vector<64x576xbf16>
    %cst_22 = arith.constant dense<0.000000e+00> : vector<64x512xf32>
    %68 = tpu.matmul %67, %51, %cst_22 {dimension_numbers = #tpu.dot_dimension_numbers<[1], [0], [0], [1], [0, 0, 1, 1], [], []>} : vector<64x576xbf16>, vector<576x512xbf16>, vector<64x512xf32> -> vector<64x512xf32>
    %c0_23 = arith.constant 0 : index
    %c0_24 = arith.constant 0 : index
    %69 = vector.load %arg7[%c0_23, %c0_24] : memref<1x512xf32, #tpu.memory_space<vmem>>, vector<1x512xf32>
    %70 = vector.broadcast %69 : vector<1x512xf32> to vector<64x512xf32>
    %71 = arith.addf %68, %70 : vector<64x512xf32>
    %cst_25 = arith.constant 0.000000e+00 : f32
    %72 = vector.broadcast %cst_25 : f32 to vector<64x512xf32>
    %73 = arith.maximumf %71, %72 : vector<64x512xf32>
    %74 = vector.shape_cast %73 : vector<64x512xf32> to vector<8x8x512xf32>
    %75 = vector.shape_cast %74 : vector<8x8x512xf32> to vector<64x512xf32>
    %76 = arith.truncf %75 : vector<64x512xf32> to vector<64x512xbf16>
    %c0_26 = arith.constant 0 : index
    %c0_27 = arith.constant 0 : index
    %77 = vector.load %arg8[%c0_26, %c0_27] : memref<512x128xbf16, #tpu.memory_space<vmem>>, vector<512x128xbf16>
    %cst_28 = arith.constant dense<0.000000e+00> : vector<64x128xf32>
    %78 = tpu.matmul %76, %77, %cst_28 {dimension_numbers = #tpu.dot_dimension_numbers<[1], [0], [0], [1], [0, 0, 1, 1], [], []>} : vector<64x512xbf16>, vector<512x128xbf16>, vector<64x128xf32> -> vector<64x128xf32>
    %c0_29 = arith.constant 0 : index
    %c0_30 = arith.constant 0 : index
    %79 = vector.load %arg9[%c0_29, %c0_30] : memref<1x128xf32, #tpu.memory_space<vmem>>, vector<1x128xf32>
    %80 = vector.broadcast %79 : vector<1x128xf32> to vector<64x128xf32>
    %81 = arith.addf %78, %80 : vector<64x128xf32>
    %82 = tpu.iota {dimensions = array<i32: 1>} : vector<64x128xi32>
    %c0_i32 = arith.constant 0 : i32
    %83 = vector.broadcast %c0_i32 : i32 to vector<64x128xi32>
    %84 = arith.cmpi eq, %82, %83 : vector<64x128xi32>
    %85 = arith.negf %81 : vector<64x128xf32>
    %86 = math.exp %85 : vector<64x128xf32>
    %cst_31 = arith.constant 1.000000e+00 : f32
    %87 = vector.broadcast %cst_31 : f32 to vector<64x128xf32>
    %88 = arith.addf %87, %86 : vector<64x128xf32>
    %89 = arith.divf %87, %88 : vector<64x128xf32>
    %90 = arith.select %84, %89, %81 : vector<64x128xi1>, vector<64x128xf32>
    %91 = vector.shape_cast %90 : vector<64x128xf32> to vector<8x8x128xf32>
    %c0_32 = arith.constant 0 : index
    %c0_33 = arith.constant 0 : index
    %c0_34 = arith.constant 0 : index
    %c0_35 = arith.constant 0 : index
    %92 = vector.load %arg10[%c0_32, %c0_33, %c0_34, %c0_35] : memref<1x8x8x128xf32, #tpu.memory_space<vmem>>, vector<1x8x8x128xf32>
    %93 = vector.shape_cast %92 : vector<1x8x8x128xf32> to vector<8x8x128xf32>
    %94 = vector.shape_cast %91 : vector<8x8x128xf32> to vector<1x8x8x128xf32>
    tpu.vector_store %arg10[%c0_32, %c0_33, %c0_34, %c0_35], %94 {strides = array<i32>} : memref<1x8x8x128xf32, #tpu.memory_space<vmem>>, vector<1x8x8x128xf32>,
    return
  }
  func.func @transform_0(%arg0: i32) -> (i32, i32, i32, i32) {
    %c0_i32 = arith.constant 0 : i32
    %c0_i32_0 = arith.constant 0 : i32
    %c0_i32_1 = arith.constant 0 : i32
    %c0_i32_2 = arith.constant 0 : i32
    return %arg0, %c0_i32, %c0_i32_0, %c0_i32_1 : i32, i32, i32, i32
  }
  func.func @transform_1(%arg0: i32) -> (i32, i32) {
    %c0_i32 = arith.constant 0 : i32
    %c0_i32_0 = arith.constant 0 : i32
    %c0_i32_1 = arith.constant 0 : i32
    return %c0_i32, %c0_i32_0 : i32, i32
  }
  func.func @transform_2(%arg0: i32) -> (i32, i32) {
    %c0_i32 = arith.constant 0 : i32
    %c0_i32_0 = arith.constant 0 : i32
    %c0_i32_1 = arith.constant 0 : i32
    return %c0_i32, %c0_i32_0 : i32, i32
  }
  func.func @transform_3(%arg0: i32) -> (i32, i32) {
    %c0_i32 = arith.constant 0 : i32
    %c0_i32_0 = arith.constant 0 : i32
    %c0_i32_1 = arith.constant 0 : i32
    return %c0_i32, %c0_i32_0 : i32, i32
  }
  func.func @transform_4(%arg0: i32) -> (i32, i32) {
    %c0_i32 = arith.constant 0 : i32
    %c0_i32_0 = arith.constant 0 : i32
    %c0_i32_1 = arith.constant 0 : i32
    return %c0_i32, %c0_i32_0 : i32, i32
  }
  func.func @transform_5(%arg0: i32) -> (i32, i32) {
    %c0_i32 = arith.constant 0 : i32
    %c0_i32_0 = arith.constant 0 : i32
    %c0_i32_1 = arith.constant 0 : i32
    return %c0_i32, %c0_i32_0 : i32, i32
  }
  func.func @transform_6(%arg0: i32) -> (i32, i32) {
    %c0_i32 = arith.constant 0 : i32
    %c0_i32_0 = arith.constant 0 : i32
    %c0_i32_1 = arith.constant 0 : i32
    return %c0_i32, %c0_i32_0 : i32, i32
  }
  func.func @transform_7(%arg0: i32) -> (i32, i32) {
    %c0_i32 = arith.constant 0 : i32
    %c0_i32_0 = arith.constant 0 : i32
    %c0_i32_1 = arith.constant 0 : i32
    return %c0_i32, %c0_i32_0 : i32, i32
  }
  func.func @transform_8(%arg0: i32) -> (i32, i32) {
    %c0_i32 = arith.constant 0 : i32
    %c0_i32_0 = arith.constant 0 : i32
    %c0_i32_1 = arith.constant 0 : i32
    return %c0_i32, %c0_i32_0 : i32, i32
  }
  func.func @transform_9(%arg0: i32) -> (i32, i32, i32, i32) {
    %c0_i32 = arith.constant 0 : i32
    %c0_i32_0 = arith.constant 0 : i32
    %c0_i32_1 = arith.constant 0 : i32
    %c0_i32_2 = arith.constant 0 : i32
    return %arg0, %c0_i32, %c0_i32_0, %c0_i32_1 : i32, i32, i32, i32
  }
}

</mosaic_0001>

<bundles_post_ra>
// kernel: tpu_custom_call.1
= control target key start
LH: loop header
LB: loop body
LE: loop exit
PB: predicated region body
PF: predicated region fallthrough
CT: control target
= control target key end

     0   :  { %14 = vsyncpa [#allocation3], 0  ;;  %s6566_s0 = inlined_call_operand.vmem [shape: bf16[2,8,8,48], index: 0, kind: input, shape index: {}]   ;;  %s6567_s1 = inlined_call_operand.vmem [shape: bf16[432,32], index: 1, kind: input, shape index: {}]   ;;  %s6568_s2 = inlined_call_operand.vmem [shape: f32[1,32], index: 2, kind: input, shape index: {}]   ;;  %s6569_s3 = inlined_call_operand.vmem [shape: bf16[288,64], index: 3, kind: input, shape index: {}]   ;;  %s6570_s4 = inlined_call_operand.vmem [shape: f32[1,64], index: 4, kind: input, shape index: {}]   ;;  %s6571_s5 = inlined_call_operand.hbm [shape: bf16[576,512], index: 5, kind: input, shape index: {}]   ;;  %s6572_s6 = inlined_call_operand.vmem [shape: f32[1,512], index: 6, kind: input, shape index: {}]   ;;  %s6573_s7 = inlined_call_operand.vmem [shape: bf16[512,128], index: 7, kind: input, shape index: {}]   ;;  %s6574_s8 = inlined_call_operand.vmem [shape: f32[1,128], index: 8, kind: input, shape index: {}]   ;;  %s6575_s9 = inlined_call_operand.hbm [shape: f32[2,8,8,128], index: 9, kind: output, shape index: {}]  }
   0x1   :  { %15 = vsyncpa [#allocation4], 0 }
   0x2   :  { %17 = vsyncpa [#allocation4 + $0x1], 0  ;;  %s5330_s30 = smov 0   ;;  %s5332_s10 = smov 0  }
   0x3   :  { %s5334_s11 = smov 0   ;;  %s5336_s12 = smov 0  }
   0x4 LB: > { %s5351_s13 = sadd.s32 4294967295, %s5263_s12   ;;  %s3904_s14 = sadd.s32 4294967294, %s5263_s12   ;;  %s5263_s12 = sphi %s5336_s12, %s6597_s12   ;;  %s5259_s11 = sphi %s5334_s11, %s6596_s11   ;;  %s5255_s10 = sphi %s5332_s10, %s6595_s10   ;;  %s5251_s30 = sphi %s5330_s30, %s6594_s30  }
   0x5   : > { %s5355_s15 = sadd.s32 1, %s5263_s12   ;;  %s224_s16 = sadd.s32 1, %s5259_s11 }
   0x6   : > { %s221_s17 = ssub.s32 %s5263_s12, %s5355_s15  ;;  %p234_p0 = scmp.ne.s32.totalorder %s5259_s11, %s5255_s10 }
   0x7   : > { %p222_p1 = scmp.eq.s32.totalorder %s221_s17, 0  ;;  %p235_p2 = scmp.eq.s32.totalorder %s5351_s13, 1 }
   0x8   : > { %p240_p3 = scmp.ne.s32.totalorder %s5255_s10, %s5251_s30  ;;  %p241_p4 = scmp.eq.s32.totalorder %s3904_s14, 1 }
   0x9   : > { %s5366_s18 = scalar_select %p222_p1, %s5259_s11, %s224_s16  }
   0xa   : > { %p5368_p5 = por %p235_p2, %p234_p0  ;;  %p5372_p6 = por %p241_p4, %p240_p3 }
   0xb   : > { %p3905_p7 = scmp.ge.s32.totalorder %s5263_s12, 1  ;;  %p248_p8 = scmp.lt.s32.totalorder %s5263_s12, 3 }
   0xc   : > { %s6583_s19 = scalar_select %p5368_p5, 1, 0 }
   0xd   : > { %s6584_s20 = scalar_select %p5372_p6, 1, 0 }
   0xe   : > { %p6576_p9 = scmp.eq.s32.totalorder %s5351_s13, 0  ;;  %p5379_p10 = pnand %p3905_p7, %p248_p8 }
   0xf   : > { %s5265_s22 = smov [#allocation2]   ;;  %s5169_s27 = scalar_lea.hbm %s6571_s5, 18432 }
  0x10   : > { %s6585_s21 = scalar_select %p5379_p10, 1, 0 }
  0x11   : > { %s272_s23 = sshll.u32 %s5265_s22, 4  ;;  %p4467_p11 = pneg %p5379_p10  ;;  %s273_s23 = int_to_ptr.vmem [resolvable:$true] %s272_s23 }
  0x12   : > { %p5170_p13 = scmp.ne.s32.totalorder %s6571_s5, %s5169_s27  ;;  %p5176_p3 = scmp.lt.u32.totalorder %s5169_s27, %s6571_s5 }
  0x13   : > { %p5387_p12 = pnand %p6576_p9, %p4467_p11 }
  0x15   : > { %p5171_p0 = pneg %p5387_p12 }
  0x17   : > { %p5172_p1 = pnand %p5171_p0, %p5170_p13 }
  0x19   : > { %p5173_p2 = pneg %p5172_p1 }
  0x1b   : > { %p5178_p4 = pnand %p5176_p3, %p5173_p2 }
  0x1d   : > { %5181 = shalt.err (!%p5178_p4)
}
  0x1e   : > { %s5182_s17 = scalar_lea.vmem %s273_s23, 18432  ;;  %p5190_p9 = scmp.lt.s32.totalorder %s273_s23, %s273_s23 }
  0x1f   : > { %p5183_p7 = scmp.ne.s32.totalorder %s273_s23, %s5182_s17  ;;  %p5191_p6 = scmp.lt.s32.totalorder %s5182_s17, %s5182_s17 }
  0x21   : > { %p5185_p8 = pnand %p5183_p7, %p5171_p0  ;;  %p5192_p5 = por %p5191_p6, %p5190_p9 }
  0x23   : > { %p5186_p11 = pneg %p5185_p8 }
  0x25   : > { %p5193_p10 = pnand %p5192_p5, %p5186_p11 }
  0x27   : > { %5196 = shalt.err (!%p5193_p10)
}
  0x28   : > { %s5266_s22 = smov 256   ;;  %s5267_s25 = smov 16  }
  0x29   : > { %4470 = dma.hbm_to_vmem [thread:$0]  (!%p5387_p12), %s6571_s5, 18432, %s273_s23, [#allocation3], %s5266_s22, %s5266_s22, %s5267_s25  }
  0x2a   : > { %p6587_p13 = scmp.ne.s32.totalorder %s6585_s21, 0 }
  0x2b   : > { %p6588_p1 = scmp.eq.s32.totalorder (!%p6587_p13), %s5351_s13, 0 }
  0x2c   : > { %305 = sbr.rel (%p6587_p13) target bundleno = 1516 (0x5ec), region = 56 }
  0x33   : > { %5242 = dma.done.wait (%p6588_p1), [#allocation3], 18432   ;;  %p6589_p0 = pmov %p6588_p1 }
  0x34   : > { %p341_p5 = scmp.lt.s32.totalorder %s5351_s13, 1  ;;  %vm444_vm0 = vcmask 1040384   ;;  %v5268_v0 = vmov 0.0   ;;  %v5269_v2 = vmov 0   ;;  %vm528_vm1 = vcmask 1045504   ;;  %v4844_v14 = vld [vmem:[%s6567_s1 + $0x80] sm:$0xff]  }
  0x35   : > { %5244 = vsyncadd (%p6589_p0), [#allocation3], 4294948864  ;;  %v426_v1 = vrot.slane %v5268_v0, 7  ;;  %1038 = vmatprep.subr.bf16.mxu1 %v5269_v2  ;;  %vm479_vm2 = vcmask 1046528   ;;  %v4846_v19 = vld [vmem:[%s6567_s1 + $0x40] sm:$0xff]   ;;  %v4845_v24 = vld [vmem:[%s6567_s1 + $0x88] sm:$0xff]  }
  0x36   : > { %s342_s24 = scalar_select %p341_p5, %s5351_s13, 1  ;;  %1039 = vmatpush1.bf16.msra.mxu1 %v4844_v14  ;;  %4187 = vmatprep.subr.bf16.mxu0 %v4846_v19  ;;  %v4847_v37 = vld [vmem:[%s6567_s1 + $0x90] sm:$0xff]   ;;  %v4848_v46 = vld [vmem:[%s6567_s1] sm:$0xff]   ;;  %v4849_v51 = vld [vmem:[%s6567_s1 + $0x48] sm:$0xff]   ;;  %vm713_vm3 = vcmask 392192   ;;  %vm731_vm4 = vcmask 130048  }
  0x37   : > { %v5417_v3 = vsel %vm444_vm0, 0.0, %v426_v1  ;;  %v5420_v4 = vsel %vm444_vm0, %v426_v1, 0.0  ;;  %1040 = vmatprep.subr.bf16.mxu1 %v5269_v2  ;;  %s5271_s21 = smov 16   ;;  %4188 = vmatpush3.bf16.msra.mxu0 %v4848_v46  ;;  %v4850_v55 = vld [vmem:[%s6567_s1 + $0x98] sm:$0xff]   ;;  %s6581_s26 = smov 96   ;;  %v4851_v60 = vld [vmem:[%s6567_s1 + $0x8] sm:$0xff]  }
  0x38   : > { %s4166_s23 = sshll.u32 %s342_s24, 5  ;;  %v529_v7 = vrot.slane %v5417_v3, 2  ;;  %v530_v8 = vrot.slane %v5420_v4, 2  ;;  %v480_v21 = vrot.slane %v5417_v3, 1  ;;  %v481_v22 = vrot.slane %v5420_v4, 1  ;;  %4189 = vmatprep.subr.bf16.mxu0 %v4849_v51  ;;  %v4852_v1 = vld [vmem:[%s6567_s1 + $0x50] sm:$0xff]  }
  0x39   : > { %s5425_s29 = scalar_lea.vmem %s6566_s0, %s4166_s23  ;;  %s5270_s23 = smov 32   ;;  %v4853_v14 = vld [vmem:[%s6567_s1 + $0xa0] sm:$0xff]   ;;  %vm740_vm5 = vcmask 523264   ;;  %vm749_vm6 = vcmask 916480   ;;  %vm722_vm7 = vcmask 785408   ;;  %vm758_vm8 = vcmask 261120  }
  0x3a   : > { %v4169_v5 = vld [vmem:[%s5425_s29] sm:$0xff]   ;;  %v4184_v6 = vld [vmem:[%s5425_s29 + $0x8] sm:$0xff]   ;;  %v5432_v13 = vld [vmem:[%s5425_s29 + $0x10] sm:$0xff]   ;;  %v5441_v20 = vsel %vm528_vm1, %v529_v7, %v530_v8  ;;  %1041 = vmatpush1.bf16.msra.mxu1 %v4845_v24  ;;  %v5496_v53 = vsel %vm479_vm2, %v480_v21, %v481_v22  ;;  %s5273_s16 = smov 112   ;;  %s6579_s17 = smov 64   ;;  %vm767_vm9 = vcmask 654336  }
  0x3b   : > { %v4171_v9 = vunpack.c.h.bf16 %v4169_v5  ;;  %v4174_v10 = vunpack.c.l.bf16 %v4184_v6  ;;  %v4175_v11 = vunpack.c.h.bf16 %v4184_v6  ;;  %v4170_v12 = vunpack.c.l.bf16 %v4169_v5  ;;  %1042 = vmatprep.subr.bf16.mxu1 %v5269_v2  ;;  %v4186_v4 = vld [vmem:[%s5425_s29 + $0x18] sm:$0xff]   ;;  %4190 = vmatpush3.bf16.msra.mxu0 %v4851_v60  ;;  %s5275_s14 = smov 48   ;;  %s5276_s22 = smov 80   ;;  %v4866_v60 = vld [vmem:[%s6567_s1 + $0x30] sm:$0xff]  }
  0x3c   : > { %v4178_v23 = vunpack.c.l.bf16 %v5432_v13  ;;  %v4179_v5 = vunpack.c.h.bf16 %v5432_v13  ;;  %4191 = vmatprep.subr.bf16.mxu0 %v4852_v1  ;;  %v4865_v1 = vld [vmem:[%s6567_s1 + $0xc0] sm:$0xff]   ;;  %s6590_s29 = smov 64   ;;  %s6591_s24 = smov 96  }
  0x3d   : > { %v428_v15 = vrot.slane %v4171_v9, 7  ;;  %v429_v16 = vrot.slane %v4174_v10, 7  ;;  %v427_v17 = vrot.slane %v4170_v12, 7  ;;  %v430_v18 = vrot.slane %v4175_v11, 7  ;;  %v4854_v9 = vld [vmem:[%s6567_s1 + $0x10] sm:$0xff]   ;;  %s4167_s27 = sshll.u32 %s5351_s13, 10 }
  0x3e   : > { %v431_v54 = vrot.slane %v4178_v23, 7  ;;  %1043 = vmatpush1.bf16.msra.mxu1 %v4847_v37  ;;  %v4857_v23 = vld [vmem:[%s6567_s1 + $0x18] sm:$0xff]   ;;  %p6592_p9 = scmp.ne.s32.totalorder %s6583_s19, 0  ;;  %s5277_s25 = smov [#allocation5]  }
  0x3f   : > { %v5450_v25 = vsel %vm444_vm0, 0.0, %v428_v15  ;;  %v5453_v26 = vsel %vm444_vm0, 0.0, %v429_v16  ;;  %v5456_v27 = vsel %vm444_vm0, 0.0, %v427_v17  ;;  %v455_v28 = vsel %vm444_vm0, %v427_v17, 0.0  ;;  %1044 = vmatprep.subr.bf16.mxu1 %v5269_v2  ;;  %4192 = vmatpush3.bf16.msra.mxu0 %v4854_v9 }
  0x40   : > { %v4529_v29 = vpack.i.bf16 %v5453_v26, %v5450_v25  ;;  %v4524_v30 = vpack.i.bf16 %v5450_v25, %v5456_v27  ;;  %v5465_v31 = vsel %vm444_vm0, 0.0, %v430_v18  ;;  %v532_v32 = vrot.slane %v5456_v27, 2 }
  0x41   : > { %v4534_v33 = vpack.i.bf16 %v5465_v31, %v5453_v26  ;;  %v533_v34 = vrot.slane %v455_v28, 2  ;;  %v456_v35 = vsel %vm444_vm0, %v428_v15, 0.0  ;;  %v535_v36 = vrot.slane %v5450_v25, 2  ;;  %v4855_v15 = vld [vmem:[%s6567_s1 + $0x58] sm:$0xff]  }
  0x42   : > { %4530 = vrot.lane.b32.xlu1 %v4529_v29, %s5270_s23  ;;  %4525 = vrot.lane.b32.xlu0 %v4524_v30, %s5271_s21  ;;  %v536_v38 = vrot.slane %v456_v35, 2  ;;  %v483_v39 = vrot.slane %v5456_v27, 1  ;;  %v484_v40 = vrot.slane %v455_v28, 1  ;;  %v486_v41 = vrot.slane %v5450_v25, 1  ;;  %v4856_v30 = vld [vmem:[%s6567_s1 + $0xa8] sm:$0xff]  }
  0x43   : > { %v534_v42 = vsel %vm528_vm1, %v532_v32, %v533_v34  ;;  %v487_v43 = vrot.slane %v456_v35, 1  ;;  %v457_v44 = vsel %vm444_vm0, %v429_v16, 0.0  ;;  %v538_v45 = vrot.slane %v5453_v26, 2  ;;  %1045 = vmatpush1.bf16.msra.mxu1 %v4850_v55  ;;  %4193 = vmatprep.subr.bf16.mxu0 %v4855_v15  ;;  %v4858_v32 = vld [vmem:[%s6567_s1 + $0x60] sm:$0xff]   ;;  %v4863_v55 = vld [vmem:[%s6567_s1 + $0x28] sm:$0xff]  }
  0x44   : > { %v4539_v47 = vpack.i.bf16 %v534_v42, %v5441_v20  ;;  %v5487_v48 = vsel %vm528_vm1, %v535_v36, %v536_v38  ;;  %v485_v49 = vsel %vm479_vm2, %v483_v39, %v484_v40  ;;  %v539_v50 = vrot.slane %v457_v44, 2  ;;  %1046 = vmatprep.subr.bf16.mxu1 %v5269_v2  ;;  %4194 = vmatpush3.bf16.msra.mxu0 %v4857_v23  ;;  %v4860_v39 = vld [vmem:[%s6567_s1 + $0x20] sm:$0xff]  }
  0x45   : > { %v488_v52 = vsel %vm479_vm2, %v486_v41, %v487_v43  ;;  %v4554_v56 = vpack.i.bf16 %v5487_v48, %v534_v42  ;;  %v489_v58 = vrot.slane %v5453_v26, 1  ;;  %v458_v59 = vsel %vm444_vm0, %v430_v18, 0.0  ;;  %4195 = vmatprep.subr.bf16.mxu0 %v4858_v32  ;;  %v4859_v42 = vld [vmem:[%s6567_s1 + $0xb0] sm:$0xff]  }
  0x46   : > { %4535 = vrot.lane.b32.xlu1 %v4534_v33, %s5271_s21  ;;  %4540 = vrot.lane.b32.xlu0 %v4539_v47, %s6581_s26  ;;  %v4544_v57 = vpack.i.bf16 %v488_v52, %v485_v49  ;;  %v5510_v61 = vsel %vm528_vm1, %v538_v45, %v539_v50  ;;  %v490_v62 = vrot.slane %v457_v44, 1  ;;  %v492_v63 = vrot.slane %v5465_v31, 1  ;;  %v4861_v44 = vld [vmem:[%s6567_s1 + $0x68] sm:$0xff]   ;;  %v4862_v47 = vld [vmem:[%s6567_s1 + $0xb8] sm:$0xff]  }
  0x47   : > { %v493_v0 = vrot.slane %v458_v59, 1  ;;  %v4559_v6 = vpack.i.bf16 %v5510_v61, %v5487_v48  ;;  %v4549_v7 = vpack.i.bf16 %v485_v49, %v5496_v53  ;;  %v541_v8 = vrot.slane %v5465_v31, 2  ;;  %1047 = vmatpush1.bf16.msra.mxu1 %v4853_v14 }
  0x48   : > { %v491_v10 = vsel %vm479_vm2, %v489_v58, %v490_v62  ;;  %v542_v12 = vrot.slane %v458_v59, 2  ;;  %v5531_v13 = vsel %vm444_vm0, 0.0, %v431_v54  ;;  %v459_v16 = vsel %vm444_vm0, %v431_v54, 0.0  ;;  %1048 = vmatprep.subr.bf16.mxu1 %v5269_v2  ;;  %4196 = vmatpush3.bf16.msra.mxu0 %v4860_v39 }
  0x49   : > { %v494_v11 = vsel %vm479_vm2, %v492_v63, %v493_v0  ;;  %v432_v17 = vrot.slane %v4179_v5, 7  ;;  %v4182_v18 = vunpack.c.l.bf16 %v4186_v4  ;;  %v4564_v19 = vpack.i.bf16 %v491_v10, %v488_v52  ;;  %4197 = vmatprep.subr.bf16.mxu0 %v4861_v44 }
  0x4a   : > { %4555 = vrot.lane.b32.xlu0 %v4554_v56, %s5273_s16  ;;  %4545 = vrot.lane.b32.xlu1 %v4544_v57, %s6579_s17  ;;  %v4569_v21 = vpack.i.bf16 %v494_v11, %v491_v10  ;;  %v495_v22 = vrot.slane %v5531_v13, 1  ;;  %v5548_v24 = vsel %vm528_vm1, %v541_v8, %v542_v12  ;;  %v496_v28 = vrot.slane %v459_v16, 1  ;;  %v4868_v10 = vld [vmem:[%s6567_s1 + $0xc8] sm:$0xff]  }
  0x4b   : > { %v4183_v29 = vunpack.c.h.bf16 %v4186_v4  ;;  %v5558_v33 = vsel %vm444_vm0, 0.0, %v432_v17  ;;  %v433_v34 = vrot.slane %v4182_v18, 7  ;;  %v4579_v35 = vpack.i.bf16 %v5548_v24, %v5510_v61  ;;  %1049 = vmatpush1.bf16.msra.mxu1 %v4856_v30 }
  0x4c   : > { %v544_v36 = vrot.slane %v5531_v13, 2  ;;  %v545_v37 = vrot.slane %v459_v16, 2  ;;  %v460_v38 = vsel %vm444_vm0, %v432_v17, 0.0  ;;  %v497_v40 = vsel %vm479_vm2, %v495_v22, %v496_v28  ;;  %1050 = vmatprep.subr.bf16.mxu1 %v5269_v2  ;;  %4198 = vmatpush3.bf16.msra.mxu0 %v4863_v55  ;;  %v4870_v16 = vld [vmem:[%s6567_s1 + $0xd0] sm:$0xff]  }
  0x4d   : > { %v434_v41 = vrot.slane %v4183_v29, 7  ;;  %v498_v43 = vrot.slane %v5558_v33, 1  ;;  %v4584_v45 = vpack.i.bf16 %v5531_v13, %v5465_v31  ;;  %v499_v46 = vrot.slane %v460_v38, 1 }
  0x4e   : > { %4560 = vrot.lane.b32.xlu0 %v4559_v6, %s6581_s26  ;;  %4550 = vrot.lane.b32.xlu1 %v4549_v7, %s5275_s14  ;;  %v779_v49 = vpack.c.bf16 %v5510_v61, %v5487_v48  ;;  %v4589_v50 = vpack.i.bf16 %v497_v40, %v494_v11  ;;  %v5588_v51 = vsel %vm528_vm1, %v544_v36, %v545_v37  ;;  %v5591_v52 = vsel %vm444_vm0, 0.0, %v433_v34  ;;  %v4864_v48 = vld [vmem:[%s6567_s1 + $0x70] sm:$0xff]   ;;  %v4867_v6 = vld [vmem:[%s6567_s1 + $0x78] sm:$0xff]  }
  0x4f   : > { %v461_v54 = vsel %vm444_vm0, %v433_v34, 0.0  ;;  %1051 = vmatpush1.bf16.msra.mxu1 %v4859_v42  ;;  %v783_v56 = vpack.c.bf16 %v5588_v51, %v5548_v24  ;;  %v547_v57 = vrot.slane %v5558_v33, 2  ;;  %v548_v58 = vrot.slane %v460_v38, 2  ;;  %4199 = vmatprep.subr.bf16.mxu0 %v4864_v48  ;;  %v4869_v11 = vld [vmem:[%s6567_s1 + $0x38] sm:$0xff]  }
  0x50   : > { %1052 = vmatprep.subr.bf16.mxu1 %v5269_v2  ;;  %3941 = vmatprep.mubr.msk.bf16.mxu1 %vm713_vm3, %v779_v49  ;;  %v550_v59 = vrot.slane %v5591_v52, 2  ;;  %v4594_v61 = vpack.i.bf16 %v5588_v51, %v5548_v24  ;;  %v4599_v62 = vpack.i.bf16 %v5558_v33, %v5531_v13  ;;  %v551_v63 = vrot.slane %v461_v54, 2 }
  0x51   : > { %v453_v0 = vsel %vm444_vm0, 0.0, %v434_v41  ;;  %v500_v4 = vsel %vm479_vm2, %v498_v43, %v499_v46  ;;  %v501_v5 = vrot.slane %v5591_v52, 1  ;;  %v502_v7 = vrot.slane %v461_v54, 1  ;;  %4200 = vmatpush3.bf16.msra.mxu0 %v4866_v60 }
  0x52   : > { %4565 = vrot.lane.b32.xlu0 %v4564_v19, %s5276_s22  ;;  %4570 = vrot.lane.b32.xlu1 %v4569_v21, %s6579_s17  ;;  %v462_v8 = vsel %vm444_vm0, %v434_v41, 0.0  ;;  %v603_v9 = vrot.slane %v453_v0, 1  ;;  %v4604_v12 = vpack.i.bf16 %v500_v4, %v497_v40  ;;  %v630_v14 = vrot.slane %v453_v0, 2  ;;  %s5201_s17 = sshll.u32 %s5277_s25, 4  ;;  %s5202_s17 = int_to_ptr.vmem [resolvable:$false] %s5201_s17 }
  0x53   : > { %1053 = vmatpush1.bf16.msra.mxu1 %v4862_v47  ;;  %v5635_v15 = vsel %vm528_vm1, %v547_v57, %v548_v58  ;;  %4201 = vmatprep.subr.bf16.mxu0 %v4867_v6  ;;  %v4619_v18 = vpack.i.bf16 %v5591_v52, %v5558_v33  ;;  %v5648_v21 = vsel %vm528_vm1, %v550_v59, %v551_v63  ;;  %v631_v29 = vrot.slane %v462_v8, 2  ;;  %s5203_s28 = scalar_lea.vmem %s5202_s17, 2048 }
  0x54   : > { %1054 = vmatprep.subr.bf16.mxu1 %v5269_v2  ;;  %v4614_v17 = vpack.i.bf16 %v5635_v15, %v5588_v51  ;;  %v787_v22 = vpack.c.bf16 %v5648_v21, %v5635_v15  ;;  %v4624_v23 = vpack.i.bf16 %v5648_v21, %v5635_v15  ;;  %v4629_v28 = vpack.i.bf16 %v453_v0, %v5591_v52 }
  0x55   : > { %4202 = vmatpush3.bf16.msra.mxu0 %v4869_v11  ;;  %v503_v30 = vsel %vm479_vm2, %v501_v5, %v502_v7  ;;  %v5663_v36 = vsel %vm528_vm1, %v630_v14, %v631_v29  ;;  %v4654_v38 = vpack.i.bf16 %v5417_v3, %v453_v0 }
  0x56   : > { %4575 = vrot.lane.b32.xlu0 %v4564_v19, %s5275_s14  ;;  %4580 = vrot.lane.b32.xlu1 %v4579_v35, %s5273_s16  ;;  %v604_v19 = vrot.slane %v462_v8, 1  ;;  %v4634_v34 = vpack.i.bf16 %v503_v30, %v500_v4  ;;  %v4649_v37 = vpack.i.bf16 %v5663_v36, %v5648_v21 }
  0x57   : > { %1055 = vmatpush1.bf16.msra.mxu1 %v4865_v1 }
  0x58   : > { %1056 = vmatprep.subr.bf16.mxu1 %v5269_v2  ;;  %v605_v32 = vsel %vm479_vm2, %v603_v9, %v604_v19 }
  0x59   : > { %v4639_v35 = vpack.i.bf16 %v605_v32, %v503_v30  ;;  %v4659_v39 = vpack.i.bf16 %v5496_v53, %v605_v32 }
  0x5a   : > { %4585 = vrot.lane.b32.xlu0 %v4584_v45, %s5270_s23  ;;  %4590 = vrot.lane.b32.xlu1 %v4589_v50, %s5276_s22 }
  0x5b   : > { %1057 = vmatpush1.bf16.msra.mxu1 %v4868_v10 }
  0x5c   : > { %1058 = vmatprep.subr.bf16.mxu1 %v5269_v2 }
  0x5e   : > { %4595 = vrot.lane.b32.xlu0 %v4594_v61, %s6581_s26  ;;  %4600 = vrot.lane.b32.xlu1 %v4599_v62, %s5271_s21 }
  0x5f   : > { %1059 = vmatpush1.bf16.msra.mxu1 %v4870_v16 }
  0x62   : > { %4605 = vrot.lane.b32.xlu0 %v4604_v12, %s6590_s29  ;;  %4610 = vrot.lane.b32.xlu1 %v4589_v50, %s5275_s14 }
  0x66   : > { %4615 = vrot.lane.b32.xlu0 %v4614_v17, %s5273_s16  ;;  %4620 = vrot.lane.b32.xlu1 %v4619_v18, %s5270_s23 }
  0x6a   : > { %4625 = vrot.lane.b32.xlu0 %v4624_v23, %s6581_s26  ;;  %4630 = vrot.lane.b32.xlu1 %v4629_v28, %s5271_s21  ;;  %s338_s26 = sand.u32 1, %s5255_s10  }
  0x6b   : > { %s6525_s13 = scalar_lea.sflag [#allocation4], %s338_s26 }
  0x6e   : > { %4635 = vrot.lane.b32.xlu0 %v4634_v34, %s5276_s22  ;;  %4640 = vrot.lane.b32.xlu1 %v4639_v35, %s6590_s29 }
  0x72   : > { %4645 = vrot.lane.b32.xlu0 %v4634_v34, %s5275_s14  ;;  %4650 = vrot.lane.b32.xlu1 %v4649_v37, %s5273_s16  ;;  %s6515_s14 = scalar_lea.hbm %s6575_s9, %s4167_s27 }
  0x76   : > { %4655 = vrot.lane.b32.xlu0 %v4654_v38, %s5270_s23  ;;  %4660 = vrot.lane.b32.xlu1 %v4659_v39, %s5276_s22 }
  0xb4   : > { %v4531_v40 = vpop.permute.xlu1 %4530  ;;  %v4526_v41 = vpop.permute.xlu0 %4525 }
  0xb5   : > { %v4528_v46 = vunpack.i.h.bf16 %v4526_v41  ;;  %v4527_v47 = vunpack.i.l.bf16 %v4526_v41  ;;  %v4533_v6 = vunpack.i.h.bf16 %v4531_v40  ;;  %v4532_v8 = vunpack.i.l.bf16 %v4531_v40 }
  0xb8   : > { %v4536_v42 = vpop.permute.xlu1 %4535  ;;  %v4541_v43 = vpop.permute.xlu0 %4540 }
  0xb9   : > { %v4543_v44 = vunpack.i.h.bf16 %v4541_v43  ;;  %v4542_v45 = vunpack.i.l.bf16 %v4541_v43  ;;  %v4538_v9 = vunpack.i.h.bf16 %v4536_v42  ;;  %v4537_v23 = vunpack.i.l.bf16 %v4536_v42 }
  0xbb   : > { %v732_v58 = vsel %vm731_vm4, %v4542_v45, %v4527_v47  ;;  %v733_v59 = vsel %vm731_vm4, %v4543_v44, %v4528_v46 }
  0xbc   : > { %v4556_v49 = vpop.permute.xlu0 %4555  ;;  %v4546_v50 = vpop.permute.xlu1 %4545 }
  0xbd   : > { %v4558_v54 = vunpack.i.h.bf16 %v4556_v49  ;;  %v4557_v55 = vunpack.i.l.bf16 %v4556_v49  ;;  %v4548_v48 = vunpack.i.h.bf16 %v4546_v50  ;;  %v4547_v57 = vunpack.i.l.bf16 %v4546_v50 }
  0xbf   : > { %v741_v60 = vsel %vm740_vm5, %v732_v58, %v4547_v57  ;;  %v742_v61 = vsel %vm740_vm5, %v733_v59, %v4548_v48  ;;  %v760_v28 = vsel %vm758_vm8, %v4558_v54, %v4533_v6  ;;  %v759_v32 = vsel %vm758_vm8, %v4557_v55, %v4532_v8 }
  0xc0   : > { %v4561_v62 = vpop.permute.xlu0 %4560  ;;  %v4551_v63 = vpop.permute.xlu1 %4550  ;;  %v750_v0 = vsel %vm749_vm6, %v741_v60, %v4557_v55  ;;  %v751_v1 = vsel %vm749_vm6, %v742_v61, %v4558_v54 }
  0xc1   : > { %v4553_v4 = vunpack.i.h.bf16 %v4551_v63  ;;  %v4552_v5 = vunpack.i.l.bf16 %v4551_v63  ;;  %v777_v7 = vpack.c.bf16 %v751_v1, %v750_v0  ;;  %v4563_v12 = vunpack.i.h.bf16 %v4561_v62 }
  0xc2   : > { %v4562_v14 = vunpack.i.l.bf16 %v4561_v62 }
  0xc3   : > { %v715_v10 = vsel %vm713_vm3, %v5456_v27, %v4553_v4  ;;  %v714_v11 = vsel %vm713_vm3, %v5417_v3, %v4552_v5  ;;  %1005 = vmatprep.mubr.bf16.mxu0 %v777_v7  ;;  %v735_v39 = vsel %vm731_vm4, %v4563_v12, %v4538_v9 }
  0xc4   : > { %v4566_v16 = vpop.permute.xlu0 %4565  ;;  %v4571_v17 = vpop.permute.xlu1 %4570  ;;  %v723_v18 = vsel %vm722_vm7, %v714_v11, %v4542_v45  ;;  %v724_v19 = vsel %vm722_vm7, %v715_v10, %v4543_v44  ;;  %v734_v40 = vsel %vm731_vm4, %v4562_v14, %v4537_v23 }
  0xc5   : > { %v4568_v29 = vunpack.i.h.bf16 %v4566_v16  ;;  %v4567_v30 = vunpack.i.l.bf16 %v4566_v16  ;;  %v4573_v27 = vunpack.i.h.bf16 %v4571_v17  ;;  %v4572_v34 = vunpack.i.l.bf16 %v4571_v17 }
  0xc6   : > { %v776_v35 = vpack.c.bf16 %v724_v19, %v723_v18 }
  0xc7   : > { %v768_v37 = vsel %vm767_vm9, %v759_v32, %v4567_v30  ;;  %v769_v38 = vsel %vm767_vm9, %v760_v28, %v4568_v29  ;;  %v744_v49 = vsel %vm740_vm5, %v735_v39, %v4573_v27  ;;  %v743_v50 = vsel %vm740_vm5, %v734_v40, %v4572_v34 }
  0xc8   : > { %1006 = vmatmul.mubr.bf16.vlgmr.msra.gmra.mrb[0].mxu0 %v776_v35  ;;  %v4576_v41 = vpop.permute.xlu0 %4575  ;;  %v4581_v42 = vpop.permute.xlu1 %4580  ;;  %v778_v43 = vpack.c.bf16 %v769_v38, %v768_v37 }
  0xc9   : > { %v4578_v44 = vunpack.i.h.bf16 %v4576_v41  ;;  %v4577_v45 = vunpack.i.l.bf16 %v4576_v41  ;;  %v4583_v46 = vunpack.i.h.bf16 %v4581_v42  ;;  %v4582_v47 = vunpack.i.l.bf16 %v4581_v42 }
  0xca   : > { %1071 = vmatmul.mubr.bf16.vlgmr.msra.gmra.mrb[0].mxu1 %v778_v43 }
  0xcb   : > { %v717_v54 = vsel %vm713_vm3, %v5453_v26, %v4578_v44  ;;  %v716_v55 = vsel %vm713_vm3, %v5450_v25, %v4577_v45  ;;  %v752_v48 = vsel %vm749_vm6, %v743_v50, %v4582_v47  ;;  %v753_v57 = vsel %vm749_vm6, %v744_v49, %v4583_v46  ;;  %3942 = vmatprep.mubr.msk.bf16.mxu1 %vm713_vm3, %v783_v56 }
  0xcc   : > { %v4586_v58 = vpop.permute.xlu0 %4585  ;;  %v4591_v59 = vpop.permute.xlu1 %4590  ;;  %v781_v60 = vpack.c.bf16 %v753_v57, %v752_v48  ;;  %v725_v61 = vsel %vm722_vm7, %v716_v55, %v4562_v14  ;;  %v726_v62 = vsel %vm722_vm7, %v717_v54, %v4563_v12 }
  0xcd   : > { %v4588_v26 = vunpack.i.h.bf16 %v4586_v58  ;;  %v4587_v63 = vunpack.i.l.bf16 %v4586_v58  ;;  %v4593_v0 = vunpack.i.h.bf16 %v4591_v59  ;;  %v4592_v25 = vunpack.i.l.bf16 %v4591_v59 }
  0xce   : > { %1013 = vmatprep.mubr.bf16.mxu0 %v781_v60  ;;  %v780_v1 = vpack.c.bf16 %v726_v62, %v725_v61  ;;  %v791_v62 = vpack.c.bf16 %v5441_v20, %v5663_v36 }
  0xcf   : > { %v761_v4 = vsel %vm758_vm8, %v4582_v47, %v4587_v63  ;;  %v762_v5 = vsel %vm758_vm8, %v4583_v46, %v4588_v26 }
  0xd0   : > { %1014 = vmatmul.mubr.bf16.gmra.mrb[4].mxu0 %v780_v1  ;;  %v4596_v24 = vpop.permute.xlu0 %4595  ;;  %v4601_v51 = vpop.permute.xlu1 %4600  ;;  %v770_v56 = vsel %vm767_vm9, %v761_v4, %v4592_v25  ;;  %v771_v6 = vsel %vm767_vm9, %v762_v5, %v4593_v0 }
  0xd1   : > { %v4598_v7 = vunpack.i.h.bf16 %v4596_v24  ;;  %v4597_v8 = vunpack.i.l.bf16 %v4596_v24  ;;  %v4603_v9 = vunpack.i.h.bf16 %v4601_v51  ;;  %v4602_v10 = vunpack.i.l.bf16 %v4601_v51 }
  0xd2   : > { %v782_v11 = vpack.c.bf16 %v771_v6, %v770_v56 }
  0xd3   : > { %v737_v12 = vsel %vm731_vm4, %v4598_v7, %v4603_v9  ;;  %v736_v14 = vsel %vm731_vm4, %v4597_v8, %v4602_v10 }
  0xd4   : > { %1079 = vmatmul.mubr.bf16.gmra.mrb[4].mxu1 %v782_v11  ;;  %v4606_v16 = vpop.permute.xlu0 %4605  ;;  %v4611_v17 = vpop.permute.xlu1 %4610 }
  0xd5   : > { %v4608_v18 = vunpack.i.h.bf16 %v4606_v16  ;;  %v4607_v19 = vunpack.i.l.bf16 %v4606_v16  ;;  %v4613_v23 = vunpack.i.h.bf16 %v4611_v17  ;;  %v4612_v28 = vunpack.i.l.bf16 %v4611_v17  ;;  %3943 = vmatprep.mubr.msk.bf16.mxu1 %vm713_vm3, %v787_v22 }
  0xd7   : > { %v719_v29 = vsel %vm713_vm3, %v5531_v13, %v4613_v23  ;;  %v718_v30 = vsel %vm713_vm3, %v5465_v31, %v4612_v28  ;;  %v745_v32 = vsel %vm740_vm5, %v736_v14, %v4607_v19  ;;  %v746_v27 = vsel %vm740_vm5, %v737_v12, %v4608_v18 }
  0xd8   : > { %v4616_v34 = vpop.permute.xlu0 %4615  ;;  %v4621_v35 = vpop.permute.xlu1 %4620  ;;  %v727_v37 = vsel %vm722_vm7, %v718_v30, %v4597_v8  ;;  %v728_v38 = vsel %vm722_vm7, %v719_v29, %v4598_v7 }
  0xd9   : > { %v4618_v39 = vunpack.i.h.bf16 %v4616_v34  ;;  %v4617_v15 = vunpack.i.l.bf16 %v4616_v34  ;;  %v784_v13 = vpack.c.bf16 %v728_v38, %v727_v37  ;;  %v4623_v40 = vunpack.i.h.bf16 %v4621_v35  ;;  %v4872_v34 = vld [vmem:[%s6569_s3 + $0x88] sm:$0xff]   ;;  %v4874_v37 = vld [vmem:[%s6569_s3] sm:$0xff]  }
  0xda   : > { %v4622_v41 = vunpack.i.l.bf16 %v4621_v35  ;;  %v4873_v35 = vld [vmem:[%s6569_s3 + $0x40] sm:$0xff]   ;;  %v4875_v38 = vld [vmem:[%s6569_s3 + $0x48] sm:$0xff]  }
  0xdb   : > { %v754_v21 = vsel %vm749_vm6, %v745_v32, %v4617_v15  ;;  %v755_v22 = vsel %vm749_vm6, %v746_v27, %v4618_v39  ;;  %v764_v49 = vsel %vm758_vm8, %v4618_v39, %v4623_v40  ;;  %v4871_v27 = vld [vmem:[%s6569_s3 + $0x80] sm:$0xff]   ;;  %4227 = vmatprep.subr.bf16.mxu0 %v4873_v35  ;;  %v4876_v39 = vld [vmem:[%s6569_s3 + $0x8] sm:$0xff]  }
  0xdc   : > { %v4626_v31 = vpop.permute.xlu0 %4625  ;;  %v4631_v42 = vpop.permute.xlu1 %4630  ;;  %v785_v43 = vpack.c.bf16 %v755_v22, %v754_v21  ;;  %v763_v50 = vsel %vm758_vm8, %v4617_v15, %v4622_v41  ;;  %4353 = vmatprep.subr.bf16.mxu1 %v4871_v27  ;;  %4228 = vmatpush3.bf16.msra.mxu0 %v4874_v37  ;;  %v4877_v15 = vld [vmem:[%s6569_s3 + $0x50] sm:$0xff]   ;;  %v4879_v22 = vld [vmem:[%s6569_s3 + $0x58] sm:$0xff]  }
  0xdd   : > { %v4628_v44 = vunpack.i.h.bf16 %v4626_v31  ;;  %v4627_v45 = vunpack.i.l.bf16 %v4626_v31  ;;  %v4633_v46 = vunpack.i.h.bf16 %v4631_v42  ;;  %v4632_v47 = vunpack.i.l.bf16 %v4631_v42  ;;  %4354 = vmatpush3.bf16.msra.mxu1 %v4871_v27  ;;  %4229 = vmatprep.subr.bf16.mxu0 %v4875_v38  ;;  %v4878_v21 = vld [vmem:[%s6569_s3 + $0x10] sm:$0xff]   ;;  %v5783_v31 = vld [vmem:[%s6568_s2] ss:$0 sm:$0xff] }
  0xde   : > { %1021 = vmatprep.mubr.bf16.mxu0 %v785_v43  ;;  %4355 = vmatprep.subr.bf16.mxu1 %v4872_v34 }
  0xdf   : > { %1022 = vmatmul.mubr.bf16.gmra.mrb[8].mxu0 %v784_v13  ;;  %v739_v54 = vsel %vm731_vm4, %v4628_v44, %v4633_v46  ;;  %v738_v55 = vsel %vm731_vm4, %v4627_v45, %v4632_v47  ;;  %v4880_v13 = vld [vmem:[%s6569_s3 + $0x18] sm:$0xff]  }
  0xe0   : > { %v4636_v48 = vpop.permute.xlu0 %4635  ;;  %v4641_v57 = vpop.permute.xlu1 %4640  ;;  %4230 = vmatpush3.bf16.msra.mxu0 %v4876_v39 }
  0xe1   : > { %v4638_v58 = vunpack.i.h.bf16 %v4636_v48  ;;  %v4637_v59 = vunpack.i.l.bf16 %v4636_v48  ;;  %v4643_v60 = vunpack.i.h.bf16 %v4641_v57  ;;  %v4642_v61 = vunpack.i.l.bf16 %v4641_v57  ;;  %4356 = vmatpush3.bf16.msra.mxu1 %v4872_v34  ;;  %4231 = vmatprep.subr.bf16.mxu0 %v4877_v15  ;;  %v4881_v57 = vld [vmem:[%s6569_s3 + $0x60] sm:$0xff]   ;;  %v4887_v15 = vld [vmem:[%s6569_s3 + $0x78] sm:$0xff]  }
  0xe3   : > { %v772_v26 = vsel %vm767_vm9, %v763_v50, %v4637_v59  ;;  %v773_v63 = vsel %vm767_vm9, %v764_v49, %v4638_v58  ;;  %v747_v0 = vsel %vm740_vm5, %v738_v55, %v4642_v61  ;;  %v748_v25 = vsel %vm740_vm5, %v739_v54, %v4643_v60  ;;  %v4882_v61 = vld [vmem:[%s6569_s3 + $0x20] sm:$0xff]  }
  0xe4   : > { %v4646_v1 = vpop.permute.xlu0 %4645  ;;  %v4651_v4 = vpop.permute.xlu1 %4650  ;;  %v786_v5 = vpack.c.bf16 %v773_v63, %v772_v26  ;;  %4232 = vmatpush3.bf16.msra.mxu0 %v4878_v21  ;;  %v4888_v21 = vld [vmem:[%s6569_s3 + $0x38] sm:$0xff]  }
  0xe5   : > { %v4648_v24 = vunpack.i.h.bf16 %v4646_v1  ;;  %v4647_v51 = vunpack.i.l.bf16 %v4646_v1  ;;  %v4653_v56 = vunpack.i.h.bf16 %v4651_v4  ;;  %v4652_v6 = vunpack.i.l.bf16 %v4651_v4  ;;  %4233 = vmatprep.subr.bf16.mxu0 %v4879_v22  ;;  %v4883_v4 = vld [vmem:[%s6569_s3 + $0x68] sm:$0xff]  }
  0xe6   : > { %1087 = vmatmul.mubr.bf16.gmra.mrb[8].mxu1 %v786_v5 }
  0xe7   : > { %v721_v7 = vsel %vm713_vm3, %v5591_v52, %v4648_v24  ;;  %v720_v36 = vsel %vm713_vm3, %v5558_v33, %v4647_v51  ;;  %v756_v8 = vsel %vm749_vm6, %v747_v0, %v4652_v6  ;;  %v757_v9 = vsel %vm749_vm6, %v748_v25, %v4653_v56  ;;  %3944 = vmatprep.mubr.msk.bf16.mxu1 %vm713_vm3, %v791_v62 }
  0xe8   : > { %v4656_v10 = vpop.permute.xlu0 %4655  ;;  %v4661_v11 = vpop.permute.xlu1 %4660  ;;  %v789_v12 = vpack.c.bf16 %v757_v9, %v756_v8  ;;  %v729_v14 = vsel %vm722_vm7, %v720_v36, %v4627_v45  ;;  %v730_v16 = vsel %vm722_vm7, %v721_v7, %v4628_v44  ;;  %4234 = vmatpush3.bf16.msra.mxu0 %v4880_v13  ;;  %v4884_v7 = vld [vmem:[%s6569_s3 + $0x28] sm:$0xff]  }
  0xe9   : > { %v4658_v17 = vunpack.i.h.bf16 %v4656_v10  ;;  %v4657_v18 = vunpack.i.l.bf16 %v4656_v10  ;;  %v4663_v19 = vunpack.i.h.bf16 %v4661_v11  ;;  %v4662_v52 = vunpack.i.l.bf16 %v4661_v11  ;;  %4235 = vmatprep.subr.bf16.mxu0 %v4881_v57 }
  0xea   : > { %1029 = vmatprep.mubr.bf16.mxu0 %v789_v12  ;;  %v788_v23 = vpack.c.bf16 %v730_v16, %v729_v14 }
  0xeb   : > { %v765_v33 = vsel %vm758_vm8, %v4652_v6, %v4657_v18  ;;  %v766_v28 = vsel %vm758_vm8, %v4653_v56, %v4658_v17 }
  0xec   : > { %1030 = vmatmul.mubr.bf16.gmra.mrb[12].mxu0 %v788_v23  ;;  %v774_v29 = vsel %vm767_vm9, %v765_v33, %v4662_v52  ;;  %v775_v30 = vsel %vm767_vm9, %v766_v28, %v4663_v19  ;;  %v4885_v33 = vld [vmem:[%s6569_s3 + $0x70] sm:$0xff]  }
  0xed   : > { %v790_v32 = vpack.c.bf16 %v775_v30, %v774_v29  ;;  %4236 = vmatpush3.bf16.msra.mxu0 %v4882_v61 }
  0xee   : > { %4237 = vmatprep.subr.bf16.mxu0 %v4883_v4 }
  0xef   : > { %1095 = vmatmul.mubr.bf16.gmra.mrb[12].mxu1 %v790_v32  ;;  %v4886_v32 = vld [vmem:[%s6569_s3 + $0x30] sm:$0xff]  }
  0xf1   : > { %4238 = vmatpush3.bf16.msra.mxu0 %v4884_v7 }
  0xf2   : > { %4239 = vmatprep.subr.bf16.mxu0 %v4885_v33 }
  0xf5   : > { %4240 = vmatpush3.bf16.msra.mxu0 %v4886_v32 }
  0xf6   : > { %4241 = vmatprep.subr.bf16.mxu0 %v4887_v15 }
  0xf9   : > { %4242 = vmatpush3.bf16.msra.mxu0 %v4888_v21 }
 0x19b   : > { %v4203_v40 = vpop.f32.mrb[0].mxu0 }
 0x19c   : > { %v4204_v41 = vpop.f32.mrb[1].mxu0 }
 0x19d   : > { %v4205_v42 = vadd.f32 %v4204_v41, %v4203_v40  ;;  %v4206_v43 = vpop.f32.mrb[2].mxu0  ;;  %v1072_v44 = vpop.f32.mrb[0].mxu1 }
 0x19e   : > { %v4207_v45 = vpop.f32.mrb[3].mxu0  ;;  %v1074_v46 = vpop.f32.mrb[1].mxu1 }
 0x19f   : > { %v4208_v47 = vadd.f32 %v4207_v45, %v4206_v43  ;;  %v1008_v49 = vadd.f32 %v4205_v42, %v5783_v31  ;;  %v1075_v50 = vpop.f32.mrb[2].mxu1 }
 0x1a0   : > { %v1077_v54 = vpop.f32.mrb[3].mxu1 }
 0x1a1   : > { %v1073_v55 = vadd.f32 %v1072_v44, %v1008_v49  ;;  %v1011_v48 = vadd.f32 %v4208_v47, %v5783_v31 }
 0x1a3   : > { %v1103_v58 = vmax.f32 %v1073_v55, 0.0  ;;  %v1076_v59 = vadd.f32 %v1075_v50, %v1011_v48  ;;  %v4209_v60 = vpop.f32.mrb[4].mxu0 }
 0x1a4   : > { %v4210_v62 = vpop.f32.mrb[5].mxu0 }
 0x1a5   : > { %v1155_v26 = vrot.slane %v1103_v58, 7  ;;  %v1104_v63 = vmax.f32 %v1076_v59, 0.0  ;;  %v4211_v0 = vadd.f32 %v4210_v62, %v4209_v60  ;;  %v4212_v25 = vpop.f32.mrb[6].mxu0 }
 0x1a6   : > { %v4213_v1 = vpop.f32.mrb[7].mxu0 }
 0x1a7   : > { %v5797_v5 = vsel %vm444_vm0, 0.0, %v1155_v26  ;;  %v1179_v24 = vsel %vm444_vm0, %v1155_v26, 0.0  ;;  %v1156_v51 = vrot.slane %v1104_v63, 7  ;;  %v4214_v56 = vadd.f32 %v4213_v1, %v4212_v25  ;;  %v1080_v6 = vpop.f32.mrb[4].mxu1 }
 0x1a8   : > { %v1201_v36 = vrot.slane %v5797_v5, 1  ;;  %v1202_v8 = vrot.slane %v1179_v24, 1  ;;  %v1246_v9 = vrot.slane %v5797_v5, 2  ;;  %v1247_v10 = vrot.slane %v1179_v24, 2  ;;  %v1082_v11 = vpop.f32.mrb[5].mxu1 }
 0x1a9   : > { %v5806_v12 = vsel %vm444_vm0, 0.0, %v1156_v51  ;;  %v1180_v14 = vsel %vm444_vm0, %v1156_v51, 0.0  ;;  %v1016_v16 = vadd.f32 %v4211_v0, %v5783_v31  ;;  %v1019_v17 = vadd.f32 %v4214_v56, %v5783_v31  ;;  %v1083_v18 = vpop.f32.mrb[6].mxu1 }
 0x1aa   : > { %v1249_v19 = vrot.slane %v5806_v12, 2  ;;  %v1250_v52 = vrot.slane %v1180_v14, 2  ;;  %v1085_v23 = vpop.f32.mrb[7].mxu1  ;;  %v5816_v30 = vsel %vm479_vm2, %v1201_v36, %v1202_v8  ;;  %v1248_v34 = vsel %vm528_vm1, %v1246_v9, %v1247_v10 }
 0x1ab   : > { %v1081_v28 = vadd.f32 %v1080_v6, %v1016_v16  ;;  %v1084_v29 = vadd.f32 %v1083_v18, %v1019_v17  ;;  %v4664_v27 = vpack.i.bf16 %v5816_v30, %v5496_v53  ;;  %v4669_v40 = vpack.i.bf16 %v1248_v34, %v5441_v20 }
 0x1ac   : > { %v5825_v35 = vsel %vm528_vm1, %v1249_v19, %v1250_v52  ;;  %v1204_v54 = vrot.slane %v5806_v12, 1  ;;  %v1205_v55 = vrot.slane %v1180_v14, 1  ;;  %v4689_v61 = vpack.i.bf16 %v5806_v12, %v5797_v5 }
 0x1ad   : > { %v1105_v37 = vmax.f32 %v1081_v28, 0.0  ;;  %v1106_v38 = vmax.f32 %v1084_v29, 0.0  ;;  %v4674_v39 = vpack.i.bf16 %v5825_v35, %v1248_v34  ;;  %4665 = vrot.lane.b32.xlu1 %v4664_v27, %s5270_s23 }
 0x1ae   : > { %v5871_v56 = vsel %vm479_vm2, %v1204_v54, %v1205_v55 }
 0x1af   : > { %v1157_v22 = vrot.slane %v1105_v37, 7  ;;  %v1158_v13 = vrot.slane %v1106_v38, 7  ;;  %4675 = vrot.lane.b32.xlu0 %v4674_v39, %s5270_s23 }
 0x1b1   : > { %v5838_v41 = vsel %vm444_vm0, 0.0, %v1157_v22  ;;  %v1181_v42 = vsel %vm444_vm0, %v1157_v22, 0.0  ;;  %v5842_v43 = vsel %vm444_vm0, 0.0, %v1158_v13  ;;  %v5845_v44 = vsel %vm444_vm0, %v1158_v13, 0.0  ;;  %4670 = vrot.lane.b32.xlu1 %v4669_v40, %s6590_s29 }
 0x1b2   : > { %v1207_v45 = vrot.slane %v5838_v41, 1  ;;  %v1208_v46 = vrot.slane %v1181_v42, 1  ;;  %v1252_v47 = vrot.slane %v5838_v41, 2  ;;  %v1253_v49 = vrot.slane %v1181_v42, 2  ;;  %v4215_v50 = vpop.f32.mrb[8].mxu0 }
 0x1b3   : > { %v1255_v48 = vrot.slane %v5842_v43, 2  ;;  %v1256_v57 = vrot.slane %v5845_v44, 2  ;;  %v4216_v58 = vpop.f32.mrb[9].mxu0  ;;  %v4679_v60 = vpack.i.bf16 %v5838_v41, %v5806_v12  ;;  %v4694_v36 = vpack.i.bf16 %v5842_v43, %v5838_v41 }
 0x1b4   : > { %v1254_v59 = vsel %vm528_vm1, %v1252_v47, %v1253_v49  ;;  %v4217_v62 = vadd.f32 %v4216_v58, %v4215_v50  ;;  %v4218_v26 = vpop.f32.mrb[10].mxu0  ;;  %v5860_v0 = vsel %vm479_vm2, %v1207_v45, %v1208_v46  ;;  %v1210_v23 = vrot.slane %v5842_v43, 1 }
 0x1b5   : > { %v1460_v63 = vpack.c.bf16 %v1254_v59, %v5825_v35  ;;  %v4219_v25 = vpop.f32.mrb[11].mxu0  ;;  %v5863_v1 = vsel %vm528_vm1, %v1255_v48, %v1256_v57  ;;  %4680 = vrot.lane.b32.xlu0 %v4679_v60, %s6590_s29  ;;  %4690 = vrot.lane.b32.xlu1 %v4689_v61, %s6591_s24  ;;  %v4704_v6 = vpack.i.bf16 %v1254_v59, %v5825_v35  ;;  %v1211_v28 = vrot.slane %v5845_v44, 1 }
 0x1b6   : > { %v4220_v4 = vadd.f32 %v4219_v25, %v4218_v26  ;;  %v1024_v24 = vadd.f32 %v4217_v62, %v5783_v31  ;;  %v4709_v51 = vpack.i.bf16 %v5863_v1, %v1254_v59  ;;  %v4684_v7 = vpack.i.bf16 %v5860_v0, %v5871_v56 }
 0x1b7   : > { %4357 = vmatprep.mubr.msk.bf16.mxu1 %vm758_vm8, %v1460_v63  ;;  %v5906_v58 = vsel %vm479_vm2, %v1210_v23, %v1211_v28 }
 0x1b8   : > { %v1027_v8 = vadd.f32 %v4220_v4, %v5783_v31 }
 0x1b9   : > { %v1088_v9 = vpop.f32.mrb[8].mxu1  ;;  %4685 = vrot.lane.b32.xlu0 %v4684_v7, %s6591_s24  ;;  %4695 = vrot.lane.b32.xlu1 %v4694_v36, %s6591_s24 }
 0x1ba   : > { %v1089_v10 = vadd.f32 %v1088_v9, %v1024_v24  ;;  %v1090_v11 = vpop.f32.mrb[9].mxu1 }
 0x1bb   : > { %v1091_v14 = vpop.f32.mrb[10].mxu1 }
 0x1bc   : > { %v1107_v16 = vmax.f32 %v1089_v10, 0.0  ;;  %v1092_v17 = vadd.f32 %v1091_v14, %v1027_v8  ;;  %v1093_v18 = vpop.f32.mrb[11].mxu1 }
 0x1bd   : > { %4710 = vrot.lane.b32.xlu0 %v4709_v51, %s5270_s23  ;;  %4700 = vrot.lane.b32.xlu1 %v4684_v7, %s5270_s23 }
 0x1be   : > { %v1159_v19 = vrot.slane %v1107_v16, 7  ;;  %v1108_v52 = vmax.f32 %v1092_v17, 0.0 }
 0x1bf   : > { %v4221_v33 = vpop.f32.mrb[12].mxu0 }
 0x1c0   : > { %v5886_v29 = vsel %vm444_vm0, 0.0, %v1159_v19  ;;  %v1183_v32 = vsel %vm444_vm0, %v1159_v19, 0.0  ;;  %v1160_v27 = vrot.slane %v1108_v52, 7  ;;  %v4222_v34 = vpop.f32.mrb[13].mxu0 }
 0x1c1   : > { %v1213_v35 = vrot.slane %v5886_v29, 1  ;;  %v1214_v37 = vrot.slane %v1183_v32, 1  ;;  %v1258_v38 = vrot.slane %v5886_v29, 2  ;;  %v1259_v39 = vrot.slane %v1183_v32, 2  ;;  %v4224_v15 = vpop.f32.mrb[14].mxu0  ;;  %4705 = vrot.lane.b32.xlu1 %v4704_v6, %s6590_s29 }
 0x1c2   : > { %v5892_v21 = vsel %vm444_vm0, 0.0, %v1160_v27  ;;  %v1184_v22 = vsel %vm444_vm0, %v1160_v27, 0.0  ;;  %v4223_v13 = vadd.f32 %v4222_v34, %v4221_v33  ;;  %v4225_v40 = vpop.f32.mrb[15].mxu0  ;;  %v1096_v42 = vpop.f32.mrb[12].mxu1  ;;  %v4714_v44 = vpack.i.bf16 %v5886_v29, %v5842_v43 }
 0x1c3   : > { %v1260_v45 = vsel %vm528_vm1, %v1258_v38, %v1259_v39  ;;  %v1261_v46 = vrot.slane %v5892_v21, 2  ;;  %v1098_v47 = vpop.f32.mrb[13].mxu1  ;;  %v1262_v50 = vrot.slane %v1184_v22, 2  ;;  %v4226_v54 = vadd.f32 %v4225_v40, %v4224_v15 }
 0x1c4   : > { %v1463_v49 = vpack.c.bf16 %v1260_v45, %v5863_v1  ;;  %v1032_v55 = vadd.f32 %v4223_v13, %v5783_v31  ;;  %4715 = vrot.lane.b32.xlu0 %v4714_v44, %s6590_s29  ;;  %v1099_v48 = vpop.f32.mrb[14].mxu1  ;;  %v4719_v57 = vpack.i.bf16 %v5892_v21, %v5886_v29  ;;  %v5909_v59 = vsel %vm479_vm2, %v1213_v35, %v1214_v37 }
 0x1c5   : > { %v4734_v60 = vpack.i.bf16 %v1260_v45, %v5863_v1  ;;  %v1101_v61 = vpop.f32.mrb[15].mxu1  ;;  %v1035_v26 = vadd.f32 %v4226_v54, %v5783_v31  ;;  %v4724_v63 = vpack.i.bf16 %v5909_v59, %v5906_v58  ;;  %v1263_v25 = vsel %vm528_vm1, %v1261_v46, %v1262_v50 }
 0x1c6   : > { %v1097_v62 = vadd.f32 %v1096_v42, %v1032_v55  ;;  %4358 = vmatmul.mubr.msk.bf16.vlgmr.msra.gmra.mrb[16].mxu1 %vm758_vm8, %v1463_v49  ;;  %4720 = vrot.lane.b32.xlu1 %v4719_v57, %s6591_s24  ;;  %v4739_v51 = vpack.i.bf16 %v1263_v25, %v1260_v45  ;;  %v1216_v7 = vrot.slane %v5892_v21, 1  ;;  %v1217_v31 = vrot.slane %v1184_v22, 1 }
 0x1c7   : > { %v1100_v24 = vadd.f32 %v1099_v48, %v1035_v26 }
 0x1c8   : > { %v1109_v4 = vmax.f32 %v1097_v62, 0.0  ;;  %4725 = vrot.lane.b32.xlu0 %v4724_v63, %s6591_s24  ;;  %v5936_v32 = vsel %vm479_vm2, %v1216_v7, %v1217_v31 }
 0x1c9   : > { %v1110_v1 = vmax.f32 %v1100_v24, 0.0 }
 0x1ca   : > { %v1161_v6 = vrot.slane %v1109_v4, 7  ;;  %4730 = vrot.lane.b32.xlu1 %v4724_v63, %s5270_s23 }
 0x1cb   : > { %v1162_v9 = vrot.slane %v1110_v1, 7 }
 0x1cc   : > { %v5922_v36 = vsel %vm444_vm0, 0.0, %v1161_v6  ;;  %v1185_v8 = vsel %vm444_vm0, %v1161_v6, 0.0  ;;  %4740 = vrot.lane.b32.xlu0 %v4739_v51, %s5270_s23 }
 0x1cd   : > { %v1219_v10 = vrot.slane %v5922_v36, 1  ;;  %v1220_v11 = vrot.slane %v1185_v8, 1  ;;  %v1264_v14 = vrot.slane %v5922_v36, 2  ;;  %v1265_v16 = vrot.slane %v1185_v8, 2 }
 0x1ce   : > { %v1178_v17 = vsel %vm444_vm0, 0.0, %v1162_v9  ;;  %v1186_v18 = vsel %vm444_vm0, %v1162_v9, 0.0  ;;  %v4744_v19 = vpack.i.bf16 %v5922_v36, %v5892_v21  ;;  %4735 = vrot.lane.b32.xlu1 %v4734_v60, %s6590_s29 }
 0x1cf   : > { %v1266_v52 = vsel %vm528_vm1, %v1264_v14, %v1265_v16  ;;  %v1328_v23 = vrot.slane %v1178_v17, 2  ;;  %v1329_v33 = vrot.slane %v1186_v18, 2  ;;  %v5939_v27 = vsel %vm479_vm2, %v1219_v10, %v1220_v11 }
 0x1d0   : > { %4745 = vrot.lane.b32.xlu0 %v4744_v19, %s6590_s29  ;;  %v1466_v28 = vpack.c.bf16 %v1266_v52, %v1263_v25  ;;  %v4759_v34 = vpack.i.bf16 %v5939_v27, %v5936_v32  ;;  %v4764_v35 = vpack.i.bf16 %v1266_v52, %v1263_v25  ;;  %v4749_v38 = vpack.i.bf16 %v5417_v3, %v1178_v17 }
 0x1d1   : > { %v1330_v37 = vsel %vm528_vm1, %v1328_v23, %v1329_v33  ;;  %v1317_v22 = vrot.slane %v1178_v17, 1  ;;  %v1318_v13 = vrot.slane %v1186_v18, 1  ;;  %v4779_v40 = vpack.i.bf16 %v1178_v17, %v5922_v36 }
 0x1d2   : > { %4361 = vmatprep.mubr.msk.bf16.mxu1 %vm758_vm8, %v1466_v28  ;;  %4760 = vrot.lane.b32.xlu1 %v4759_v34, %s5270_s23  ;;  %v1469_v39 = vpack.c.bf16 %v5441_v20, %v1330_v37  ;;  %v4769_v15 = vpack.i.bf16 %v1330_v37, %v1266_v52 }
 0x1d3   : > { %v5955_v42 = vsel %vm479_vm2, %v1317_v22, %v1318_v13 }
 0x1d4   : > { %4750 = vrot.lane.b32.xlu0 %v4749_v38, %s6590_s29  ;;  %4362 = vmatmul.mubr.msk.bf16.gmra.mrb[20].mxu1 %vm758_vm8, %v1469_v39  ;;  %v4774_v44 = vpack.i.bf16 %v5496_v53, %v5955_v42 }
 0x1d6   : > { %4765 = vrot.lane.b32.xlu1 %v4764_v35, %s6590_s29 }
 0x1d8   : > { %4755 = vrot.lane.b32.xlu0 %v4759_v34, %s6591_s24 }
 0x1da   : > { %4780 = vrot.lane.b32.xlu1 %v4779_v40, %s6591_s24 }
 0x1dc   : > { %4770 = vrot.lane.b32.xlu0 %v4769_v15, %s5270_s23 }
 0x1e0   : > { %4775 = vrot.lane.b32.xlu0 %v4774_v44, %s6591_s24  ;;  %s3910_s24 = sshll.u32 %s338_s26, 6 }
 0x1e1   : > { %s6485_s23 = scalar_lea.vmem [#allocation5], %s3910_s24 }
 0x21f   : > { %v4666_v45 = vpop.permute.xlu1 %4665 }
 0x220   : > { %v4668_v49 = vunpack.i.h.bf16 %v4666_v45  ;;  %v4667_v50 = vunpack.i.l.bf16 %v4666_v45 }
 0x221   : > { %v4676_v46 = vpop.permute.xlu0 %4675 }
 0x222   : > { %v4678_v54 = vunpack.i.h.bf16 %v4676_v46  ;;  %v4677_v55 = vunpack.i.l.bf16 %v4676_v46  ;;  %v1411_v4 = vsel %vm758_vm8, %v5797_v5, %v4668_v49  ;;  %v1410_v24 = vsel %vm758_vm8, %v5417_v3, %v4667_v50 }
 0x223   : > { %v4671_v47 = vpop.permute.xlu1 %4670 }
 0x224   : > { %v4673_v60 = vunpack.i.h.bf16 %v4671_v47  ;;  %v4672_v61 = vunpack.i.l.bf16 %v4671_v47  ;;  %v1435_v51 = vsel %vm758_vm8, %v5871_v56, %v4678_v54  ;;  %v1434_v6 = vsel %vm758_vm8, %v5816_v30, %v4677_v55 }
 0x226   : > { %v1418_v31 = vsel %vm740_vm5, %v1410_v24, %v4672_v61  ;;  %v1419_v8 = vsel %vm740_vm5, %v1411_v4, %v4673_v60 }
 0x227   : > { %v4681_v48 = vpop.permute.xlu0 %4680  ;;  %v4691_v57 = vpop.permute.xlu1 %4690 }
 0x228   : > { %v4683_v62 = vunpack.i.h.bf16 %v4681_v48  ;;  %v4682_v26 = vunpack.i.l.bf16 %v4681_v48  ;;  %v4693_v63 = vunpack.i.h.bf16 %v4691_v57  ;;  %v4692_v25 = vunpack.i.l.bf16 %v4691_v57 }
 0x22a   : > { %v1442_v11 = vsel %vm740_vm5, %v1434_v6, %v4682_v26  ;;  %v1443_v5 = vsel %vm740_vm5, %v1435_v51, %v4683_v62  ;;  %v1426_v14 = vsel %vm722_vm7, %v1418_v31, %v4692_v25  ;;  %v1427_v16 = vsel %vm722_vm7, %v1419_v8, %v4693_v63 }
 0x22b   : > { %v4686_v1 = vpop.permute.xlu0 %4685  ;;  %v4696_v7 = vpop.permute.xlu1 %4695  ;;  %v1458_v19 = vpack.c.bf16 %v1427_v16, %v1426_v14 }
 0x22c   : > { %v4688_v9 = vunpack.i.h.bf16 %v4686_v1  ;;  %v4687_v10 = vunpack.i.l.bf16 %v4686_v1  ;;  %v4698_v47 = vunpack.i.h.bf16 %v4696_v7  ;;  %v4697_v49 = vunpack.i.l.bf16 %v4696_v7 }
 0x22e   : > { %v1450_v56 = vsel %vm722_vm7, %v1442_v11, %v4687_v10  ;;  %v1451_v30 = vsel %vm722_vm7, %v1443_v5, %v4688_v9 }
 0x22f   : > { %v4701_v17 = vpop.permute.xlu1 %4700  ;;  %v1459_v18 = vpack.c.bf16 %v1451_v30, %v1450_v56  ;;  %v4711_v52 = vpop.permute.xlu0 %4710 }
 0x230   : > { %v4703_v23 = vunpack.i.h.bf16 %v4701_v17  ;;  %v4702_v33 = vunpack.i.l.bf16 %v4701_v17  ;;  %v4713_v38 = vunpack.i.h.bf16 %v4711_v52  ;;  %v4712_v39 = vunpack.i.l.bf16 %v4711_v52 }
 0x231   : > { %1629 = vmatprep.mubr.bf16.mxu0 %v1459_v18 }
 0x232   : > { %1630 = vmatmul.mubr.bf16.vlgmr.msra.gmra.mrb[16].mxu0 %v1458_v19  ;;  %v1413_v15 = vsel %vm758_vm8, %v5838_v41, %v4703_v23  ;;  %v1412_v22 = vsel %vm758_vm8, %v5806_v12, %v4702_v33  ;;  %v1437_v54 = vsel %vm758_vm8, %v5906_v58, %v4713_v38  ;;  %v1436_v55 = vsel %vm758_vm8, %v5860_v0, %v4712_v39 }
 0x233   : > { %v4706_v28 = vpop.permute.xlu1 %4705 }
 0x234   : > { %v4708_v34 = vunpack.i.h.bf16 %v4706_v28  ;;  %v4707_v35 = vunpack.i.l.bf16 %v4706_v28 }
 0x236   : > { %v4716_v37 = vpop.permute.xlu0 %4715  ;;  %v1420_v44 = vsel %vm740_vm5, %v1412_v22, %v4707_v35  ;;  %v1421_v45 = vsel %vm740_vm5, %v1413_v15, %v4708_v34 }
 0x237   : > { %v4718_v13 = vunpack.i.h.bf16 %v4716_v37  ;;  %v4717_v40 = vunpack.i.l.bf16 %v4716_v37  ;;  %v1428_v60 = vsel %vm722_vm7, %v1420_v44, %v4697_v49  ;;  %v1429_v61 = vsel %vm722_vm7, %v1421_v45, %v4698_v47 }
 0x238   : > { %v4721_v46 = vpop.permute.xlu1 %4720  ;;  %v1461_v4 = vpack.c.bf16 %v1429_v61, %v1428_v60 }
 0x239   : > { %v1444_v12 = vsel %vm740_vm5, %v1436_v55, %v4717_v40  ;;  %v1445_v57 = vsel %vm740_vm5, %v1437_v54, %v4718_v13  ;;  %v4723_v17 = vunpack.i.h.bf16 %v4721_v46  ;;  %v4722_v18 = vunpack.i.l.bf16 %v4721_v46 }
 0x23a   : > { %v4726_v50 = vpop.permute.xlu0 %4725 }
 0x23b   : > { %v4728_v41 = vunpack.i.h.bf16 %v4726_v50  ;;  %v4727_v48 = vunpack.i.l.bf16 %v4726_v50 }
 0x23c   : > { %v4731_v62 = vpop.permute.xlu1 %4730 }
 0x23d   : > { %v1452_v26 = vsel %vm722_vm7, %v1444_v12, %v4727_v48  ;;  %v1453_v63 = vsel %vm722_vm7, %v1445_v57, %v4728_v41  ;;  %v4733_v51 = vunpack.i.h.bf16 %v4731_v62  ;;  %v4732_v6 = vunpack.i.l.bf16 %v4731_v62 }
 0x23e   : > { %v4741_v25 = vpop.permute.xlu0 %4740  ;;  %v1462_v58 = vpack.c.bf16 %v1453_v63, %v1452_v26 }
 0x23f   : > { %v4743_v8 = vunpack.i.h.bf16 %v4741_v25  ;;  %v4742_v9 = vunpack.i.l.bf16 %v4741_v25  ;;  %v1415_v11 = vsel %vm758_vm8, %v5886_v29, %v4733_v51  ;;  %v1414_v5 = vsel %vm758_vm8, %v5842_v43, %v4732_v6 }
 0x240   : > { %1637 = vmatprep.mubr.bf16.mxu0 %v1462_v58  ;;  %v4736_v0 = vpop.permute.xlu1 %4735 }
 0x241   : > { %1638 = vmatmul.mubr.bf16.gmra.mrb[20].mxu0 %v1461_v4  ;;  %v4738_v1 = vunpack.i.h.bf16 %v4736_v0  ;;  %v4737_v7 = vunpack.i.l.bf16 %v4736_v0  ;;  %v1439_v52 = vsel %vm758_vm8, %v5936_v32, %v4743_v8  ;;  %v1438_v23 = vsel %vm758_vm8, %v5909_v59, %v4742_v9 }
 0x242   : > { %v4746_v24 = vpop.permute.xlu0 %4745 }
 0x243   : > { %v1422_v14 = vsel %vm740_vm5, %v1414_v5, %v4737_v7  ;;  %v1423_v16 = vsel %vm740_vm5, %v1415_v11, %v4738_v1  ;;  %v4748_v56 = vunpack.i.h.bf16 %v4746_v24  ;;  %v4747_v30 = vunpack.i.l.bf16 %v4746_v24  ;;  %v4891_v11 = vld [vmem:[#allocation2 + $0x4] ss:$16 sps:$4 sm:$0xff]   ;;  %v4892_v5 = vld [vmem:[#allocation2 + $0x8] ss:$16 sps:$4 sm:$0xff]  }
 0x244   : > { %v4761_v31 = vpop.permute.xlu1 %4760  ;;  %v1430_v43 = vsel %vm722_vm7, %v1422_v14, %v4722_v18  ;;  %v1431_v34 = vsel %vm722_vm7, %v1423_v16, %v4723_v17  ;;  %v4894_v14 = vld [vmem:[#allocation2 + $0xc] ss:$16 sps:$4 sm:$0xff]   ;;  %v4897_v16 = vld [vmem:[#allocation2 + $0x24] ss:$16 sps:$4 sm:$0xff]   ;;  %2870 = vmatprep.subr.bf16.mxu0 %v4891_v11  ;;  %v4898_v17 = vld [vmem:[#allocation2 + $0x28] ss:$16 sps:$4 sm:$0xff]  }
 0x245   : > { %v1446_v35 = vsel %vm740_vm5, %v1438_v23, %v4747_v30  ;;  %v1447_v37 = vsel %vm740_vm5, %v1439_v52, %v4748_v56  ;;  %v4763_v32 = vunpack.i.h.bf16 %v4761_v31  ;;  %v4762_v22 = vunpack.i.l.bf16 %v4761_v31  ;;  %v4900_v56 = vld [vmem:[#allocation2 + $0x2c] ss:$16 sps:$4 sm:$0xff]   ;;  %3089 = vmatprep.subr.bf16.mxu1 %v4894_v14  ;;  %v4895_v30 = vld [vmem:[#allocation2 + $0x20] ss:$16 sps:$4 sm:$0xff]   ;;  %v4903_v18 = vld [vmem:[#allocation2 + $0x44] ss:$16 sps:$4 sm:$0xff]  }
 0x246   : > { %v4751_v10 = vpop.permute.xlu0 %4750  ;;  %v1464_v40 = vpack.c.bf16 %v1431_v34, %v1430_v43  ;;  %3090 = vmatpush1.bf16.msra.mxu1 %v4892_v5  ;;  %v4901_v52 = vld [vmem:[#allocation2 + $0x40] ss:$16 sps:$4 sm:$0xff]   ;;  %v4904_v23 = vld [vmem:[#allocation2 + $0x48] ss:$16 sps:$4 sm:$0xff]   ;;  %v4915_v34 = vld [vmem:[#allocation2 + $0x84] ss:$16 sps:$4 sm:$0xff]  }
 0x247   : > { %v1417_v41 = vsel %vm758_vm8, %v5922_v36, %v4763_v32  ;;  %v1416_v48 = vsel %vm758_vm8, %v5892_v21, %v4762_v22  ;;  %v4753_v12 = vunpack.i.h.bf16 %v4751_v10  ;;  %v4752_v57 = vunpack.i.l.bf16 %v4751_v10  ;;  %v4889_v10 = vld [vmem:[#allocation2] ss:$16 sps:$4 sm:$0xff]   ;;  %3091 = vmatprep.subr.bf16.mxu1 %v4900_v56  ;;  %v4910_v43 = vld [vmem:[#allocation2 + $0x68] ss:$16 sps:$4 sm:$0xff]   ;;  %v4972_v11 = vld [vmem:[#allocation2 + $0x1ac] ss:$16 sps:$4 sm:$0xff]  }
 0x248   : > { %v4766_v19 = vpop.permute.xlu1 %4765  ;;  %2871 = vmatpush1.bf16.msra.mxu0 %v4889_v10  ;;  %v4919_v32 = vld [vmem:[#allocation2 + $0xa0] ss:$16 sps:$4 sm:$0xff]   ;;  %v4922_v22 = vld [vmem:[#allocation2 + $0xa8] ss:$16 sps:$4 sm:$0xff]   ;;  %v4969_v10 = vld [vmem:[#allocation2 + $0x1a4] ss:$16 sps:$4 sm:$0xff]  }
 0x249   : > { %v4768_v44 = vunpack.i.h.bf16 %v4766_v19  ;;  %v4767_v45 = vunpack.i.l.bf16 %v4766_v19  ;;  %2872 = vmatprep.subr.bf16.mxu0 %v4897_v16  ;;  %v4906_v19 = vld [vmem:[#allocation2 + $0x4c] ss:$16 sps:$4 sm:$0xff]   ;;  %v4967_v5 = vld [vmem:[#allocation2 + $0x1a0] ss:$16 sps:$4 sm:$0xff]   ;;  %v4970_v14 = vld [vmem:[#allocation2 + $0x1a8] ss:$16 sps:$4 sm:$0xff]  }
 0x24a   : > { %v4756_v33 = vpop.permute.xlu0 %4755  ;;  %3092 = vmatpush1.bf16.msra.mxu1 %v4898_v17  ;;  %v4975_v16 = vld [vmem:[#allocation2 + $0x1c4] ss:$16 sps:$4 sm:$0xff]   ;;  %v4978_v56 = vld [vmem:[#allocation2 + $0x1cc] ss:$16 sps:$4 sm:$0xff]   ;;  %v4976_v17 = vld [vmem:[#allocation2 + $0x1c8] ss:$16 sps:$4 sm:$0xff]  }
 0x24b   : > { %v4758_v29 = vunpack.i.h.bf16 %v4756_v33  ;;  %v4757_v28 = vunpack.i.l.bf16 %v4756_v33  ;;  %v1424_v61 = vsel %vm740_vm5, %v1416_v48, %v4767_v45  ;;  %v1425_v62 = vsel %vm740_vm5, %v1417_v41, %v4768_v44  ;;  %v4909_v33 = vld [vmem:[#allocation2 + $0x64] ss:$16 sps:$4 sm:$0xff]   ;;  %3093 = vmatprep.subr.bf16.mxu1 %v4906_v19  ;;  %v4928_v44 = vld [vmem:[#allocation2 + $0xc8] ss:$16 sps:$4 sm:$0xff]   ;;  %v6044_v19 = vld [vmem:[%s6570_s4] ss:$0 sm:$0xff] }
 0x24c   : > { %v4781_v38 = vpop.permute.xlu1 %4780  ;;  %2873 = vmatpush1.bf16.msra.mxu0 %v4895_v30  ;;  %v4933_v45 = vld [vmem:[#allocation2 + $0xe4] ss:$16 sps:$4 sm:$0xff]   ;;  %v4940_v41 = vld [vmem:[#allocation2 + $0x108] ss:$16 sps:$4 sm:$0xff]   ;;  %v4973_v30 = vld [vmem:[#allocation2 + $0x1c0] ss:$16 sps:$4 sm:$0xff]  }
 0x24d   : > { %v1454_v39 = vsel %vm722_vm7, %v1446_v35, %v4757_v28  ;;  %v1455_v15 = vsel %vm722_vm7, %v1447_v37, %v4758_v29  ;;  %v4783_v49 = vunpack.i.h.bf16 %v4781_v38  ;;  %v4782_v50 = vunpack.i.l.bf16 %v4781_v38  ;;  %2874 = vmatprep.subr.bf16.mxu0 %v4903_v18  ;;  %v4912_v29 = vld [vmem:[#allocation2 + $0x6c] ss:$16 sps:$4 sm:$0xff]   ;;  %v4907_v28 = vld [vmem:[#allocation2 + $0x60] ss:$16 sps:$4 sm:$0xff]   ;;  %v4916_v38 = vld [vmem:[#allocation2 + $0x88] ss:$16 sps:$4 sm:$0xff]  }
 0x24e   : > { %v4771_v13 = vpop.permute.xlu0 %4770  ;;  %v1465_v59 = vpack.c.bf16 %v1455_v15, %v1454_v39  ;;  %3094 = vmatpush1.bf16.msra.mxu1 %v4904_v23  ;;  %v4918_v35 = vld [vmem:[#allocation2 + $0x8c] ss:$16 sps:$4 sm:$0xff]   ;;  %v4913_v37 = vld [vmem:[#allocation2 + $0x80] ss:$16 sps:$4 sm:$0xff]   ;;  %v4921_v39 = vld [vmem:[#allocation2 + $0xa4] ss:$16 sps:$4 sm:$0xff]  }
 0x24f   : > { %v4773_v46 = vunpack.i.h.bf16 %v4771_v13  ;;  %v4772_v47 = vunpack.i.l.bf16 %v4771_v13  ;;  %v1432_v25 = vsel %vm722_vm7, %v1424_v61, %v4782_v50  ;;  %v1433_v36 = vsel %vm722_vm7, %v1425_v62, %v4783_v49  ;;  %3095 = vmatprep.subr.bf16.mxu1 %v4912_v29  ;;  %v4924_v15 = vld [vmem:[#allocation2 + $0xac] ss:$16 sps:$4 sm:$0xff]   ;;  %v4927_v13 = vld [vmem:[#allocation2 + $0xc4] ss:$16 sps:$4 sm:$0xff]   ;;  %v4934_v49 = vld [vmem:[#allocation2 + $0xe8] ss:$16 sps:$4 sm:$0xff]  }
 0x250   : > { %1645 = vmatprep.mubr.bf16.mxu0 %v1465_v59  ;;  %v1467_v0 = vpack.c.bf16 %v1433_v36, %v1432_v25  ;;  %2875 = vmatpush1.bf16.msra.mxu0 %v4901_v52  ;;  %v4930_v59 = vld [vmem:[#allocation2 + $0xcc] ss:$16 sps:$4 sm:$0xff]   ;;  %v4939_v50 = vld [vmem:[#allocation2 + $0x104] ss:$16 sps:$4 sm:$0xff]   ;;  %v4955_v25 = vld [vmem:[#allocation2 + $0x160] ss:$16 sps:$4 sm:$0xff]  }
 0x251   : > { %v1441_v54 = vsel %vm758_vm8, %v5955_v42, %v4773_v46  ;;  %v1440_v55 = vsel %vm758_vm8, %v5939_v27, %v4772_v47  ;;  %1646 = vmatmul.mubr.bf16.gmra.mrb[24].mxu0 %v1464_v40  ;;  %2876 = vmatprep.subr.bf16.mxu0 %v4909_v33  ;;  %v4925_v40 = vld [vmem:[#allocation2 + $0xc0] ss:$16 sps:$4 sm:$0xff]   ;;  %v4936_v46 = vld [vmem:[#allocation2 + $0xec] ss:$16 sps:$4 sm:$0xff]   ;;  %v4945_v48 = vld [vmem:[#allocation2 + $0x124] ss:$16 sps:$4 sm:$0xff]  }
 0x252   : > { %v4776_v60 = vpop.permute.xlu0 %4775  ;;  %v1448_v42 = vsel %vm740_vm5, %v1440_v55, %v4752_v57  ;;  %v1449_v27 = vsel %vm740_vm5, %v1441_v54, %v4753_v12  ;;  %3096 = vmatpush1.bf16.msra.mxu1 %v4910_v43  ;;  %v4931_v47 = vld [vmem:[#allocation2 + $0xe0] ss:$16 sps:$4 sm:$0xff]   ;;  %v4942_v54 = vld [vmem:[#allocation2 + $0x10c] ss:$16 sps:$4 sm:$0xff]   ;;  %v4951_v61 = vld [vmem:[#allocation2 + $0x144] ss:$16 sps:$4 sm:$0xff]  }
 0x253   : > { %v4778_v26 = vunpack.i.h.bf16 %v4776_v60  ;;  %v4777_v63 = vunpack.i.l.bf16 %v4776_v60  ;;  %3097 = vmatprep.subr.bf16.mxu1 %v4918_v35  ;;  %v4937_v55 = vld [vmem:[#allocation2 + $0x100] ss:$16 sps:$4 sm:$0xff]   ;;  %v4948_v12 = vld [vmem:[#allocation2 + $0x12c] ss:$16 sps:$4 sm:$0xff]   ;;  %v4946_v60 = vld [vmem:[#allocation2 + $0x128] ss:$16 sps:$4 sm:$0xff]  }
 0x254   : > { %2877 = vmatpush1.bf16.msra.mxu0 %v4907_v28  ;;  %v4943_v57 = vld [vmem:[#allocation2 + $0x120] ss:$16 sps:$4 sm:$0xff]   ;;  %v4954_v62 = vld [vmem:[#allocation2 + $0x14c] ss:$16 sps:$4 sm:$0xff]   ;;  %v4958_v36 = vld [vmem:[#allocation2 + $0x168] ss:$16 sps:$4 sm:$0xff]  }
 0x255   : > { %v1456_v58 = vsel %vm722_vm7, %v1448_v42, %v4777_v63  ;;  %v1457_v21 = vsel %vm722_vm7, %v1449_v27, %v4778_v26  ;;  %2878 = vmatprep.subr.bf16.mxu0 %v4915_v34  ;;  %v4949_v26 = vld [vmem:[#allocation2 + $0x140] ss:$16 sps:$4 sm:$0xff]   ;;  %v4952_v63 = vld [vmem:[#allocation2 + $0x148] ss:$16 sps:$4 sm:$0xff]   ;;  %v4957_v42 = vld [vmem:[#allocation2 + $0x164] ss:$16 sps:$4 sm:$0xff]  }
 0x256   : > { %v1468_v4 = vpack.c.bf16 %v1457_v21, %v1456_v58  ;;  %3098 = vmatpush1.bf16.msra.mxu1 %v4916_v38  ;;  %v4960_v27 = vld [vmem:[#allocation2 + $0x16c] ss:$16 sps:$4 sm:$0xff]   ;;  %v4963_v58 = vld [vmem:[#allocation2 + $0x184] ss:$16 sps:$4 sm:$0xff]  }
 0x257   : > { %3099 = vmatprep.subr.bf16.mxu1 %v4924_v15  ;;  %v4966_v21 = vld [vmem:[#allocation2 + $0x18c] ss:$16 sps:$4 sm:$0xff]   ;;  %v4981_v34 = vld [vmem:[#allocation2 + $0x1e4] ss:$16 sps:$4 sm:$0xff]   ;;  %v4982_v15 = vld [vmem:[#allocation2 + $0x1e8] ss:$16 sps:$4 sm:$0xff]  }
 0x258   : > { %1653 = vmatprep.mubr.bf16.mxu0 %v1468_v4  ;;  %2879 = vmatpush1.bf16.msra.mxu0 %v4913_v37  ;;  %v4961_v4 = vld [vmem:[#allocation2 + $0x180] ss:$16 sps:$4 sm:$0xff]   ;;  %v4984_v35 = vld [vmem:[#allocation2 + $0x1ec] ss:$16 sps:$4 sm:$0xff]  }
 0x259   : > { %1654 = vmatmul.mubr.bf16.gmra.mrb[28].mxu0 %v1467_v0  ;;  %2880 = vmatprep.subr.bf16.mxu0 %v4921_v39  ;;  %v4964_v0 = vld [vmem:[#allocation2 + $0x188] ss:$16 sps:$4 sm:$0xff]   ;;  %v4979_v39 = vld [vmem:[#allocation2 + $0x1e0] ss:$16 sps:$4 sm:$0xff]  }
 0x25a   : > { %3100 = vmatpush1.bf16.msra.mxu1 %v4922_v22 }
 0x25b   : > { %3101 = vmatprep.subr.bf16.mxu1 %v4930_v59 }
 0x25c   : > { %2881 = vmatpush1.bf16.msra.mxu0 %v4919_v32 }
 0x25d   : > { %2882 = vmatprep.subr.bf16.mxu0 %v4927_v13  ;;  %v4987_v13 = vld [vmem:[#allocation2 + $0x204] ss:$16 sps:$4 sm:$0xff]  }
 0x25e   : > { %3102 = vmatpush1.bf16.msra.mxu1 %v4928_v44  ;;  %v4990_v44 = vld [vmem:[#allocation2 + $0x20c] ss:$16 sps:$4 sm:$0xff]  }
 0x25f   : > { %3103 = vmatprep.subr.bf16.mxu1 %v4936_v46 }
 0x260   : > { %2883 = vmatpush1.bf16.msra.mxu0 %v4925_v40 }
 0x261   : > { %2884 = vmatprep.subr.bf16.mxu0 %v4933_v45 }
 0x262   : > { %3104 = vmatpush1.bf16.msra.mxu1 %v4934_v49 }
 0x263   : > { %3105 = vmatprep.subr.bf16.mxu1 %v4942_v54 }
 0x264   : > { %2885 = vmatpush1.bf16.msra.mxu0 %v4931_v47 }
 0x265   : > { %2886 = vmatprep.subr.bf16.mxu0 %v4939_v50 }
 0x266   : > { %3106 = vmatpush1.bf16.msra.mxu1 %v4940_v41 }
 0x267   : > { %3107 = vmatprep.subr.bf16.mxu1 %v4948_v12 }
 0x268   : > { %2887 = vmatpush1.bf16.msra.mxu0 %v4937_v55 }
 0x269   : > { %2888 = vmatprep.subr.bf16.mxu0 %v4945_v48 }
 0x26a   : > { %3108 = vmatpush1.bf16.msra.mxu1 %v4946_v60 }
 0x26b   : > { %3109 = vmatprep.subr.bf16.mxu1 %v4954_v62 }
 0x26c   : > { %2889 = vmatpush1.bf16.msra.mxu0 %v4943_v57 }
 0x26d   : > { %2890 = vmatprep.subr.bf16.mxu0 %v4951_v61 }
 0x26e   : > { %3110 = vmatpush1.bf16.msra.mxu1 %v4952_v63 }
 0x26f   : > { %3111 = vmatprep.subr.bf16.mxu1 %v4960_v27 }
 0x270   : > { %2891 = vmatpush1.bf16.msra.mxu0 %v4949_v26 }
 0x271   : > { %2892 = vmatprep.subr.bf16.mxu0 %v4957_v42 }
 0x272   : > { %3112 = vmatpush1.bf16.msra.mxu1 %v4958_v36 }
 0x273   : > { %3113 = vmatprep.subr.bf16.mxu1 %v4966_v21 }
 0x274   : > { %2893 = vmatpush1.bf16.msra.mxu0 %v4955_v25 }
 0x275   : > { %2894 = vmatprep.subr.bf16.mxu0 %v4963_v58 }
 0x276   : > { %3114 = vmatpush1.bf16.msra.mxu1 %v4964_v0 }
 0x277   : > { %3115 = vmatprep.subr.bf16.mxu1 %v4972_v11 }
 0x278   : > { %2895 = vmatpush1.bf16.msra.mxu0 %v4961_v4 }
 0x279   : > { %2896 = vmatprep.subr.bf16.mxu0 %v4969_v10 }
 0x27a   : > { %3116 = vmatpush1.bf16.msra.mxu1 %v4970_v14 }
 0x27b   : > { %3117 = vmatprep.subr.bf16.mxu1 %v4978_v56 }
 0x27c   : > { %2897 = vmatpush1.bf16.msra.mxu0 %v4967_v5 }
 0x27d   : > { %2898 = vmatprep.subr.bf16.mxu0 %v4975_v16 }
 0x27e   : > { %3118 = vmatpush1.bf16.msra.mxu1 %v4976_v17 }
 0x27f   : > { %3119 = vmatprep.subr.bf16.mxu1 %v4984_v35 }
 0x280   : > { %2899 = vmatpush1.bf16.msra.mxu0 %v4973_v30 }
 0x281   : > { %2900 = vmatprep.subr.bf16.mxu0 %v4981_v34 }
 0x282   : > { %3120 = vmatpush1.bf16.msra.mxu1 %v4982_v15 }
 0x283   : > { %3162 = vmatprep.subr.bf16.mxu1 %v4990_v44 }
 0x284   : > { %2901 = vmatpush1.bf16.msra.mxu0 %v4979_v39 }
 0x285   : > { %2943 = vmatprep.subr.bf16.mxu0 %v4987_v13 }
 0x299   : > { %v6025_v24 = vpop.f32.mrb[16].mxu1 }
 0x29a   : > { %v6027_v51 = vpop.f32.mrb[17].mxu1 }
 0x29b   : > { %v6029_v6 = vpop.f32.mrb[18].mxu1 }
 0x29c   : > { %v6031_v1 = vpop.f32.mrb[19].mxu1 }
 0x2a7   : > { %v6033_v7 = vpop.f32.mrb[20].mxu1 }
 0x2a8   : > { %v6035_v31 = vpop.f32.mrb[21].mxu1 }
 0x2a9   : > { %v6037_v8 = vpop.f32.mrb[22].mxu1 }
 0x2aa   : > { %v6039_v9 = vpop.f32.mrb[23].mxu1 }
 0x305   : > { %v4243_v18 = vpop.f32.mrb[16].mxu0 }
 0x306   : > { %v4244_v52 = vpop.f32.mrb[17].mxu0 }
 0x307   : > { %v4245_v23 = vadd.f32 %v4244_v52, %v4243_v18  ;;  %v4246_v33 = vpop.f32.mrb[18].mxu0 }
 0x308   : > { %v4247_v29 = vpop.f32.mrb[19].mxu0 }
 0x309   : > { %v1632_v28 = vadd.f32 %v4245_v23, %v6044_v19  ;;  %v4248_v43 = vadd.f32 %v4247_v29, %v4246_v33 }
 0x30b   : > { %v1697_v37 = vadd.f32 %v6027_v51, %v1632_v28  ;;  %v1635_v38 = vadd.f32 %v4248_v43, %v6044_v19 }
 0x30d   : > { %v1727_v32 = vmax.f32 %v1697_v37, 0.0  ;;  %v1700_v22 = vadd.f32 %v6031_v1, %v1635_v38 }
 0x30f   : > { %v1887_v59 = vrot.slane %v1727_v32, 7  ;;  %v1728_v40 = vmax.f32 %v1700_v22, 0.0 }
 0x311   : > { %v6051_v45 = vsel %vm444_vm0, 0.0, %v1887_v59  ;;  %v6054_v51 = vsel %vm444_vm0, %v1887_v59, 0.0  ;;  %v1888_v46 = vrot.slane %v1728_v40, 7 }
 0x312   : > { %v1934_v47 = vrot.slane %v6054_v51, 1  ;;  %v1933_v49 = vrot.slane %v6051_v45, 1 }
 0x313   : > { %v6059_v1 = vsel %vm444_vm0, 0.0, %v1888_v46  ;;  %v6074_v42 = vsel %vm444_vm0, %v1888_v46, 0.0 }
 0x314   : > { %v4249_v50 = vpop.f32.mrb[20].mxu0  ;;  %v4784_v54 = vpack.i.bf16 %v6059_v1, %v6051_v45  ;;  %v6064_v41 = vsel %vm479_vm2, %v1933_v49, %v1934_v47  ;;  %v1937_v58 = vrot.slane %v6074_v42, 1  ;;  %v1936_v21 = vrot.slane %v6059_v1, 1 }
 0x315   : > { %v4250_v55 = vpop.f32.mrb[21].mxu0  ;;  %v4789_v12 = vpack.i.bf16 %v6064_v41, %v5496_v53 }
 0x316   : > { %v4251_v48 = vadd.f32 %v4250_v55, %v4249_v50  ;;  %v4252_v57 = vpop.f32.mrb[22].mxu0  ;;  %4785 = vrot.lane.b32.xlu0 %v4784_v54, %s6590_s29  ;;  %v6093_v14 = vsel %vm479_vm2, %v1936_v21, %v1937_v58  ;;  %v1981_v58 = vrot.slane %v6059_v1, 2 }
 0x317   : > { %v4253_v60 = vpop.f32.mrb[23].mxu0  ;;  %4790 = vrot.lane.b32.xlu1 %v4789_v12, %s6590_s29 }
 0x318   : > { %v1640_v61 = vadd.f32 %v4251_v48, %v6044_v19  ;;  %v4254_v62 = vadd.f32 %v4253_v60, %v4252_v57 }
 0x31a   : > { %v1705_v26 = vadd.f32 %v6025_v24, %v1640_v61  ;;  %v1643_v63 = vadd.f32 %v4254_v62, %v6044_v19 }
 0x31c   : > { %v1729_v27 = vmax.f32 %v1705_v26, 0.0  ;;  %v1708_v25 = vadd.f32 %v6029_v6, %v1643_v63 }
 0x31e   : > { %v1889_v53 = vrot.slane %v1729_v27, 7  ;;  %v1730_v36 = vmax.f32 %v1708_v25, 0.0 }
 0x320   : > { %v6080_v4 = vsel %vm444_vm0, 0.0, %v1889_v53  ;;  %v6083_v0 = vsel %vm444_vm0, %v1889_v53, 0.0  ;;  %v1890_v24 = vrot.slane %v1730_v36, 7 }
 0x321   : > { %v1940_v10 = vrot.slane %v6083_v0, 1  ;;  %v1939_v11 = vrot.slane %v6080_v4, 1 }
 0x322   : > { %v6088_v5 = vsel %vm444_vm0, 0.0, %v1890_v24  ;;  %v1914_v34 = vsel %vm444_vm0, %v1890_v24, 0.0 }
 0x323   : > { %v4794_v6 = vpack.i.bf16 %v6088_v5, %v6080_v4  ;;  %v6096_v16 = vsel %vm479_vm2, %v1939_v11, %v1940_v10  ;;  %v1943_v59 = vrot.slane %v1914_v34, 1  ;;  %v1942_v44 = vrot.slane %v6088_v5, 1 }
 0x324   : > { %v4255_v56 = vpop.f32.mrb[24].mxu0  ;;  %v4799_v30 = vpack.i.bf16 %v6096_v16, %v6093_v14  ;;  %v1988_v21 = vrot.slane %v1914_v34, 2  ;;  %v1987_v10 = vrot.slane %v6088_v5, 2 }
 0x325   : > { %v4256_v17 = vpop.f32.mrb[25].mxu0  ;;  %4795 = vrot.lane.b32.xlu0 %v4794_v6, %s6590_s29  ;;  %v6126_v62 = vsel %vm479_vm2, %v1942_v44, %v1943_v59 }
 0x326   : > { %v4257_v18 = vadd.f32 %v4256_v17, %v4255_v56  ;;  %v4258_v52 = vpop.f32.mrb[26].mxu0  ;;  %4800 = vrot.lane.b32.xlu1 %v4799_v30, %s6590_s29  ;;  %v1979_v56 = vrot.slane %v6054_v51, 2  ;;  %v1985_v30 = vrot.slane %v6083_v0, 2  ;;  %v1978_v17 = vrot.slane %v6051_v45, 2 }
 0x327   : > { %v4259_v23 = vpop.f32.mrb[27].mxu0 }
 0x328   : > { %v1648_v33 = vadd.f32 %v4257_v18, %v6044_v19  ;;  %v4260_v29 = vadd.f32 %v4259_v23, %v4258_v52  ;;  %v1984_v18 = vrot.slane %v6080_v4, 2 }
 0x32a   : > { %v1713_v28 = vadd.f32 %v6035_v31, %v1648_v33  ;;  %v1651_v43 = vadd.f32 %v4260_v29, %v6044_v19 }
 0x32c   : > { %v1731_v35 = vmax.f32 %v1713_v28, 0.0  ;;  %v1716_v37 = vadd.f32 %v6039_v9, %v1651_v43  ;;  %v4261_v38 = vpop.f32.mrb[28].mxu0  ;;  %v6167_v43 = vsel %vm528_vm1, %v1987_v10, %v1988_v21  ;;  %v4988_v10 = vld [vmem:[#allocation2 + $0x208] ss:$16 sps:$4 sm:$0xff]  }
 0x32d   : > { %v4262_v39 = vpop.f32.mrb[29].mxu0 }
 0x32e   : > { %v1891_v15 = vrot.slane %v1731_v35, 7  ;;  %v1732_v32 = vmax.f32 %v1716_v37, 0.0  ;;  %v4263_v22 = vadd.f32 %v4262_v39, %v4261_v38  ;;  %v4264_v13 = vpop.f32.mrb[30].mxu0  ;;  %v1980_v39 = vsel %vm528_vm1, %v1978_v17, %v1979_v56  ;;  %v4991_v56 = vld [vmem:[#allocation2 + $0x220] ss:$16 sps:$4 sm:$0xff]  }
 0x32f   : > { %v4265_v40 = vpop.f32.mrb[31].mxu0  ;;  %v4997_v17 = vld [vmem:[#allocation2 + $0x240] ss:$16 sps:$4 sm:$0xff]  }
 0x330   : > { %v6109_v46 = vsel %vm444_vm0, 0.0, %v1891_v15  ;;  %v6112_v31 = vsel %vm444_vm0, %v1891_v15, 0.0  ;;  %v1892_v47 = vrot.slane %v1732_v32, 7  ;;  %v1656_v49 = vadd.f32 %v4263_v22, %v6044_v19 }
 0x331   : > { %v1946_v9 = vrot.slane %v6112_v31, 1  ;;  %v4266_v50 = vadd.f32 %v4265_v40, %v4264_v13  ;;  %v1945_v54 = vrot.slane %v6109_v46, 1  ;;  %v6175_v15 = vsel %vm528_vm1, %v1984_v18, %v1985_v30  ;;  %v4994_v30 = vld [vmem:[#allocation2 + $0x228] ss:$16 sps:$4 sm:$0xff]  }
 0x332   : > { %v6118_v55 = vsel %vm444_vm0, 0.0, %v1892_v47  ;;  %v1721_v48 = vadd.f32 %v6033_v7, %v1656_v49  ;;  %v1916_v60 = vsel %vm444_vm0, %v1892_v47, 0.0  ;;  %v1991_v32 = vrot.slane %v6112_v31, 2  ;;  %v5000_v18 = vld [vmem:[#allocation2 + $0x248] ss:$16 sps:$4 sm:$0xff]  }
 0x333   : > { %v1659_v12 = vadd.f32 %v4266_v50, %v6044_v19  ;;  %v4804_v57 = vpack.i.bf16 %v6118_v55, %v6109_v46  ;;  %v6129_v26 = vsel %vm479_vm2, %v1945_v54, %v1946_v9  ;;  %v1982_v19 = vrot.slane %v6074_v42, 2 }
 0x334   : > { %v1733_v61 = vmax.f32 %v1721_v48, 0.0  ;;  %v4809_v7 = vpack.i.bf16 %v6129_v26, %v6126_v62  ;;  %v1949_v25 = vrot.slane %v1916_v60, 1  ;;  %v1948_v36 = vrot.slane %v6118_v55, 1 }
 0x335   : > { %v1724_v63 = vadd.f32 %v6037_v8, %v1659_v12  ;;  %4805 = vrot.lane.b32.xlu0 %v4804_v57, %s6590_s29  ;;  %v6164_v28 = vsel %vm528_vm1, %v1981_v58, %v1982_v19  ;;  %v1994_v34 = vrot.slane %v1916_v60, 2  ;;  %v1993_v37 = vrot.slane %v6118_v55, 2 }
 0x336   : > { %v1893_v27 = vrot.slane %v1733_v61, 7  ;;  %4810 = vrot.lane.b32.xlu1 %v4809_v7, %s6590_s29  ;;  %v6154_v33 = vsel %vm479_vm2, %v1948_v36, %v1949_v25  ;;  %v1990_v13 = vrot.slane %v6109_v46, 2  ;;  %v4824_v40 = vpack.i.bf16 %v6164_v28, %v1980_v39 }
 0x337   : > { %v1734_v53 = vmax.f32 %v1724_v63, 0.0  ;;  %v4829_v44 = vpack.i.bf16 %v6167_v43, %v6175_v15  ;;  %v6184_v47 = vsel %vm528_vm1, %v1993_v37, %v1994_v34 }
 0x338   : > { %v6140_v24 = vsel %vm444_vm0, 0.0, %v1893_v27  ;;  %v1917_v8 = vsel %vm444_vm0, %v1893_v27, 0.0  ;;  %v6192_v31 = vsel %vm528_vm1, %v1990_v13, %v1991_v32  ;;  %v5003_v32 = vld [vmem:[#allocation2 + $0x260] ss:$16 sps:$4 sm:$0xff]   ;;  %v5011_v13 = vld [vmem:[#allocation2 + $0x284] ss:$16 sps:$4 sm:$0xff]  }
 0x339   : > { %v1952_v11 = vrot.slane %v1917_v8, 1  ;;  %v1894_v6 = vrot.slane %v1734_v53, 7  ;;  %v1951_v42 = vrot.slane %v6140_v24, 1  ;;  %v1997_v22 = vrot.slane %v1917_v8, 2  ;;  %v4985_v8 = vld [vmem:[#allocation2 + $0x200] ss:$16 sps:$4 sm:$0xff]  }
 0x33a   : > { %v1996_v59 = vrot.slane %v6140_v24, 2  ;;  %v4834_v50 = vpack.i.bf16 %v6184_v47, %v6192_v31 }
 0x33b   : > { %v6150_v52 = vsel %vm444_vm0, 0.0, %v1894_v6  ;;  %v1918_v23 = vsel %vm444_vm0, %v1894_v6, 0.0  ;;  %v6157_v29 = vsel %vm479_vm2, %v1951_v42, %v1952_v11  ;;  %v4993_v6 = vld [vmem:[#allocation2 + $0x224] ss:$16 sps:$4 sm:$0xff]   ;;  %v4996_v42 = vld [vmem:[#allocation2 + $0x22c] ss:$16 sps:$4 sm:$0xff]  }
 0x33c   : > { %v4814_v51 = vpack.i.bf16 %v6150_v52, %v6140_v24  ;;  %v4819_v0 = vpack.i.bf16 %v6157_v29, %v6154_v33  ;;  %v2033_v35 = vrot.slane %v1918_v23, 1  ;;  %v2032_v38 = vrot.slane %v6150_v52, 1 }
 0x33d   : > { %v6195_v9 = vsel %vm528_vm1, %v1996_v59, %v1997_v22  ;;  %v2043_v48 = vrot.slane %v6150_v52, 2  ;;  %v2044_v12 = vrot.slane %v1918_v23, 2  ;;  %v5005_v23 = vld [vmem:[#allocation2 + $0x264] ss:$16 sps:$4 sm:$0xff]   ;;  %v5006_v22 = vld [vmem:[#allocation2 + $0x268] ss:$16 sps:$4 sm:$0xff]  }
 0x33e   : > { %4815 = vrot.lane.b32.xlu0 %v4814_v51, %s6590_s29  ;;  %4820 = vrot.lane.b32.xlu1 %v4819_v0, %s6590_s29  ;;  %v6187_v49 = vsel %vm479_vm2, %v2032_v38, %v2033_v35  ;;  %v5008_v51 = vld [vmem:[#allocation2 + $0x26c] ss:$16 sps:$4 sm:$0xff]  }
 0x33f   : > { %v4839_v54 = vpack.i.bf16 %v6195_v9, %v6187_v49  ;;  %v6205_v57 = vsel %vm528_vm1, %v2043_v48, %v2044_v12  ;;  %v5014_v59 = vld [vmem:[#allocation2 + $0x28c] ss:$16 sps:$4 sm:$0xff]  }
 0x342   : > { %4825 = vrot.lane.b32.xlu0 %v4824_v40, %s6590_s29  ;;  %4830 = vrot.lane.b32.xlu1 %v4829_v44, %s6590_s29 }
 0x346   : > { %4835 = vrot.lane.b32.xlu0 %v4834_v50, %s6590_s29  ;;  %4840 = vrot.lane.b32.xlu1 %v4839_v54, %s6590_s29 }
 0x34a   : > { %2060 = vrot.lane.b32.xlu0 %v6205_v57, %s6590_s29  ;;  %s3830_s29 = sshll.u32 %s6485_s23, 4  ;;  %s6517_s29 = int_to_ptr.vmem [resolvable:$true] %s3830_s29 }
 0x34b   : > { %s5197_s22 = scalar_lea.vmem %s6517_s29, 1024  ;;  %p5204_p2 = scmp.lt.s32.totalorder %s6517_s29, %s5202_s17 }
 0x34c   : > { %p5198_p6 = scmp.ne.s32.totalorder %s6517_s29, %s5197_s22  ;;  %p5205_p3 = scmp.lt.s32.totalorder %s5203_s28, %s5197_s22 }
 0x34e   : > { %p5199_p10 = pnand %p5198_p6, %p6592_p9  ;;  %p5206_p4 = por %p5205_p3, %p5204_p2 }
 0x350   : > { %p5200_p12 = pneg %p5199_p10 }
 0x352   : > { %p5207_p7 = pnand %p5206_p4, %p5200_p12 }
 0x388   : > { %v4786_v60 = vpop.permute.xlu0 %4785 }
 0x389   : > { %v4788_v61 = vunpack.i.h.bf16 %v4786_v60  ;;  %v4787_v63 = vunpack.i.l.bf16 %v4786_v60  ;;  %v4791_v7 = vpop.permute.xlu1 %4790  ;;  %v5009_v60 = vld [vmem:[#allocation2 + $0x280] ss:$16 sps:$4 sm:$0xff]  }
 0x38a   : > { %v4793_v19 = vunpack.i.h.bf16 %v4791_v7  ;;  %v4792_v27 = vunpack.i.l.bf16 %v4791_v7  ;;  %v5020_v7 = vld [vmem:[#allocation2 + $0x2ac] ss:$16 sps:$4 sm:$0xff]  }
 0x38b   : > { %v2082_v25 = vsel %vm740_vm5, %v5441_v20, %v4787_v63  ;;  %v2083_v53 = vsel %vm740_vm5, %v1980_v39, %v4788_v61  ;;  %v5012_v61 = vld [vmem:[#allocation2 + $0x288] ss:$16 sps:$4 sm:$0xff]   ;;  %v5017_v63 = vld [vmem:[#allocation2 + $0x2a4] ss:$16 sps:$4 sm:$0xff]  }
 0x38c   : > { %v2075_v36 = vsel %vm740_vm5, %v6051_v45, %v4793_v19  ;;  %v6216_v58 = vsel %vm740_vm5, %v5417_v3, %v4792_v27  ;;  %v2100_v21 = vpack.c.bf16 %v2083_v53, %v2082_v25  ;;  %v4999_v45 = vld [vmem:[#allocation2 + $0x244] ss:$16 sps:$4 sm:$0xff]   ;;  %v5002_v3 = vld [vmem:[#allocation2 + $0x24c] ss:$16 sps:$4 sm:$0xff]   ;;  %v5021_v25 = vld [vmem:[#allocation2 + $0x2c0] ss:$16 sps:$4 sm:$0xff]  }
 0x38d   : > { %v2099_v11 = vpack.c.bf16 %v2075_v36, %v6216_v58  ;;  %v5023_v19 = vld [vmem:[#allocation2 + $0x2c4] ss:$16 sps:$4 sm:$0xff]   ;;  %v5026_v27 = vld [vmem:[#allocation2 + $0x2cc] ss:$16 sps:$4 sm:$0xff]   ;;  %v5024_v53 = vld [vmem:[#allocation2 + $0x2c8] ss:$16 sps:$4 sm:$0xff]  }
 0x38e   : > { %2902 = vmatprep.mubr.bf16.mxu0 %v2100_v21  ;;  %3121 = vmatprep.mubr.bf16.mxu1 %v2100_v21  ;;  %v5029_v36 = vld [vmem:[#allocation2 + $0x2e4] ss:$16 sps:$4 sm:$0xff]   ;;  %v5032_v21 = vld [vmem:[#allocation2 + $0x2ec] ss:$16 sps:$4 sm:$0xff]  }
 0x38f   : > { %2903 = vmatmul.mubr.bf16.vlgmr.msra.gmra.mrb[32].mxu0 %v2099_v11  ;;  %3122 = vmatmul.mubr.bf16.vlgmr.msra.gmra.mrb[24].mxu1 %v2099_v11 }
 0x390   : > { %2944 = vmatpush1.bf16.msra.mxu0 %v4985_v8  ;;  %3163 = vmatpush1.bf16.msra.mxu1 %v4988_v10 }
 0x391   : > { %2945 = vmatprep.subr.bf16.mxu0 %v4993_v6  ;;  %3164 = vmatprep.subr.bf16.mxu1 %v4996_v42  ;;  %v5027_v42 = vld [vmem:[#allocation2 + $0x2e0] ss:$16 sps:$4 sm:$0xff]  }
 0x394   : > { %2946 = vmatpush1.bf16.msra.mxu0 %v4991_v56  ;;  %3165 = vmatpush1.bf16.msra.mxu1 %v4994_v30  ;;  %v5030_v56 = vld [vmem:[#allocation2 + $0x2e8] ss:$16 sps:$4 sm:$0xff]  }
 0x395   : > { %2947 = vmatprep.subr.bf16.mxu0 %v4999_v45  ;;  %3166 = vmatprep.subr.bf16.mxu1 %v5002_v3  ;;  %v5035_v3 = vld [vmem:[#allocation2 + $0x304] ss:$16 sps:$4 sm:$0xff]  }
 0x397   : > { %v4796_v0 = vpop.permute.xlu0 %4795 }
 0x398   : > { %v4798_v34 = vunpack.i.h.bf16 %v4796_v0  ;;  %v4797_v35 = vunpack.i.l.bf16 %v4796_v0  ;;  %v4801_v37 = vpop.permute.xlu1 %4800  ;;  %2948 = vmatpush1.bf16.msra.mxu0 %v4997_v17  ;;  %3167 = vmatpush1.bf16.msra.mxu1 %v5000_v18  ;;  %v5038_v17 = vld [vmem:[#allocation2 + $0x30c] ss:$16 sps:$4 sm:$0xff]  }
 0x399   : > { %v4803_v38 = vunpack.i.h.bf16 %v4801_v37  ;;  %v4802_v39 = vunpack.i.l.bf16 %v4801_v37  ;;  %2949 = vmatprep.subr.bf16.mxu0 %v5005_v23  ;;  %3168 = vmatprep.subr.bf16.mxu1 %v5008_v51  ;;  %v5033_v37 = vld [vmem:[#allocation2 + $0x300] ss:$16 sps:$4 sm:$0xff]  }
 0x39a   : > { %v2084_v40 = vsel %vm740_vm5, %v6164_v28, %v4797_v35  ;;  %v2085_v44 = vsel %vm740_vm5, %v6175_v15, %v4798_v34 }
 0x39b   : > { %v2077_v50 = vsel %vm740_vm5, %v6080_v4, %v4803_v38  ;;  %v2076_v54 = vsel %vm740_vm5, %v6059_v1, %v4802_v39  ;;  %v2104_v48 = vpack.c.bf16 %v2085_v44, %v2084_v40  ;;  %v5015_v1 = vld [vmem:[#allocation2 + $0x2a0] ss:$16 sps:$4 sm:$0xff]   ;;  %v5018_v4 = vld [vmem:[#allocation2 + $0x2a8] ss:$16 sps:$4 sm:$0xff]   ;;  %v5041_v39 = vld [vmem:[#allocation2 + $0x324] ss:$16 sps:$4 sm:$0xff]  }
 0x39c   : > { %v6227_v12 = vpack.c.bf16 %v2077_v50, %v2076_v54  ;;  %2950 = vmatpush1.bf16.msra.mxu0 %v5003_v32  ;;  %3169 = vmatpush1.bf16.msra.mxu1 %v5006_v22  ;;  %v5036_v38 = vld [vmem:[#allocation2 + $0x308] ss:$16 sps:$4 sm:$0xff]   ;;  %v5044_v32 = vld [vmem:[#allocation2 + $0x32c] ss:$16 sps:$4 sm:$0xff]   ;;  %v5039_v44 = vld [vmem:[#allocation2 + $0x320] ss:$16 sps:$4 sm:$0xff]  }
 0x39d   : > { %2951 = vmatprep.subr.bf16.mxu0 %v5011_v13  ;;  %3170 = vmatprep.subr.bf16.mxu1 %v5014_v59  ;;  %v5042_v50 = vld [vmem:[#allocation2 + $0x328] ss:$16 sps:$4 sm:$0xff]   ;;  %v5047_v54 = vld [vmem:[#allocation2 + $0x344] ss:$16 sps:$4 sm:$0xff]  }
 0x39e   : > { %2912 = vmatprep.mubr.bf16.mxu0 %v2104_v48  ;;  %3131 = vmatprep.mubr.bf16.mxu1 %v2104_v48  ;;  %v5050_v48 = vld [vmem:[#allocation2 + $0x34c] ss:$16 sps:$4 sm:$0xff]  }
 0x39f   : > { %2913 = vmatmul.mubr.bf16.gmra.mrb[36].mxu0 %v6227_v12  ;;  %3132 = vmatmul.mubr.bf16.gmra.mrb[28].mxu1 %v6227_v12 }
 0x3a0   : > { %2952 = vmatpush1.bf16.msra.mxu0 %v5009_v60  ;;  %3171 = vmatpush1.bf16.msra.mxu1 %v5012_v61 }
 0x3a1   : > { %2953 = vmatprep.subr.bf16.mxu0 %v5017_v63  ;;  %3172 = vmatprep.subr.bf16.mxu1 %v5020_v7 }
 0x3a4   : > { %2954 = vmatpush1.bf16.msra.mxu0 %v5015_v1  ;;  %3173 = vmatpush1.bf16.msra.mxu1 %v5018_v4 }
 0x3a5   : > { %2955 = vmatprep.subr.bf16.mxu0 %v5023_v19  ;;  %3174 = vmatprep.subr.bf16.mxu1 %v5026_v27  ;;  %v5045_v19 = vld [vmem:[#allocation2 + $0x340] ss:$16 sps:$4 sm:$0xff]   ;;  %v5048_v27 = vld [vmem:[#allocation2 + $0x348] ss:$16 sps:$4 sm:$0xff]  }
 0x3a7   : > { %v4806_v8 = vpop.permute.xlu0 %4805 }
 0x3a8   : > { %v4808_v10 = vunpack.i.h.bf16 %v4806_v8  ;;  %v4807_v11 = vunpack.i.l.bf16 %v4806_v8  ;;  %2956 = vmatpush1.bf16.msra.mxu0 %v5021_v25  ;;  %3175 = vmatpush1.bf16.msra.mxu1 %v5024_v53  ;;  %v4811_v6 = vpop.permute.xlu1 %4810  ;;  %v5056_v25 = vld [vmem:[#allocation2 + $0x36c] ss:$16 sps:$4 sm:$0xff]   ;;  %v5054_v53 = vld [vmem:[#allocation2 + $0x368] ss:$16 sps:$4 sm:$0xff]   ;;  %v5057_v8 = vld [vmem:[#allocation2 + $0x380] ss:$16 sps:$4 sm:$0xff]  }
 0x3a9   : > { %v4813_v30 = vunpack.i.h.bf16 %v4811_v6  ;;  %v4812_v45 = vunpack.i.l.bf16 %v4811_v6  ;;  %2957 = vmatprep.subr.bf16.mxu0 %v5029_v36  ;;  %3176 = vmatprep.subr.bf16.mxu1 %v5032_v21  ;;  %v5059_v36 = vld [vmem:[#allocation2 + $0x384] ss:$16 sps:$4 sm:$0xff]   ;;  %v5062_v21 = vld [vmem:[#allocation2 + $0x38c] ss:$16 sps:$4 sm:$0xff]  }
 0x3aa   : > { %v2086_v18 = vsel %vm740_vm5, %v6167_v43, %v4807_v11  ;;  %v2087_v23 = vsel %vm740_vm5, %v6192_v31, %v4808_v10  ;;  %v5060_v10 = vld [vmem:[#allocation2 + $0x388] ss:$16 sps:$4 sm:$0xff]   ;;  %v5065_v11 = vld [vmem:[#allocation2 + $0x3a4] ss:$16 sps:$4 sm:$0xff]   ;;  %v5068_v6 = vld [vmem:[#allocation2 + $0x3ac] ss:$16 sps:$4 sm:$0xff]  }
 0x3ab   : > { %v2108_v51 = vpack.c.bf16 %v2087_v23, %v2086_v18  ;;  %v2079_v0 = vsel %vm740_vm5, %v6109_v46, %v4813_v30  ;;  %v2078_v34 = vsel %vm740_vm5, %v6088_v5, %v4812_v45  ;;  %v5071_v30 = vld [vmem:[#allocation2 + $0x3c4] ss:$16 sps:$4 sm:$0xff]   ;;  %v5080_v23 = vld [vmem:[#allocation2 + $0x3ec] ss:$16 sps:$4 sm:$0xff]  }
 0x3ac   : > { %v6239_v35 = vpack.c.bf16 %v2079_v0, %v2078_v34  ;;  %2958 = vmatpush1.bf16.msra.mxu0 %v5027_v42  ;;  %3177 = vmatpush1.bf16.msra.mxu1 %v5030_v56  ;;  %v5063_v42 = vld [vmem:[#allocation2 + $0x3a0] ss:$16 sps:$4 sm:$0xff]   ;;  %v5066_v56 = vld [vmem:[#allocation2 + $0x3a8] ss:$16 sps:$4 sm:$0xff]   ;;  %v5077_v18 = vld [vmem:[#allocation2 + $0x3e4] ss:$16 sps:$4 sm:$0xff]  }
 0x3ad   : > { %2959 = vmatprep.subr.bf16.mxu0 %v5035_v3  ;;  %3178 = vmatprep.subr.bf16.mxu1 %v5038_v17  ;;  %v5069_v3 = vld [vmem:[#allocation2 + $0x3c0] ss:$16 sps:$4 sm:$0xff]   ;;  %v5072_v17 = vld [vmem:[#allocation2 + $0x3c8] ss:$16 sps:$4 sm:$0xff]  }
 0x3ae   : > { %2922 = vmatprep.mubr.bf16.mxu0 %v2108_v51  ;;  %3141 = vmatprep.mubr.bf16.mxu1 %v2108_v51  ;;  %v5075_v34 = vld [vmem:[#allocation2 + $0x3e0] ss:$16 sps:$4 sm:$0xff]  }
 0x3af   : > { %2923 = vmatmul.mubr.bf16.gmra.mrb[40].mxu0 %v6239_v35  ;;  %3142 = vmatmul.mubr.bf16.gmra.mrb[32].mxu1 %v6239_v35 }
 0x3b0   : > { %v4816_v46 = vpop.permute.xlu0 %4815  ;;  %v4821_v22 = vpop.permute.xlu1 %4820  ;;  %2960 = vmatpush1.bf16.msra.mxu0 %v5033_v37  ;;  %3179 = vmatpush1.bf16.msra.mxu1 %v5036_v38  ;;  %v5078_v37 = vld [vmem:[#allocation2 + $0x3e8] ss:$16 sps:$4 sm:$0xff]   ;;  %v5083_v38 = vld [vmem:[#allocation2 + $0x404] ss:$16 sps:$4 sm:$0xff]  }
 0x3b1   : > { %v4818_v5 = vunpack.i.h.bf16 %v4816_v46  ;;  %v4817_v13 = vunpack.i.l.bf16 %v4816_v46  ;;  %v4823_v59 = vunpack.i.h.bf16 %v4821_v22  ;;  %v4822_v40 = vunpack.i.l.bf16 %v4821_v22  ;;  %2961 = vmatprep.subr.bf16.mxu0 %v5041_v39  ;;  %3180 = vmatprep.subr.bf16.mxu1 %v5044_v32  ;;  %v5086_v39 = vld [vmem:[#allocation2 + $0x40c] ss:$16 sps:$4 sm:$0xff]  }
 0x3b3   : > { %v2081_v60 = vsel %vm740_vm5, %v6140_v24, %v4823_v59  ;;  %v2080_v61 = vsel %vm740_vm5, %v6118_v55, %v4822_v40  ;;  %v2088_v63 = vsel %vm740_vm5, %v6184_v47, %v4817_v13  ;;  %v2089_v7 = vsel %vm740_vm5, %v6195_v9, %v4818_v5  ;;  %v5053_v24 = vld [vmem:[#allocation2 + $0x364] ss:$16 sps:$4 sm:$0xff]   ;;  %v5051_v55 = vld [vmem:[#allocation2 + $0x360] ss:$16 sps:$4 sm:$0xff]   ;;  %v5084_v59 = vld [vmem:[#allocation2 + $0x408] ss:$16 sps:$4 sm:$0xff]  }
 0x3b4   : > { %v6251_v1 = vpack.c.bf16 %v2081_v60, %v2080_v61  ;;  %v2112_v4 = vpack.c.bf16 %v2089_v7, %v2088_v63  ;;  %2962 = vmatpush1.bf16.msra.mxu0 %v5039_v44  ;;  %3181 = vmatpush1.bf16.msra.mxu1 %v5042_v50  ;;  %v4826_v45 = vpop.permute.xlu0 %4825  ;;  %v4831_v22 = vpop.permute.xlu1 %4830  ;;  %v5081_v5 = vld [vmem:[#allocation2 + $0x400] ss:$16 sps:$4 sm:$0xff]   ;;  %v5089_v50 = vld [vmem:[#allocation2 + $0x424] ss:$16 sps:$4 sm:$0xff]   ;;  %v5098_v63 = vld [vmem:[#allocation2 + $0x44c] ss:$16 sps:$4 sm:$0xff]  }
 0x3b5   : > { %2963 = vmatprep.subr.bf16.mxu0 %v5047_v54  ;;  %3182 = vmatprep.subr.bf16.mxu1 %v5050_v48  ;;  %v4828_v51 = vunpack.i.h.bf16 %v4826_v45  ;;  %v4827_v0 = vunpack.i.l.bf16 %v4826_v45  ;;  %v4833_v40 = vunpack.i.h.bf16 %v4831_v22  ;;  %v4832_v44 = vunpack.i.l.bf16 %v4831_v22  ;;  %v5092_v54 = vld [vmem:[#allocation2 + $0x42c] ss:$16 sps:$4 sm:$0xff]   ;;  %v5095_v48 = vld [vmem:[#allocation2 + $0x444] ss:$16 sps:$4 sm:$0xff]  }
 0x3b6   : > { %2932 = vmatprep.mubr.bf16.mxu0 %v2112_v4  ;;  %3151 = vmatprep.mubr.bf16.mxu1 %v2112_v4  ;;  %v5110_v45 = vld [vmem:[%s6573_s7 + $0xc8] sm:$0xff]  }
 0x3b7   : > { %2933 = vmatmul.mubr.bf16.gmra.mrb[44].mxu0 %v6251_v1  ;;  %3152 = vmatmul.mubr.bf16.gmra.mrb[36].mxu1 %v6251_v1  ;;  %v2091_v32 = vsel %vm740_vm5, %v6093_v14, %v4828_v51  ;;  %v2090_v46 = vsel %vm740_vm5, %v6064_v41, %v4827_v0  ;;  %v5087_v14 = vld [vmem:[#allocation2 + $0x420] ss:$16 sps:$4 sm:$0xff]   ;;  %v5090_v41 = vld [vmem:[#allocation2 + $0x428] ss:$16 sps:$4 sm:$0xff]   ;;  %v2092_v60 = vsel %vm740_vm5, %v6096_v16, %v4832_v44 }
 0x3b8   : > { %2964 = vmatpush1.bf16.msra.mxu0 %v5045_v19  ;;  %3183 = vmatpush1.bf16.msra.mxu1 %v5048_v27  ;;  %v2101_v13 = vpack.c.bf16 %v2091_v32, %v2090_v46  ;;  %v2093_v61 = vsel %vm740_vm5, %v6126_v62, %v4833_v40  ;;  %v4836_v7 = vpop.permute.xlu0 %4835  ;;  %v4841_v4 = vpop.permute.xlu1 %4840  ;;  %v5093_v27 = vld [vmem:[#allocation2 + $0x440] ss:$16 sps:$4 sm:$0xff]   ;;  %v5117_v0 = vld [vmem:[%s6573_s7 + $0x58] sm:$0xff]   ;;  %v5125_v22 = vld [vmem:[%s6573_s7 + $0x68] sm:$0xff]  }
 0x3b9   : > { %2975 = vmatprep.mubr.bf16.mxu0 %v6227_v12  ;;  %3194 = vmatprep.mubr.bf16.mxu1 %v6227_v12  ;;  %v5074_v12 = vld [vmem:[#allocation2 + $0x3cc] ss:$16 sps:$4 sm:$0xff]   ;;  %v2105_v19 = vpack.c.bf16 %v2093_v61, %v2092_v60  ;;  %v4842_v16 = vunpack.i.l.bf16 %v4841_v4  ;;  %v5099_v62 = vld [vmem:[#allocation2 + $0x460] ss:$16 sps:$4 sm:$0xff]  }
 0x3ba   : > { %2965 = vmatprep.subr.bf16.mxu0 %v5053_v24  ;;  %3184 = vmatprep.subr.bf16.mxu1 %v5056_v25  ;;  %v4838_v24 = vunpack.i.h.bf16 %v4836_v7  ;;  %v4837_v25 = vunpack.i.l.bf16 %v4836_v7  ;;  %v5116_v51 = vld [vmem:[%s6573_s7 + $0x90] sm:$0xff]   ;;  %v5123_v32 = vld [vmem:[%s6573_s7 + $0x20] sm:$0xff]   ;;  %v5133_v40 = vld [vmem:[%s6573_s7 + $0x78] sm:$0xff]  }
 0x3bb   : > { %v5124_v46 = vld [vmem:[%s6573_s7 + $0xa0] sm:$0xff]   ;;  %v5134_v44 = vld [vmem:[%s6573_s7 + $0xf8] sm:$0xff]  }
 0x3bc   : > { %2966 = vmatpush1.bf16.msra.mxu0 %v5051_v55  ;;  %3185 = vmatpush1.bf16.msra.mxu1 %v5054_v53  ;;  %v5101_v55 = vld [vmem:[#allocation2 + $0x464] ss:$16 sps:$4 sm:$0xff]   ;;  %v5104_v53 = vld [vmem:[#allocation2 + $0x46c] ss:$16 sps:$4 sm:$0xff]   ;;  %v2116_v61 = vld [vmem:[%s6572_s6] sm:$0xf] }
 0x3bd   : > { %2967 = vmatprep.subr.bf16.mxu0 %v5059_v36  ;;  %3186 = vmatprep.subr.bf16.mxu1 %v5062_v21  ;;  %v5102_v36 = vld [vmem:[#allocation2 + $0x468] ss:$16 sps:$4 sm:$0xff]   ;;  %v2094_v21 = vsel %vm740_vm5, %v6129_v26, %v4837_v25  ;;  %v4843_v26 = vunpack.i.h.bf16 %v4841_v4 }
 0x3c0   : > { %2968 = vmatpush1.bf16.msra.mxu0 %v5057_v8  ;;  %3187 = vmatpush1.bf16.msra.mxu1 %v5060_v10  ;;  %v2095_v8 = vsel %vm740_vm5, %v6154_v33, %v4838_v24  ;;  %v5105_v10 = vld [vmem:[%s6573_s7 + $0x40] sm:$0xff]   ;;  %v2061_v33 = vpop.permute.xlu0 %2060 }
 0x3c1   : > { %2969 = vmatprep.subr.bf16.mxu0 %v5065_v11  ;;  %3188 = vmatprep.subr.bf16.mxu1 %v5068_v6  ;;  %v2098_v11 = vsel %vm740_vm5, %v6150_v52, %v4842_v16  ;;  %v2109_v6 = vpack.c.bf16 %v2095_v8, %v2094_v21 }
 0x3c4   : > { %2970 = vmatpush1.bf16.msra.mxu0 %v5063_v42  ;;  %3189 = vmatpush1.bf16.msra.mxu1 %v5066_v56  ;;  %v2114_v42 = vpack.c.bf16 %v6216_v58, %v2098_v11  ;;  %v2096_v56 = vsel %vm740_vm5, %v6157_v29, %v4843_v26  ;;  %v2103_v58 = vpack.c.bf16 %v6175_v15, %v6164_v28  ;;  %v5108_v29 = vld [vmem:[%s6573_s7 + $0x80] sm:$0xff]   ;;  %v5111_v28 = vld [vmem:[%s6573_s7 + $0x8] sm:$0xff]  }
 0x3c5   : > { %2971 = vmatprep.subr.bf16.mxu0 %v5071_v30  ;;  %3190 = vmatprep.subr.bf16.mxu1 %v5074_v12  ;;  %v2097_v30 = vsel %vm740_vm5, %v6187_v49, %v2061_v33  ;;  %v5107_v12 = vld [vmem:[%s6573_s7] sm:$0xff]   ;;  %v5109_v49 = vld [vmem:[%s6573_s7 + $0x48] sm:$0xff]  }
 0x3c6   : > { %v2113_v52 = vpack.c.bf16 %v2097_v30, %v2096_v56  ;;  %v5112_v15 = vld [vmem:[%s6573_s7 + $0x88] sm:$0xff]  }
 0x3c8   : > { %2972 = vmatpush1.bf16.msra.mxu0 %v5069_v3  ;;  %3191 = vmatpush1.bf16.msra.mxu1 %v5072_v17  ;;  %v5113_v3 = vld [vmem:[%s6573_s7 + $0x50] sm:$0xff]  }
 0x3c9   : > { %2973 = vmatprep.subr.bf16.mxu0 %v5077_v18  ;;  %3192 = vmatprep.subr.bf16.mxu1 %v5080_v23  ;;  %v5114_v17 = vld [vmem:[%s6573_s7 + $0xd0] sm:$0xff]   ;;  %v2107_v18 = vpack.c.bf16 %v6192_v31, %v6167_v43  ;;  %v5118_v43 = vld [vmem:[%s6573_s7 + $0xd8] sm:$0xff]  }
 0x3ca   : > { %v5115_v23 = vld [vmem:[%s6573_s7 + $0x10] sm:$0xff]   ;;  %v5119_v31 = vld [vmem:[%s6573_s7 + $0x18] sm:$0xff]  }
 0x3cc   : > { %2974 = vmatpush1.bf16.msra.mxu0 %v5075_v34  ;;  %3193 = vmatpush1.bf16.msra.mxu1 %v5078_v37  ;;  %v5120_v34 = vld [vmem:[%s6573_s7 + $0x98] sm:$0xff]   ;;  %v5121_v37 = vld [vmem:[%s6573_s7 + $0x60] sm:$0xff]  }
 0x3cd   : > { %3016 = vmatprep.subr.bf16.mxu0 %v5083_v38  ;;  %3235 = vmatprep.subr.bf16.mxu1 %v5086_v39  ;;  %v5122_v38 = vld [vmem:[%s6573_s7 + $0xe0] sm:$0xff]   ;;  %v2111_v39 = vpack.c.bf16 %v6195_v9, %v6184_v47  ;;  %v5126_v47 = vld [vmem:[%s6573_s7 + $0xe8] sm:$0xff]   ;;  %v2115_v9 = vpack.c.bf16 %v5441_v20, %v6205_v57  ;;  %v5130_v20 = vld [vmem:[%s6573_s7 + $0xf0] sm:$0xff]  }
 0x3ce   : > { %v5131_v57 = vld [vmem:[%s6573_s7 + $0x30] sm:$0xff]  }
 0x3cf   : > { %2976 = vmatmul.mubr.bf16.vlgmr.msra.gmra.mrb[32].mxu0 %v2101_v13  ;;  %3195 = vmatmul.mubr.bf16.vlgmr.msra.gmra.mrb[24].mxu1 %v2101_v13  ;;  %v5128_v13 = vld [vmem:[%s6573_s7 + $0xa8] sm:$0xff]  }
 0x3d0   : > { %2985 = vmatprep.mubr.bf16.mxu0 %v6239_v35  ;;  %3017 = vmatpush1.bf16.msra.mxu0 %v5081_v5  ;;  %v5127_v5 = vld [vmem:[%s6573_s7 + $0x28] sm:$0xff]  }
 0x3d1   : > { %3204 = vmatprep.mubr.bf16.mxu1 %v6239_v35  ;;  %3236 = vmatpush1.bf16.msra.mxu1 %v5084_v59  ;;  %v5096_v35 = vld [vmem:[#allocation2 + $0x448] ss:$16 sps:$4 sm:$0xff]   ;;  %v5132_v59 = vld [vmem:[%s6573_s7 + $0xb0] sm:$0xff]  }
 0x3d2   : > { %3018 = vmatprep.subr.bf16.mxu0 %v5089_v50  ;;  %3237 = vmatprep.subr.bf16.mxu1 %v5092_v54  ;;  %v5135_v50 = vld [vmem:[%s6573_s7 + $0x38] sm:$0xff]  }
 0x3d3   : > { %v5136_v54 = vld [vmem:[%s6573_s7 + $0xb8] sm:$0xff]  }
 0x3d4   : > { %3019 = vmatpush1.bf16.msra.mxu0 %v5087_v14  ;;  %v2118_v14 = vlaneseq }
 0x3d5   : > { %3238 = vmatpush1.bf16.msra.mxu1 %v5090_v41  ;;  %3020 = vmatprep.subr.bf16.mxu0 %v5095_v48 }
 0x3d6   : > { %3239 = vmatprep.subr.bf16.mxu1 %v5098_v63  ;;  %v2119_v41 = vshrl.u32 %v2118_v14, 7 }
 0x3d7   : > { %2986 = vmatmul.mubr.bf16.gmra.mrb[36].mxu0 %v2105_v19  ;;  %3205 = vmatmul.mubr.bf16.gmra.mrb[28].mxu1 %v2105_v19 }
 0x3d8   : > { %2995 = vmatprep.mubr.bf16.mxu0 %v6251_v1  ;;  %3214 = vmatprep.mubr.bf16.mxu1 %v6251_v1  ;;  %v5106_v1 = vld [vmem:[%s6573_s7 + $0xc0] sm:$0xff]   ;;  %v2120_v48 = vsub.s32 0, %v2119_v41  ;;  %v2128_v60 = vsub.s32 2, %v2119_v41  ;;  %v2124_v63 = vsub.s32 1, %v2119_v41  ;;  %v2132_v7 = vsub.s32 3, %v2119_v41 }
 0x3d9   : > { %3021 = vmatpush1.bf16.msra.mxu0 %v5093_v27  ;;  %3240 = vmatpush1.bf16.msra.mxu1 %v5096_v35 }
 0x3da   : > { %3022 = vmatprep.subr.bf16.mxu0 %v5101_v55  ;;  %3241 = vmatprep.subr.bf16.mxu1 %v5104_v53  ;;  %v6404_v4 = vrot.slane %v2116_v61, %v2120_v48  ;;  %v6406_v19 = vrot.slane %v2116_v61, %v2128_v60  ;;  %v6408_v27 = vrot.slane %v2116_v61, %v2124_v63 }
 0x3db   : > { %v6410_v35 = vrot.slane %v2116_v61, %v2132_v7 }
 0x3dd   : > { %3023 = vmatpush1.bf16.msra.mxu0 %v5099_v62  ;;  %3242 = vmatpush1.bf16.msra.mxu1 %v5102_v36 }
 0x3de   : > { %4273 = vmatprep.subr.bf16.mxu0 %v5105_v10  ;;  %4313 = vmatprep.subr.bf16.mxu1 %v5106_v1 }
 0x3df   : > { %2996 = vmatmul.mubr.bf16.gmra.mrb[40].mxu0 %v2109_v6  ;;  %3215 = vmatmul.mubr.bf16.gmra.mrb[32].mxu1 %v2109_v6 }
 0x3e0   : > { %3005 = vmatprep.mubr.bf16.mxu0 %v2114_v42  ;;  %3224 = vmatprep.mubr.bf16.mxu1 %v2114_v42 }
 0x3e7   : > { %3006 = vmatmul.mubr.bf16.gmra.mrb[44].mxu0 %v2113_v52  ;;  %3225 = vmatmul.mubr.bf16.gmra.mrb[36].mxu1 %v2113_v52 }
 0x3e8   : > { %3048 = vmatprep.mubr.bf16.mxu0 %v5269_v2  ;;  %3267 = vmatprep.mubr.bf16.mxu1 %v5269_v2 }
 0x3ef   : > { %4112 = vmatmul.mubr.msk.bf16.vlgmr.msra.gmra.mrb[32].mxu0 %vm740_vm5, %v2103_v58  ;;  %4116 = vmatmul.mubr.msk.bf16.vlgmr.msra.gmra.mrb[24].mxu1 %vm740_vm5, %v2103_v58 }
 0x3f0   : > { %3058 = vmatprep.mubr.bf16.mxu0 %v5269_v2  ;;  %3277 = vmatprep.mubr.bf16.mxu1 %v5269_v2 }
 0x3f1   : > { %4274 = vmatpush3.bf16.msra.mxu0 %v5107_v12  ;;  %4314 = vmatpush3.bf16.msra.mxu1 %v5108_v29 }
 0x3f2   : > { %4275 = vmatprep.subr.bf16.mxu0 %v5109_v49  ;;  %4315 = vmatprep.subr.bf16.mxu1 %v5110_v45 }
 0x3f5   : > { %4276 = vmatpush3.bf16.msra.mxu0 %v5111_v28  ;;  %4316 = vmatpush3.bf16.msra.mxu1 %v5112_v15 }
 0x3f6   : > { %4277 = vmatprep.subr.bf16.mxu0 %v5113_v3  ;;  %4317 = vmatprep.subr.bf16.mxu1 %v5114_v17 }
 0x3f7   : > { %4113 = vmatmul.mubr.msk.bf16.gmra.mrb[36].mxu0 %vm740_vm5, %v2107_v18  ;;  %4117 = vmatmul.mubr.msk.bf16.gmra.mrb[28].mxu1 %vm740_vm5, %v2107_v18 }
 0x3f8   : > { %3068 = vmatprep.mubr.bf16.mxu0 %v5269_v2  ;;  %3287 = vmatprep.mubr.bf16.mxu1 %v5269_v2 }
 0x3f9   : > { %4278 = vmatpush3.bf16.msra.mxu0 %v5115_v23  ;;  %4318 = vmatpush3.bf16.msra.mxu1 %v5116_v51 }
 0x3fa   : > { %4279 = vmatprep.subr.bf16.mxu0 %v5117_v0  ;;  %4319 = vmatprep.subr.bf16.mxu1 %v5118_v43 }
 0x3fd   : > { %4280 = vmatpush3.bf16.msra.mxu0 %v5119_v31  ;;  %4320 = vmatpush3.bf16.msra.mxu1 %v5120_v34 }
 0x3fe   : > { %4281 = vmatprep.subr.bf16.mxu0 %v5121_v37  ;;  %4321 = vmatprep.subr.bf16.mxu1 %v5122_v38 }
 0x3ff   : > { %4114 = vmatmul.mubr.msk.bf16.gmra.mrb[40].mxu0 %vm740_vm5, %v2111_v39  ;;  %4118 = vmatmul.mubr.msk.bf16.gmra.mrb[32].mxu1 %vm740_vm5, %v2111_v39 }
 0x400   : > { %3078 = vmatprep.mubr.bf16.mxu0 %v5269_v2  ;;  %3297 = vmatprep.mubr.bf16.mxu1 %v5269_v2  ;;  %v5129_v2 = vld [vmem:[%s6573_s7 + $0x70] sm:$0xff]  }
 0x401   : > { %4282 = vmatpush3.bf16.msra.mxu0 %v5123_v32  ;;  %4322 = vmatpush3.bf16.msra.mxu1 %v5124_v46 }
 0x402   : > { %4283 = vmatprep.subr.bf16.mxu0 %v5125_v22  ;;  %4323 = vmatprep.subr.bf16.mxu1 %v5126_v47 }
 0x405   : > { %4284 = vmatpush3.bf16.msra.mxu0 %v5127_v5  ;;  %4324 = vmatpush3.bf16.msra.mxu1 %v5128_v13 }
 0x406   : > { %4285 = vmatprep.subr.bf16.mxu0 %v5129_v2  ;;  %4325 = vmatprep.subr.bf16.mxu1 %v5130_v20 }
 0x407   : > { %4115 = vmatmul.mubr.msk.bf16.gmra.mrb[44].mxu0 %vm740_vm5, %v2115_v9  ;;  %4119 = vmatmul.mubr.msk.bf16.gmra.mrb[36].mxu1 %vm740_vm5, %v2115_v9 }
 0x409   : > { %4286 = vmatpush3.bf16.msra.mxu0 %v5131_v57  ;;  %4326 = vmatpush3.bf16.msra.mxu1 %v5132_v59 }
 0x40a   : > { %4287 = vmatprep.subr.bf16.mxu0 %v5133_v40  ;;  %4327 = vmatprep.subr.bf16.mxu1 %v5134_v44 }
 0x40d   : > { %4288 = vmatpush3.bf16.msra.mxu0 %v5135_v50  ;;  %4328 = vmatpush3.bf16.msra.mxu1 %v5136_v54 }
 0x4c2   : > { %v3050_v24 = vpop.f32.mrb[32].mxu0  ;;  %v3269_v25 = vpop.f32.mrb[24].mxu1 }
 0x4c3   : > { %v4365_v55 = vadd.f32 %v3050_v24, %v6404_v4  ;;  %v4381_v53 = vadd.f32 %v3269_v25, %v6406_v19  ;;  %v3052_v16 = vpop.f32.mrb[33].mxu0  ;;  %v3271_v62 = vpop.f32.mrb[25].mxu1 }
 0x4c4   : > { %v4366_v36 = vadd.f32 %v3052_v16, %v6408_v27  ;;  %v4382_v21 = vadd.f32 %v3271_v62, %v6410_v35  ;;  %v3054_v8 = vpop.f32.mrb[34].mxu0  ;;  %v3273_v10 = vpop.f32.mrb[26].mxu1 }
 0x4c5   : > { %v4367_v1 = vadd.f32 %v3054_v8, %v6404_v4  ;;  %v4383_v11 = vadd.f32 %v3273_v10, %v6406_v19  ;;  %v3056_v6 = vpop.f32.mrb[35].mxu0  ;;  %v3275_v26 = vpop.f32.mrb[27].mxu1  ;;  %v3308_v56 = vmax.f32 %v4365_v55, 0.0  ;;  %v3310_v30 = vmax.f32 %v4381_v53, 0.0 }
 0x4c6   : > { %v4368_v42 = vadd.f32 %v3056_v6, %v6408_v27  ;;  %v4384_v33 = vadd.f32 %v3275_v26, %v6410_v35  ;;  %v3309_v12 = vmax.f32 %v4366_v36, 0.0  ;;  %v3311_v29 = vmax.f32 %v4382_v21, 0.0 }
 0x4c7   : > { %v3312_v52 = vmax.f32 %v4367_v1, 0.0  ;;  %v3314_v58 = vmax.f32 %v4383_v11, 0.0 }
 0x4c8   : > { %v3313_v49 = vmax.f32 %v4368_v42, 0.0  ;;  %v3315_v45 = vmax.f32 %v4384_v33, 0.0 }
 0x4c9   : > { %v3340_v28 = vpack.c.bf16 %v3312_v52, %v3308_v56  ;;  %v3342_v15 = vpack.c.bf16 %v3314_v58, %v3310_v30 }
 0x4ca   : > { %v3341_v3 = vpack.c.bf16 %v3313_v49, %v3309_v12  ;;  %v3343_v17 = vpack.c.bf16 %v3315_v45, %v3311_v29  ;;  %v3060_v18 = vpop.f32.mrb[36].mxu0  ;;  %v3279_v23 = vpop.f32.mrb[28].mxu1 }
 0x4cb   : > { %v4369_v51 = vadd.f32 %v3060_v18, %v6404_v4  ;;  %v4385_v0 = vadd.f32 %v3279_v23, %v6406_v19  ;;  %v3062_v43 = vpop.f32.mrb[37].mxu0  ;;  %v3281_v31 = vpop.f32.mrb[29].mxu1 }
 0x4cc   : > { %v4370_v34 = vadd.f32 %v3062_v43, %v6408_v27  ;;  %v4386_v37 = vadd.f32 %v3281_v31, %v6410_v35  ;;  %v3064_v38 = vpop.f32.mrb[38].mxu0  ;;  %v3283_v39 = vpop.f32.mrb[30].mxu1  ;;  %3651 = vmatprep.mubr.bf16.mxu0 %v3341_v3  ;;  %3716 = vmatprep.mubr.bf16.mxu1 %v3343_v17 }
 0x4cd   : > { %v4371_v32 = vadd.f32 %v3064_v38, %v6404_v4  ;;  %v4387_v46 = vadd.f32 %v3283_v39, %v6406_v19  ;;  %v3066_v22 = vpop.f32.mrb[39].mxu0  ;;  %v3285_v47 = vpop.f32.mrb[31].mxu1  ;;  %3652 = vmatmul.mubr.bf16.vlgmr.msra.gmra.mrb[48].mxu0 %v3340_v28  ;;  %3717 = vmatmul.mubr.bf16.vlgmr.msra.gmra.mrb[40].mxu1 %v3342_v15  ;;  %v3316_v13 = vmax.f32 %v4369_v51, 0.0  ;;  %v3318_v2 = vmax.f32 %v4385_v0, 0.0 }
 0x4ce   : > { %v4372_v9 = vadd.f32 %v3066_v22, %v6408_v27  ;;  %v4388_v5 = vadd.f32 %v3285_v47, %v6410_v35  ;;  %v3317_v59 = vmax.f32 %v4370_v34, 0.0  ;;  %v3319_v40 = vmax.f32 %v4386_v37, 0.0 }
 0x4cf   : > { %v3320_v20 = vmax.f32 %v4371_v32, 0.0  ;;  %v3322_v57 = vmax.f32 %v4387_v46, 0.0 }
 0x4d0   : > { %v3321_v44 = vmax.f32 %v4372_v9, 0.0  ;;  %v3323_v50 = vmax.f32 %v4388_v5, 0.0 }
 0x4d1   : > { %v3344_v54 = vpack.c.bf16 %v3320_v20, %v3316_v13  ;;  %v3346_v41 = vpack.c.bf16 %v3322_v57, %v3318_v2 }
 0x4d2   : > { %v3345_v48 = vpack.c.bf16 %v3321_v44, %v3317_v59  ;;  %v3347_v60 = vpack.c.bf16 %v3323_v50, %v3319_v40  ;;  %v3070_v61 = vpop.f32.mrb[40].mxu0  ;;  %v3289_v63 = vpop.f32.mrb[32].mxu1 }
 0x4d3   : > { %v4373_v7 = vadd.f32 %v3070_v61, %v6404_v4  ;;  %v4389_v24 = vadd.f32 %v3289_v63, %v6406_v19  ;;  %v3072_v25 = vpop.f32.mrb[41].mxu0  ;;  %v3291_v55 = vpop.f32.mrb[33].mxu1 }
 0x4d4   : > { %v4374_v53 = vadd.f32 %v3072_v25, %v6408_v27  ;;  %v4390_v16 = vadd.f32 %v3291_v55, %v6410_v35  ;;  %v3074_v62 = vpop.f32.mrb[42].mxu0  ;;  %v3293_v36 = vpop.f32.mrb[34].mxu1  ;;  %3659 = vmatprep.mubr.bf16.mxu0 %v3345_v48  ;;  %3724 = vmatprep.mubr.bf16.mxu1 %v3347_v60 }
 0x4d5   : > { %v4375_v21 = vadd.f32 %v3074_v62, %v6404_v4  ;;  %v4391_v8 = vadd.f32 %v3293_v36, %v6406_v19  ;;  %v3076_v10 = vpop.f32.mrb[43].mxu0  ;;  %v3295_v1 = vpop.f32.mrb[35].mxu1  ;;  %3660 = vmatmul.mubr.bf16.gmra.mrb[52].mxu0 %v3344_v54  ;;  %3725 = vmatmul.mubr.bf16.gmra.mrb[44].mxu1 %v3346_v41  ;;  %v3324_v26 = vmax.f32 %v4373_v7, 0.0  ;;  %v3326_v42 = vmax.f32 %v4389_v24, 0.0 }
 0x4d6   : > { %v4376_v11 = vadd.f32 %v3076_v10, %v6408_v27  ;;  %v4392_v6 = vadd.f32 %v3295_v1, %v6410_v35  ;;  %v3325_v30 = vmax.f32 %v4374_v53, 0.0  ;;  %v3327_v52 = vmax.f32 %v4390_v16, 0.0 }
 0x4d7   : > { %v3328_v33 = vmax.f32 %v4375_v21, 0.0  ;;  %v3330_v56 = vmax.f32 %v4391_v8, 0.0 }
 0x4d8   : > { %v3329_v58 = vmax.f32 %v4376_v11, 0.0  ;;  %v3331_v12 = vmax.f32 %v4392_v6, 0.0 }
 0x4d9   : > { %v3348_v29 = vpack.c.bf16 %v3328_v33, %v3324_v26  ;;  %v3350_v49 = vpack.c.bf16 %v3330_v56, %v3326_v42 }
 0x4da   : > { %v3349_v45 = vpack.c.bf16 %v3329_v58, %v3325_v30  ;;  %v3351_v28 = vpack.c.bf16 %v3331_v12, %v3327_v52  ;;  %v3080_v15 = vpop.f32.mrb[44].mxu0  ;;  %v3299_v3 = vpop.f32.mrb[36].mxu1 }
 0x4db   : > { %v4377_v17 = vadd.f32 %v3080_v15, %v6404_v4  ;;  %v4393_v18 = vadd.f32 %v3299_v3, %v6406_v19  ;;  %v3082_v23 = vpop.f32.mrb[45].mxu0  ;;  %v3301_v51 = vpop.f32.mrb[37].mxu1 }
 0x4dc   : > { %v4378_v0 = vadd.f32 %v3082_v23, %v6408_v27  ;;  %v4394_v43 = vadd.f32 %v3301_v51, %v6410_v35  ;;  %v3084_v31 = vpop.f32.mrb[46].mxu0  ;;  %v3303_v34 = vpop.f32.mrb[38].mxu1  ;;  %3667 = vmatprep.mubr.bf16.mxu0 %v3349_v45  ;;  %3732 = vmatprep.mubr.bf16.mxu1 %v3351_v28 }
 0x4dd   : > { %v4379_v37 = vadd.f32 %v3084_v31, %v6404_v4  ;;  %v4395_v38 = vadd.f32 %v3303_v34, %v6406_v19  ;;  %v3086_v39 = vpop.f32.mrb[47].mxu0  ;;  %v3305_v32 = vpop.f32.mrb[39].mxu1  ;;  %3668 = vmatmul.mubr.bf16.gmra.mrb[56].mxu0 %v3348_v29  ;;  %3733 = vmatmul.mubr.bf16.gmra.mrb[48].mxu1 %v3350_v49  ;;  %v3332_v47 = vmax.f32 %v4377_v17, 0.0  ;;  %v3334_v9 = vmax.f32 %v4393_v18, 0.0 }
 0x4de   : > { %v4380_v46 = vadd.f32 %v3086_v39, %v6408_v27  ;;  %v4396_v22 = vadd.f32 %v3305_v32, %v6410_v35  ;;  %v3333_v2 = vmax.f32 %v4378_v0, 0.0  ;;  %v3335_v20 = vmax.f32 %v4394_v43, 0.0  ;;  %v6447_v35 = vld [vmem:[%s6574_s8] ss:$0 sm:$0xff] }
 0x4df   : > { %v3336_v5 = vmax.f32 %v4379_v37, 0.0  ;;  %v3338_v13 = vmax.f32 %v4395_v38, 0.0 }
 0x4e0   : > { %v3337_v57 = vmax.f32 %v4380_v46, 0.0  ;;  %v3339_v59 = vmax.f32 %v4396_v22, 0.0 }
 0x4e1   : > { %v3352_v40 = vpack.c.bf16 %v3336_v5, %v3332_v47  ;;  %v3354_v4 = vpack.c.bf16 %v3338_v13, %v3334_v9 }
 0x4e2   : > { %v3353_v44 = vpack.c.bf16 %v3337_v57, %v3333_v2  ;;  %v3355_v19 = vpack.c.bf16 %v3339_v59, %v3335_v20 }
 0x4e4   : > { %3675 = vmatprep.mubr.bf16.mxu0 %v3353_v44  ;;  %3740 = vmatprep.mubr.bf16.mxu1 %v3355_v19 }
 0x4e5   : > { %3676 = vmatmul.mubr.bf16.gmra.mrb[60].mxu0 %v3352_v40  ;;  %3741 = vmatmul.mubr.bf16.gmra.mrb[52].mxu1 %v3354_v4 }
 0x5a0   : > { %v4289_v50 = vpop.f32.mrb[48].mxu0  ;;  %v4329_v27 = vpop.f32.mrb[40].mxu1 }
 0x5a1   : > { %v4290_v54 = vpop.f32.mrb[49].mxu0  ;;  %v4330_v41 = vpop.f32.mrb[41].mxu1 }
 0x5a2   : > { %v4291_v48 = vadd.f32 %v4290_v54, %v4289_v50  ;;  %v4331_v60 = vadd.f32 %v4330_v41, %v4329_v27  ;;  %v4292_v61 = vpop.f32.mrb[50].mxu0  ;;  %v4332_v63 = vpop.f32.mrb[42].mxu1 }
 0x5a3   : > { %v4293_v7 = vpop.f32.mrb[51].mxu0  ;;  %v4333_v24 = vpop.f32.mrb[43].mxu1 }
 0x5a4   : > { %v3654_v25 = vadd.f32 %v4291_v48, %v6447_v35  ;;  %v4294_v55 = vadd.f32 %v4293_v7, %v4292_v61  ;;  %v4334_v53 = vadd.f32 %v4333_v24, %v4332_v63  ;;  %v6475_v48 = vand.u32 127, %v2118_v14 }
 0x5a6   : > { %v6450_v16 = vadd.f32 %v4331_v60, %v3654_v25  ;;  %v3657_v62 = vadd.f32 %v4294_v55, %v6447_v35  ;;  %vm3751_vm10 = vcmp.eq.s32.totalorder %v6475_v48, 0 }
 0x5a8   : > { %v4153_v36 = vmul.f32 -1.442695, %v6450_v16  ;;  %v6454_v21 = vadd.f32 %v4334_v53, %v3657_v62  ;;  %v4295_v8 = vpop.f32.mrb[52].mxu0  ;;  %v4335_v10 = vpop.f32.mrb[44].mxu1 }
 0x5a9   : > { %v4296_v1 = vpop.f32.mrb[53].mxu0  ;;  %v4336_v11 = vpop.f32.mrb[45].mxu1 }
 0x5aa   : > { %5137 = vpow2.f32 %v4153_v36  ;;  %v4154_v6 = vmul.f32 -1.442695, %v6454_v21  ;;  %v4297_v26 = vadd.f32 %v4296_v1, %v4295_v8  ;;  %v4337_v42 = vadd.f32 %v4336_v11, %v4335_v10  ;;  %v4298_v33 = vpop.f32.mrb[54].mxu0  ;;  %v4338_v56 = vpop.f32.mrb[46].mxu1 }
 0x5ab   : > { %v4299_v30 = vpop.f32.mrb[55].mxu0  ;;  %v4339_v52 = vpop.f32.mrb[47].mxu1 }
 0x5ac   : > { %5139 = vpow2.f32 %v4154_v6  ;;  %v3662_v58 = vadd.f32 %v4297_v26, %v6447_v35  ;;  %v4300_v12 = vadd.f32 %v4299_v30, %v4298_v33  ;;  %v4340_v29 = vadd.f32 %v4339_v52, %v4338_v56 }
 0x5ae   : > { %v6458_v49 = vadd.f32 %v4337_v42, %v3662_v58  ;;  %v3665_v45 = vadd.f32 %v4300_v12, %v6447_v35 }
 0x5b0   : > { %v4155_v28 = vmul.f32 -1.442695, %v6458_v49  ;;  %v6462_v15 = vadd.f32 %v4340_v29, %v3665_v45  ;;  %v4301_v3 = vpop.f32.mrb[56].mxu0  ;;  %v4341_v17 = vpop.f32.mrb[48].mxu1 }
 0x5b1   : > { %v4302_v18 = vpop.f32.mrb[57].mxu0  ;;  %v4342_v23 = vpop.f32.mrb[49].mxu1 }
 0x5b2   : > { %5141 = vpow2.f32 %v4155_v28  ;;  %v4156_v51 = vmul.f32 -1.442695, %v6462_v15  ;;  %v4303_v0 = vadd.f32 %v4302_v18, %v4301_v3  ;;  %v4343_v43 = vadd.f32 %v4342_v23, %v4341_v17  ;;  %v4304_v31 = vpop.f32.mrb[58].mxu0  ;;  %v4344_v34 = vpop.f32.mrb[50].mxu1 }
 0x5b3   : > { %v4305_v37 = vpop.f32.mrb[59].mxu0  ;;  %v4345_v38 = vpop.f32.mrb[51].mxu1 }
 0x5b4   : > { %v5138_v39 = vpop.eup %5137  ;;  %5143 = vpow2.f32 %v4156_v51  ;;  %v3670_v32 = vadd.f32 %v4303_v0, %v6447_v35  ;;  %v4306_v46 = vadd.f32 %v4305_v37, %v4304_v31  ;;  %v4346_v22 = vadd.f32 %v4345_v38, %v4344_v34 }
 0x5b5   : > { %v3776_v47 = vadd.f32 1.0, %v5138_v39 }
 0x5b6   : > { %v5140_v9 = vpop.eup %5139  ;;  %v6466_v5 = vadd.f32 %v4343_v43, %v3670_v32  ;;  %v3673_v13 = vadd.f32 %v4306_v46, %v6447_v35 }
 0x5b7   : > { %5145 = vrcp.f32 %v3776_v47  ;;  %v3777_v2 = vadd.f32 1.0, %v5140_v9 }
 0x5b8   : > { %v4157_v20 = vmul.f32 -1.442695, %v6466_v5  ;;  %v6470_v57 = vadd.f32 %v4346_v22, %v3673_v13  ;;  %v4307_v59 = vpop.f32.mrb[60].mxu0  ;;  %v4347_v40 = vpop.f32.mrb[52].mxu1 }
 0x5b9   : > { %5147 = vrcp.f32 %v3777_v2  ;;  %v4308_v4 = vpop.f32.mrb[61].mxu0  ;;  %v4348_v44 = vpop.f32.mrb[53].mxu1 }
 0x5ba   : > { %5149 = vpow2.f32 %v4157_v20  ;;  %v4158_v19 = vmul.f32 -1.442695, %v6470_v57  ;;  %v4309_v50 = vadd.f32 %v4308_v4, %v4307_v59  ;;  %v4349_v27 = vadd.f32 %v4348_v44, %v4347_v40  ;;  %v4310_v54 = vpop.f32.mrb[62].mxu0  ;;  %v4350_v41 = vpop.f32.mrb[54].mxu1 }
 0x5bb   : > { %v4311_v60 = vpop.f32.mrb[63].mxu0  ;;  %v4351_v61 = vpop.f32.mrb[55].mxu1 }
 0x5bc   : > { %v5142_v63 = vpop.eup %5141  ;;  %5151 = vpow2.f32 %v4158_v19  ;;  %v3678_v7 = vadd.f32 %v4309_v50, %v6447_v35  ;;  %v4312_v24 = vadd.f32 %v4311_v60, %v4310_v54  ;;  %v4352_v25 = vadd.f32 %v4351_v61, %v4350_v41 }
 0x5bd   : > { %v3778_v55 = vadd.f32 1.0, %v5142_v63 }
 0x5be   : > { %v5144_v53 = vpop.eup %5143  ;;  %v3743_v62 = vadd.f32 %v4349_v27, %v3678_v7  ;;  %v3681_v36 = vadd.f32 %v4312_v24, %v6447_v35 }
 0x5bf   : > { %5153 = vrcp.f32 %v3778_v55  ;;  %v3779_v14 = vadd.f32 1.0, %v5144_v53 }
 0x5c0   : > { %v4159_v8 = vmul.f32 -1.442695, %v3743_v62  ;;  %v3746_v10 = vadd.f32 %v4352_v25, %v3681_v36 }
 0x5c1   : > { %v5146_v1 = vpop.eup %5145  ;;  %5155 = vrcp.f32 %v3779_v14 }
 0x5c2   : > { %v3800_v11 = vsel %vm3751_vm10, %v5146_v1, %v6450_v16  ;;  %5157 = vpow2.f32 %v4159_v8  ;;  %v4160_v6 = vmul.f32 -1.442695, %v3746_v10 }
 0x5c3   : > { %v5148_v26 = vpop.eup %5147  ;;  %3808 = vst [vmem:[%s6485_s23] sm:$0xff] %v3800_v11 }
 0x5c4   : > { %v5150_v35 = vpop.eup %5149  ;;  %v3801_v42 = vsel %vm3751_vm10, %v5148_v26, %v6454_v21  ;;  %5159 = vpow2.f32 %v4160_v6 }
 0x5c5   : > { %3809 = vst [vmem:[%s6485_s23 + $0x8] sm:$0xff] %v3801_v42  ;;  %v3780_v33 = vadd.f32 1.0, %v5150_v35 }
 0x5c6   : > { %v5152_v56 = vpop.eup %5151 }
 0x5c7   : > { %5161 = vrcp.f32 %v3780_v33  ;;  %v3781_v16 = vadd.f32 1.0, %v5152_v56 }
 0x5c9   : > { %v5154_v30 = vpop.eup %5153  ;;  %5163 = vrcp.f32 %v3781_v16 }
 0x5ca   : > { %v3802_v52 = vsel %vm3751_vm10, %v5154_v30, %v6458_v49 }
 0x5cb   : > { %v5156_v58 = vpop.eup %5155  ;;  %3810 = vst [vmem:[%s6485_s23 + $0x10] sm:$0xff] %v3802_v52 }
 0x5cc   : > { %v5158_v12 = vpop.eup %5157  ;;  %v3803_v21 = vsel %vm3751_vm10, %v5156_v58, %v6462_v15 }
 0x5cd   : > { %3811 = vst [vmem:[%s6485_s23 + $0x18] sm:$0xff] %v3803_v21  ;;  %v3782_v29 = vadd.f32 1.0, %v5158_v12 }
 0x5ce   : > { %v5160_v45 = vpop.eup %5159 }
 0x5cf   : > { %5165 = vrcp.f32 %v3782_v29  ;;  %v3783_v28 = vadd.f32 1.0, %v5160_v45 }
 0x5d1   : > { %v5162_v3 = vpop.eup %5161  ;;  %5167 = vrcp.f32 %v3783_v28 }
 0x5d2   : > { %v3804_v49 = vsel %vm3751_vm10, %v5162_v3, %v6466_v5 }
 0x5d3   : > { %v5164_v17 = vpop.eup %5163  ;;  %3812 = vst [vmem:[%s6485_s23 + $0x20] sm:$0xff] %v3804_v49 }
 0x5d4   : > { %v3805_v15 = vsel %vm3751_vm10, %v5164_v17, %v6470_v57 }
 0x5d5   : > { %3813 = vst [vmem:[%s6485_s23 + $0x28] sm:$0xff] %v3805_v15 }
 0x5d9   : > { %v5166_v18 = vpop.eup %5165 }
 0x5da   : > { %v3806_v23 = vsel %vm3751_vm10, %v5166_v18, %v3743_v62 }
 0x5db   : > { %v5168_v51 = vpop.eup %5167  ;;  %3814 = vst [vmem:[%s6485_s23 + $0x30] sm:$0xff] %v3806_v23 }
 0x5dc   : > { %v3807_v0 = vsel %vm3751_vm10, %v5168_v51, %v3746_v10 }
 0x5dd   : > { %3815 = vst [vmem:[%s6485_s23 + $0x38] sm:$0xff] %v3807_v0 }
 0x5de   : > { %5210 = shalt.err (!%p5207_p7)
}
 0x5df   : > { %s5211_s26 = scalar_lea.hbm %s6515_s14, 1024  ;;  %s5215_s27 = scalar_lea.hbm %s6575_s9, 2048 }
 0x5e0   : > { %p5212_p8 = scmp.ne.s32.totalorder %s6515_s14, %s5211_s26  ;;  %p5216_p1 = scmp.lt.u32.totalorder %s6515_s14, %s6575_s9 }
 0x5e1   : > { %p5217_p0 = scmp.lt.u32.totalorder %s5215_s27, %s5211_s26  ;;  %p5219_p6 = scmp.lt.u32.totalorder %s5211_s26, %s6515_s14 }
 0x5e2   : > { %p5213_p11 = pnand %p5212_p8, %p6592_p9 }
 0x5e3   : > { %p5218_p5 = por %p5217_p0, %p5216_p1 }
 0x5e4   : > { %p5214_p13 = pneg %p5213_p11 }
 0x5e5   : > { %p5220_p10 = por %p5219_p6, %p5218_p5 }
 0x5e7   : > { %p5221_p12 = pnand %p5220_p10, %p5214_p13 }
 0x5e9   : > { %5224 = shalt.err (!%p5221_p12)
}
 0x5ea   : > { %s5278_s22 = smov 128   ;;  %s5279_s25 = smov 8  }
 0x5eb   : > { %4465 = dma.vmem_to_hbm [thread:$0]  (%p6592_p9), %s6517_s29, 1024, %s6515_s14, %s6525_s13, %s5278_s22, %s5278_s22, %s5279_s25  }
 0x5ec PF: > { %p4477_p2 = scmp.ge.s32.totalorder %s5263_s12, 2  ;;  %s3845_s17 = sand.u32 1, %s5251_s30  }
 0x5ed   : > { %p6593_p3 = scmp.ne.s32.totalorder %s6584_s20, 0  ;;  %s3846_s28 = scalar_lea.sflag [#allocation4], %s3845_s17 }
 0x5ef   : > { %p4472_p4 = pnand %p4477_p2, %p6593_p3 }
 0x5f1   : > { %5246 = dma.done.wait (!%p4472_p4), %s3846_s28, 1024  }
 0x5f2   : > { %5248 = vsyncadd (!%p4472_p4), %s3846_s28, 4294966272  ;;  %p20_p7 = scmp.ge.s32.totalorder %s5355_s15, 4   ;;  %s6594_s30 = smov %s5255_s10 }
 0x5f3   : > { %s6595_s10 = smov %s5259_s11  ;;  %s6596_s11 = smov %s5366_s18 }
 0x5f4   : > { %s6597_s12 = smov %s5355_s15  ;;  %22 = sbr.rel (!%p20_p7) target bundleno = 4 (0x4), region = 96 }
 0x5fb   :  { %3851 = vsyncpa [#allocation3], 1 }
 0x5fc   :  { %3853 = vsyncpa [#allocation3 + $0x1], 1 }
 0x5fd   :  { %3854 = vsyncpa [#allocation4], 1 }
 0x5fe   :  { %3856 = vsyncpa [#allocation4 + $0x1], 1 }

</bundles_post_ra>
